<compile_context>
chip_gen: v5e
topology: v5e:2x2
jax: 0.10.0
libtpu: 0.0.40
codegen_flags: <defaults>
</compile_context>

<pallas_src>
import numpy as np
import jax
import jax.numpy as jnp
from jax.experimental import pallas as pl
from jax.experimental.pallas import tpu as pltpu

KSIZE = 7
PAD = KSIZE // 2
BN_EPS = 1e-5


def _build_weighted_masks(conv_w, H, W):
    """Per-tap 7x7 weight planes with the zero-padding boundary mask folded in.

    conv_w: (1, 2, KSIZE, KSIZE) spatial conv weight (BatchNorm already folded).
    Returns (2*KSIZE*KSIZE, H*W) float32:
      row t              -> tap t applied to the channel-mean map,
      row KSIZE*KSIZE+t  -> tap t applied to the channel-max map.
    """
    k2 = KSIZE * KSIZE
    ii = np.arange(H)[:, None]
    jj = np.arange(W)[None, :]
    valid = np.zeros((k2, H * W), np.float32)
    t = 0
    for dh in range(KSIZE):
        for dw in range(KSIZE):
            m = ((ii + dh - PAD >= 0) & (ii + dh - PAD < H)
                 & (jj + dw - PAD >= 0) & (jj + dw - PAD < W))
            valid[t] = m.astype(np.float32).reshape(-1)
            t += 1
    w_flat = jnp.asarray(conv_w, jnp.float32).reshape(2, k2)      # (2, 49)
    wm = w_flat[:, :, None] * jnp.asarray(valid)[None, :, :]      # (2, 49, HW)
    return wm.reshape(2 * k2, H * W)


def _choose_batch_tile(B, C, HW, itemsize, max_block_bytes=4 * 1024 * 1024):
    """Largest batch tile whose input block stays under max_block_bytes while
    keeping >= 2 grid steps (v7x dual TensorCore) whenever B allows it."""
    per_b = max(1, C * HW * itemsize)
    cap = max(1, max_block_bytes // per_b)
    bt = 1
    for cand in range(1, B + 1):
        if B % cand == 0 and cand <= cap:
            bt = cand
    if bt == B and B > 1:
        for cand in range(B // 2, 0, -1):
            if B % cand == 0 and cand <= cap:
                return cand
    return bt


def _make_kernel(width):
    """Kernel closure; `width` (W) turns (dh, dw) taps into flat H*W offsets."""
    k2 = KSIZE * KSIZE

    def kernel(x_ref, w1_ref, b1_ref, w2_ref, b2_ref, wm_ref, scal_ref, o_ref,
               avg_ref, max_ref, sa_ref):
        bt, c, hw = x_ref.shape
        inv_hw = 1.0 / hw
        inv_c = 1.0 / c
        conv_bias = scal_ref[0]
        gamma = scal_ref[1]

        # ---- channel attention + channel mean/max of the CA-scaled features.
        # Per-sample matvecs keep C on the sublane axis so every broadcast below
        # is a cheap unit-dim stretch (no lane<->sublane relayouts).
        ca_cols = []
        for b in range(bt):                                        # static unroll
            xb = x_ref[b].astype(jnp.float32)                      # (C, HW)
            pooled = jnp.sum(xb, axis=1, keepdims=True) * inv_hw   # (C, 1)
            hid = jnp.dot(w1_ref[...], pooled,
                          preferred_element_type=jnp.float32) + b1_ref[...]
            hid = jnp.maximum(hid, 0.0)                            # (Cr, 1)
            cab = jax.nn.sigmoid(
                jnp.dot(w2_ref[...], hid,
                        preferred_element_type=jnp.float32) + b2_ref[...])  # (C, 1)
            ca_cols.append(cab)
            xcab = xb * cab                                        # (C, HW)
            avg_ref[pl.ds(b, 1), :] = jnp.sum(xcab, axis=0, keepdims=True) * inv_c
            max_ref[pl.ds(b, 1), :] = jnp.max(xcab, axis=0, keepdims=True)

        # ---- 7x7 conv (BN folded) + sigmoid, batched over the Bt tile.
        # Each tap is a lane-roll of the flattened H*W axis (XLU) times a
        # host-precomputed weight plane that already carries the zero-padding
        # boundary mask -> no misaligned slices, no padded scratch to zero.
        avg = avg_ref[...]                                         # (Bt, HW)
        mx = max_ref[...]                                          # (Bt, HW)
        acc = jnp.zeros((bt, hw), jnp.float32) + conv_bias
        t = 0
        for dh in range(KSIZE):
            for dw in range(KSIZE):
                off = (dh - PAD) * width + (dw - PAD)
                s = (-off) % hw
                r_avg = pltpu.roll(avg, s, 1) if s else avg
                r_max = pltpu.roll(mx, s, 1) if s else mx
                acc = (acc + wm_ref[pl.ds(t, 1), :] * r_avg
                       + wm_ref[pl.ds(k2 + t, 1), :] * r_max)
                t += 1
        sa_ref[...] = jax.nn.sigmoid(acc)                          # (Bt, HW)

        # ---- fused residual gate: out = x * ((1-gamma) + gamma * ca * sa)
        one_minus_gamma = 1.0 - gamma
        for b in range(bt):
            gate = one_minus_gamma + (gamma * ca_cols[b]) * sa_ref[pl.ds(b, 1), :]
            o_ref[b] = (x_ref[b].astype(jnp.float32) * gate).astype(o_ref.dtype)

    return kernel


def lite_hybrid_attention(x, params):
    B, C, H, W = x.shape
    HW = H * W
    k2 = KSIZE * KSIZE

    w1 = jnp.asarray(params["w1"], jnp.float32)                   # (Cr, C)
    b1 = jnp.asarray(params["b1"], jnp.float32).reshape(-1, 1)    # (Cr, 1)
    w2 = jnp.asarray(params["w2"], jnp.float32)                   # (C, Cr)
    b2 = jnp.asarray(params["b2"], jnp.float32).reshape(-1, 1)    # (C, 1)
    Cr = w1.shape[0]
    wm = _build_weighted_masks(params["conv_w"], H, W)            # (98, HW)
    scal = jnp.stack([jnp.asarray(params["conv_b"], jnp.float32).reshape(()),
                      jnp.asarray(params["gamma"], jnp.float32).reshape(())])

    itemsize = x.dtype.itemsize
    bt = _choose_batch_tile(B, C, HW, itemsize)
    grid = (B // bt,)
    x_flat = x.reshape(B, C, HW)        # lane-dense: H*W on the lane axis (free reshape)

    block_bytes = bt * C * HW * itemsize
    vmem_limit = int(min(32 * 1024 * 1024,                        # fits v5e/v6e/v7x
                         max(16 * 1024 * 1024, 8 * block_bytes)))

    out_flat = pl.pallas_call(
        _make_kernel(W),
        out_shape=jax.ShapeDtypeStruct((B, C, HW), x.dtype),
        grid_spec=pltpu.PrefetchScalarGridSpec(
            num_scalar_prefetch=0,
            grid=grid,
            in_specs=[
                pl.BlockSpec((bt, C, HW), lambda b: (b, 0, 0)),       # x
                pl.BlockSpec((Cr, C), lambda b: (0, 0)),              # w1 (C -> C/r)
                pl.BlockSpec((Cr, 1), lambda b: (0, 0)),              # b1
                pl.BlockSpec((C, Cr), lambda b: (0, 0)),              # w2 (C/r -> C)
                pl.BlockSpec((C, 1), lambda b: (0, 0)),               # b2
                pl.BlockSpec((2 * k2, HW), lambda b: (0, 0)),         # masked 7x7 tap planes
                pl.BlockSpec(memory_space=pltpu.MemorySpace.SMEM),    # [conv_bias, gamma]
            ],
            out_specs=pl.BlockSpec((bt, C, HW), lambda b: (b, 0, 0)),
            scratch_shapes=[pltpu.VMEM((bt, HW), jnp.float32),        # channel-mean map
                            pltpu.VMEM((bt, HW), jnp.float32),        # channel-max map
                            pltpu.VMEM((bt, HW), jnp.float32)],       # spatial attention
        ),
        compiler_params=pltpu.CompilerParams(
            dimension_semantics=("parallel",),
            vmem_limit_bytes=vmem_limit,
        ),
    )(x_flat, w1, b1, w2, b2, wm, scal)
    return out_flat.reshape(B, C, H, W)


if __name__ == "__main__":
    B, C, H, W = 8, 32, 16, 16
    reduction = 8
    Cr = C // reduction

    key = jax.random.PRNGKey(0)
    kx, k1, k2, k3 = jax.random.split(key, 4)

    x = jax.random.normal(kx, (B, C, H, W), jnp.float32)

    # Deterministic synthetic weights (shapes follow the PyTorch __init__):
    # kaiming-normal (fan_out) scaling for convs, zero biases (as _init_weights).
    w1 = jax.random.normal(k1, (Cr, C), jnp.float32) * np.sqrt(2.0 / Cr)
    b1 = jnp.zeros((Cr,), jnp.float32)
    w2 = jax.random.normal(k2, (C, Cr), jnp.float32) * np.sqrt(2.0 / C)
    b2 = jnp.zeros((C,), jnp.float32)
    sw = jax.random.normal(k3, (1, 2, KSIZE, KSIZE), jnp.float32) * np.sqrt(2.0 / (KSIZE * KSIZE))
    sb = jnp.zeros((1,), jnp.float32)

    # BatchNorm2d(1) folded in eval mode (weight=1, bias=0, running stats 0/1).
    # TODO(synk): train-mode (batch-statistics) BatchNorm is not reproduced.
    bn_scale = 1.0 / np.sqrt(1.0 + BN_EPS)
    sw_eff = sw * bn_scale
    sb_eff = sb * bn_scale

    # Module inits gamma = 0 (pure identity); use 0.5 so the attention path is exercised.
    gamma = 0.5

    params = dict(w1=w1, b1=b1, w2=w2, b2=b2,
                  conv_w=sw_eff, conv_b=sb_eff[0], gamma=gamma)

    out = jax.block_until_ready(lite_hybrid_attention(x, params))

    # Pure-JAX reference for verification.
    pooled = jnp.mean(x, axis=(2, 3))                                 # (B, C)
    hid = jnp.maximum(pooled @ w1.T + b1, 0.0)
    ca = jax.nn.sigmoid(hid @ w2.T + b2)
    x1 = x * ca[:, :, None, None]
    avg_o = jnp.mean(x1, axis=1, keepdims=True)
    max_o = jnp.max(x1, axis=1, keepdims=True)
    conv = jax.lax.conv_general_dilated(
        jnp.concatenate([avg_o, max_o], axis=1), sw_eff,
        window_strides=(1, 1), padding=((PAD, PAD), (PAD, PAD)),
        dimension_numbers=("NCHW", "OIHW", "NCHW")) + sb_eff[0]
    sa = jax.nn.sigmoid(conv)
    x2 = x1 * sa
    ref = x + gamma * (x2 - x)

    err = float(np.max(np.abs(np.asarray(out) - np.asarray(ref))))
    assert np.allclose(np.asarray(out), np.asarray(ref), atol=5e-4, rtol=2e-3), err
    print("KERNEL_OK")
</pallas_src>

<mosaic_0001>
module attributes {stable_mosaic.version = 11 : i64} {
  func.func @kernel(%arg0: i32, %arg1: memref<4x32x256xf32, #tpu.memory_space<vmem>>, %arg2: memref<4x32xf32, #tpu.memory_space<vmem>>, %arg3: memref<4x1xf32, #tpu.memory_space<vmem>>, %arg4: memref<32x4xf32, #tpu.memory_space<vmem>>, %arg5: memref<32x1xf32, #tpu.memory_space<vmem>>, %arg6: memref<98x256xf32, #tpu.memory_space<vmem>>, %arg7: memref<2xf32, #tpu.memory_space<smem>>, %arg8: memref<4x32x256xf32, #tpu.memory_space<vmem>>, %arg9: memref<4x256xf32, #tpu.memory_space<vmem>>, %arg10: memref<4x256xf32, #tpu.memory_space<vmem>>, %arg11: memref<4x256xf32, #tpu.memory_space<vmem>>) attributes {dimension_semantics = [#tpu.dimension_semantics<parallel>], iteration_bounds = array<i64: 2>, scalar_prefetch = 0 : i64, scratch_operands = 3 : i64, tpu.core_type = #tpu.core_type<tc>, window_params = [{transform_indices = @transform_0, window_bounds = array<i64: 4, 32, 256>}, {pipeline_mode = #tpu.pipeline_mode<synchronous>, transform_indices = @transform_1, window_bounds = array<i64: 4, 32>}, {pipeline_mode = #tpu.pipeline_mode<synchronous>, transform_indices = @transform_2, window_bounds = array<i64: 4, 1>}, {pipeline_mode = #tpu.pipeline_mode<synchronous>, transform_indices = @transform_3, window_bounds = array<i64: 32, 4>}, {pipeline_mode = #tpu.pipeline_mode<synchronous>, transform_indices = @transform_4, window_bounds = array<i64: 32, 1>}, {pipeline_mode = #tpu.pipeline_mode<synchronous>, transform_indices = @transform_5, window_bounds = array<i64: 98, 256>}, {transform_indices = @transform_6, window_bounds = array<i64: 2>}, {transform_indices = @transform_7, window_bounds = array<i64: 4, 32, 256>}]} {
    %c0 = arith.constant 0 : index
    %0 = memref.load %arg7[%c0] : memref<2xf32, #tpu.memory_space<smem>>
    %c1 = arith.constant 1 : index
    %1 = memref.load %arg7[%c1] : memref<2xf32, #tpu.memory_space<smem>>
    %c0_0 = arith.constant 0 : index
    %c0_1 = arith.constant 0 : index
    %c0_2 = arith.constant 0 : index
    %2 = vector.load %arg1[%c0_0, %c0_1, %c0_2] : memref<4x32x256xf32, #tpu.memory_space<vmem>>, vector<1x32x256xf32>
    %3 = vector.shape_cast %2 : vector<1x32x256xf32> to vector<32x256xf32>
    %cst = arith.constant dense<0.000000e+00> : vector<32xf32>
    %4 = vector.multi_reduction <add>, %3, %cst [1] : vector<32x256xf32> to vector<32xf32>
    %5 = vector.shape_cast %4 : vector<32xf32> to vector<32x1xf32>
    %cst_3 = arith.constant 3.906250e-03 : f32
    %6 = vector.broadcast %cst_3 : f32 to vector<32x1xf32>
    %7 = arith.mulf %5, %6 : vector<32x1xf32>
    %c0_4 = arith.constant 0 : index
    %c0_5 = arith.constant 0 : index
    %8 = vector.load %arg2[%c0_4, %c0_5] : memref<4x32xf32, #tpu.memory_space<vmem>>, vector<4x32xf32>
    %cst_6 = arith.constant dense<0.000000e+00> : vector<4x1xf32>
    %9 = tpu.matmul %8, %7, %cst_6 {dimension_numbers = #tpu.dot_dimension_numbers<[1], [0], [0], [1], [0, 0, 1, 1], [], []>} : vector<4x32xf32>, vector<32x1xf32>, vector<4x1xf32> -> vector<4x1xf32>
    %c0_7 = arith.constant 0 : index
    %c0_8 = arith.constant 0 : index
    %10 = vector.load %arg3[%c0_7, %c0_8] : memref<4x1xf32, #tpu.memory_space<vmem>>, vector<4x1xf32>
    %11 = arith.addf %9, %10 : vector<4x1xf32>
    %cst_9 = arith.constant 0.000000e+00 : f32
    %12 = vector.broadcast %cst_9 : f32 to vector<4x1xf32>
    %13 = arith.maximumf %11, %12 : vector<4x1xf32>
    %c0_10 = arith.constant 0 : index
    %c0_11 = arith.constant 0 : index
    %14 = vector.load %arg4[%c0_10, %c0_11] : memref<32x4xf32, #tpu.memory_space<vmem>>, vector<32x4xf32>
    %cst_12 = arith.constant dense<0.000000e+00> : vector<32x1xf32>
    %15 = tpu.matmul %14, %13, %cst_12 {dimension_numbers = #tpu.dot_dimension_numbers<[1], [0], [0], [1], [0, 0, 1, 1], [], []>} : vector<32x4xf32>, vector<4x1xf32>, vector<32x1xf32> -> vector<32x1xf32>
    %c0_13 = arith.constant 0 : index
    %c0_14 = arith.constant 0 : index
    %16 = vector.load %arg5[%c0_13, %c0_14] : memref<32x1xf32, #tpu.memory_space<vmem>>, vector<32x1xf32>
    %17 = arith.addf %15, %16 : vector<32x1xf32>
    %18 = arith.negf %17 : vector<32x1xf32>
    %19 = math.exp %18 : vector<32x1xf32>
    %cst_15 = arith.constant 1.000000e+00 : f32
    %20 = vector.broadcast %cst_15 : f32 to vector<32x1xf32>
    %21 = arith.addf %20, %19 : vector<32x1xf32>
    %22 = arith.divf %20, %21 : vector<32x1xf32>
    %23 = vector.broadcast %22 : vector<32x1xf32> to vector<32x256xf32>
    %24 = arith.mulf %3, %23 : vector<32x256xf32>
    %cst_16 = arith.constant dense<0.000000e+00> : vector<256xf32>
    %25 = vector.multi_reduction <add>, %24, %cst_16 [0] : vector<32x256xf32> to vector<256xf32>
    %26 = vector.shape_cast %25 : vector<256xf32> to vector<1x256xf32>
    %cst_17 = arith.constant 3.125000e-02 : f32
    %27 = vector.broadcast %cst_17 : f32 to vector<1x256xf32>
    %28 = arith.mulf %26, %27 : vector<1x256xf32>
    %c0_18 = arith.constant 0 : index
    %c0_19 = arith.constant 0 : index
    %29 = vector.load %arg9[%c0_18, %c0_19] : memref<4x256xf32, #tpu.memory_space<vmem>>, vector<1x256xf32>
    tpu.vector_store %arg9[%c0_18, %c0_19], %28 {strides = array<i32>} : memref<4x256xf32, #tpu.memory_space<vmem>>, vector<1x256xf32>,
    %cst_20 = arith.constant dense<0xFF800000> : vector<256xf32>
    %30 = vector.multi_reduction <maximumf>, %24, %cst_20 [0] : vector<32x256xf32> to vector<256xf32>
    %31 = vector.shape_cast %30 : vector<256xf32> to vector<1x256xf32>
    %c0_21 = arith.constant 0 : index
    %c0_22 = arith.constant 0 : index
    %32 = vector.load %arg10[%c0_21, %c0_22] : memref<4x256xf32, #tpu.memory_space<vmem>>, vector<1x256xf32>
    tpu.vector_store %arg10[%c0_21, %c0_22], %31 {strides = array<i32>} : memref<4x256xf32, #tpu.memory_space<vmem>>, vector<1x256xf32>,
    %c1_23 = arith.constant 1 : index
    %c0_24 = arith.constant 0 : index
    %c0_25 = arith.constant 0 : index
    %33 = vector.load %arg1[%c1_23, %c0_24, %c0_25] : memref<4x32x256xf32, #tpu.memory_space<vmem>>, vector<1x32x256xf32>
    %34 = vector.shape_cast %33 : vector<1x32x256xf32> to vector<32x256xf32>
    %cst_26 = arith.constant dense<0.000000e+00> : vector<32xf32>
    %35 = vector.multi_reduction <add>, %34, %cst_26 [1] : vector<32x256xf32> to vector<32xf32>
    %36 = vector.shape_cast %35 : vector<32xf32> to vector<32x1xf32>
    %cst_27 = arith.constant 3.906250e-03 : f32
    %37 = vector.broadcast %cst_27 : f32 to vector<32x1xf32>
    %38 = arith.mulf %36, %37 : vector<32x1xf32>
    %c0_28 = arith.constant 0 : index
    %c0_29 = arith.constant 0 : index
    %39 = vector.load %arg2[%c0_28, %c0_29] : memref<4x32xf32, #tpu.memory_space<vmem>>, vector<4x32xf32>
    %cst_30 = arith.constant dense<0.000000e+00> : vector<4x1xf32>
    %40 = tpu.matmul %39, %38, %cst_30 {dimension_numbers = #tpu.dot_dimension_numbers<[1], [0], [0], [1], [0, 0, 1, 1], [], []>} : vector<4x32xf32>, vector<32x1xf32>, vector<4x1xf32> -> vector<4x1xf32>
    %c0_31 = arith.constant 0 : index
    %c0_32 = arith.constant 0 : index
    %41 = vector.load %arg3[%c0_31, %c0_32] : memref<4x1xf32, #tpu.memory_space<vmem>>, vector<4x1xf32>
    %42 = arith.addf %40, %41 : vector<4x1xf32>
    %cst_33 = arith.constant 0.000000e+00 : f32
    %43 = vector.broadcast %cst_33 : f32 to vector<4x1xf32>
    %44 = arith.maximumf %42, %43 : vector<4x1xf32>
    %c0_34 = arith.constant 0 : index
    %c0_35 = arith.constant 0 : index
    %45 = vector.load %arg4[%c0_34, %c0_35] : memref<32x4xf32, #tpu.memory_space<vmem>>, vector<32x4xf32>
    %cst_36 = arith.constant dense<0.000000e+00> : vector<32x1xf32>
    %46 = tpu.matmul %45, %44, %cst_36 {dimension_numbers = #tpu.dot_dimension_numbers<[1], [0], [0], [1], [0, 0, 1, 1], [], []>} : vector<32x4xf32>, vector<4x1xf32>, vector<32x1xf32> -> vector<32x1xf32>
    %c0_37 = arith.constant 0 : index
    %c0_38 = arith.constant 0 : index
    %47 = vector.load %arg5[%c0_37, %c0_38] : memref<32x1xf32, #tpu.memory_space<vmem>>, vector<32x1xf32>
    %48 = arith.addf %46, %47 : vector<32x1xf32>
    %49 = arith.negf %48 : vector<32x1xf32>
    %50 = math.exp %49 : vector<32x1xf32>
    %cst_39 = arith.constant 1.000000e+00 : f32
    %51 = vector.broadcast %cst_39 : f32 to vector<32x1xf32>
    %52 = arith.addf %51, %50 : vector<32x1xf32>
    %53 = arith.divf %51, %52 : vector<32x1xf32>
    %54 = vector.broadcast %53 : vector<32x1xf32> to vector<32x256xf32>
    %55 = arith.mulf %34, %54 : vector<32x256xf32>
    %cst_40 = arith.constant dense<0.000000e+00> : vector<256xf32>
    %56 = vector.multi_reduction <add>, %55, %cst_40 [0] : vector<32x256xf32> to vector<256xf32>
    %57 = vector.shape_cast %56 : vector<256xf32> to vector<1x256xf32>
    %cst_41 = arith.constant 3.125000e-02 : f32
    %58 = vector.broadcast %cst_41 : f32 to vector<1x256xf32>
    %59 = arith.mulf %57, %58 : vector<1x256xf32>
    %c1_42 = arith.constant 1 : index
    %c0_43 = arith.constant 0 : index
    %60 = vector.load %arg9[%c1_42, %c0_43] : memref<4x256xf32, #tpu.memory_space<vmem>>, vector<1x256xf32>
    tpu.vector_store %arg9[%c1_42, %c0_43], %59 {strides = array<i32>} : memref<4x256xf32, #tpu.memory_space<vmem>>, vector<1x256xf32>,
    %cst_44 = arith.constant dense<0xFF800000> : vector<256xf32>
    %61 = vector.multi_reduction <maximumf>, %55, %cst_44 [0] : vector<32x256xf32> to vector<256xf32>
    %62 = vector.shape_cast %61 : vector<256xf32> to vector<1x256xf32>
    %c1_45 = arith.constant 1 : index
    %c0_46 = arith.constant 0 : index
    %63 = vector.load %arg10[%c1_45, %c0_46] : memref<4x256xf32, #tpu.memory_space<vmem>>, vector<1x256xf32>
    tpu.vector_store %arg10[%c1_45, %c0_46], %62 {strides = array<i32>} : memref<4x256xf32, #tpu.memory_space<vmem>>, vector<1x256xf32>,
    %c2 = arith.constant 2 : index
    %c0_47 = arith.constant 0 : index
    %c0_48 = arith.constant 0 : index
    %64 = vector.load %arg1[%c2, %c0_47, %c0_48] : memref<4x32x256xf32, #tpu.memory_space<vmem>>, vector<1x32x256xf32>
    %65 = vector.shape_cast %64 : vector<1x32x256xf32> to vector<32x256xf32>
    %cst_49 = arith.constant dense<0.000000e+00> : vector<32xf32>
    %66 = vector.multi_reduction <add>, %65, %cst_49 [1] : vector<32x256xf32> to vector<32xf32>
    %67 = vector.shape_cast %66 : vector<32xf32> to vector<32x1xf32>
    %cst_50 = arith.constant 3.906250e-03 : f32
    %68 = vector.broadcast %cst_50 : f32 to vector<32x1xf32>
    %69 = arith.mulf %67, %68 : vector<32x1xf32>
    %c0_51 = arith.constant 0 : index
    %c0_52 = arith.constant 0 : index
    %70 = vector.load %arg2[%c0_51, %c0_52] : memref<4x32xf32, #tpu.memory_space<vmem>>, vector<4x32xf32>
    %cst_53 = arith.constant dense<0.000000e+00> : vector<4x1xf32>
    %71 = tpu.matmul %70, %69, %cst_53 {dimension_numbers = #tpu.dot_dimension_numbers<[1], [0], [0], [1], [0, 0, 1, 1], [], []>} : vector<4x32xf32>, vector<32x1xf32>, vector<4x1xf32> -> vector<4x1xf32>
    %c0_54 = arith.constant 0 : index
    %c0_55 = arith.constant 0 : index
    %72 = vector.load %arg3[%c0_54, %c0_55] : memref<4x1xf32, #tpu.memory_space<vmem>>, vector<4x1xf32>
    %73 = arith.addf %71, %72 : vector<4x1xf32>
    %cst_56 = arith.constant 0.000000e+00 : f32
    %74 = vector.broadcast %cst_56 : f32 to vector<4x1xf32>
    %75 = arith.maximumf %73, %74 : vector<4x1xf32>
    %c0_57 = arith.constant 0 : index
    %c0_58 = arith.constant 0 : index
    %76 = vector.load %arg4[%c0_57, %c0_58] : memref<32x4xf32, #tpu.memory_space<vmem>>, vector<32x4xf32>
    %cst_59 = arith.constant dense<0.000000e+00> : vector<32x1xf32>
    %77 = tpu.matmul %76, %75, %cst_59 {dimension_numbers = #tpu.dot_dimension_numbers<[1], [0], [0], [1], [0, 0, 1, 1], [], []>} : vector<32x4xf32>, vector<4x1xf32>, vector<32x1xf32> -> vector<32x1xf32>
    %c0_60 = arith.constant 0 : index
    %c0_61 = arith.constant 0 : index
    %78 = vector.load %arg5[%c0_60, %c0_61] : memref<32x1xf32, #tpu.memory_space<vmem>>, vector<32x1xf32>
    %79 = arith.addf %77, %78 : vector<32x1xf32>
    %80 = arith.negf %79 : vector<32x1xf32>
    %81 = math.exp %80 : vector<32x1xf32>
    %cst_62 = arith.constant 1.000000e+00 : f32
    %82 = vector.broadcast %cst_62 : f32 to vector<32x1xf32>
    %83 = arith.addf %82, %81 : vector<32x1xf32>
    %84 = arith.divf %82, %83 : vector<32x1xf32>
    %85 = vector.broadcast %84 : vector<32x1xf32> to vector<32x256xf32>
    %86 = arith.mulf %65, %85 : vector<32x256xf32>
    %cst_63 = arith.constant dense<0.000000e+00> : vector<256xf32>
    %87 = vector.multi_reduction <add>, %86, %cst_63 [0] : vector<32x256xf32> to vector<256xf32>
    %88 = vector.shape_cast %87 : vector<256xf32> to vector<1x256xf32>
    %cst_64 = arith.constant 3.125000e-02 : f32
    %89 = vector.broadcast %cst_64 : f32 to vector<1x256xf32>
    %90 = arith.mulf %88, %89 : vector<1x256xf32>
    %c2_65 = arith.constant 2 : index
    %c0_66 = arith.constant 0 : index
    %91 = vector.load %arg9[%c2_65, %c0_66] : memref<4x256xf32, #tpu.memory_space<vmem>>, vector<1x256xf32>
    tpu.vector_store %arg9[%c2_65, %c0_66], %90 {strides = array<i32>} : memref<4x256xf32, #tpu.memory_space<vmem>>, vector<1x256xf32>,
    %cst_67 = arith.constant dense<0xFF800000> : vector<256xf32>
    %92 = vector.multi_reduction <maximumf>, %86, %cst_67 [0] : vector<32x256xf32> to vector<256xf32>
    %93 = vector.shape_cast %92 : vector<256xf32> to vector<1x256xf32>
    %c2_68 = arith.constant 2 : index
    %c0_69 = arith.constant 0 : index
    %94 = vector.load %arg10[%c2_68, %c0_69] : memref<4x256xf32, #tpu.memory_space<vmem>>, vector<1x256xf32>
    tpu.vector_store %arg10[%c2_68, %c0_69], %93 {strides = array<i32>} : memref<4x256xf32, #tpu.memory_space<vmem>>, vector<1x256xf32>,
    %c3 = arith.constant 3 : index
    %c0_70 = arith.constant 0 : index
    %c0_71 = arith.constant 0 : index
    %95 = vector.load %arg1[%c3, %c0_70, %c0_71] : memref<4x32x256xf32, #tpu.memory_space<vmem>>, vector<1x32x256xf32>
    %96 = vector.shape_cast %95 : vector<1x32x256xf32> to vector<32x256xf32>
    %cst_72 = arith.constant dense<0.000000e+00> : vector<32xf32>
    %97 = vector.multi_reduction <add>, %96, %cst_72 [1] : vector<32x256xf32> to vector<32xf32>
    %98 = vector.shape_cast %97 : vector<32xf32> to vector<32x1xf32>
    %cst_73 = arith.constant 3.906250e-03 : f32
    %99 = vector.broadcast %cst_73 : f32 to vector<32x1xf32>
    %100 = arith.mulf %98, %99 : vector<32x1xf32>
    %c0_74 = arith.constant 0 : index
    %c0_75 = arith.constant 0 : index
    %101 = vector.load %arg2[%c0_74, %c0_75] : memref<4x32xf32, #tpu.memory_space<vmem>>, vector<4x32xf32>
    %cst_76 = arith.constant dense<0.000000e+00> : vector<4x1xf32>
    %102 = tpu.matmul %101, %100, %cst_76 {dimension_numbers = #tpu.dot_dimension_numbers<[1], [0], [0], [1], [0, 0, 1, 1], [], []>} : vector<4x32xf32>, vector<32x1xf32>, vector<4x1xf32> -> vector<4x1xf32>
    %c0_77 = arith.constant 0 : index
    %c0_78 = arith.constant 0 : index
    %103 = vector.load %arg3[%c0_77, %c0_78] : memref<4x1xf32, #tpu.memory_space<vmem>>, vector<4x1xf32>
    %104 = arith.addf %102, %103 : vector<4x1xf32>
    %cst_79 = arith.constant 0.000000e+00 : f32
    %105 = vector.broadcast %cst_79 : f32 to vector<4x1xf32>
    %106 = arith.maximumf %104, %105 : vector<4x1xf32>
    %c0_80 = arith.constant 0 : index
    %c0_81 = arith.constant 0 : index
    %107 = vector.load %arg4[%c0_80, %c0_81] : memref<32x4xf32, #tpu.memory_space<vmem>>, vector<32x4xf32>
    %cst_82 = arith.constant dense<0.000000e+00> : vector<32x1xf32>
    %108 = tpu.matmul %107, %106, %cst_82 {dimension_numbers = #tpu.dot_dimension_numbers<[1], [0], [0], [1], [0, 0, 1, 1], [], []>} : vector<32x4xf32>, vector<4x1xf32>, vector<32x1xf32> -> vector<32x1xf32>
    %c0_83 = arith.constant 0 : index
    %c0_84 = arith.constant 0 : index
    %109 = vector.load %arg5[%c0_83, %c0_84] : memref<32x1xf32, #tpu.memory_space<vmem>>, vector<32x1xf32>
    %110 = arith.addf %108, %109 : vector<32x1xf32>
    %111 = arith.negf %110 : vector<32x1xf32>
    %112 = math.exp %111 : vector<32x1xf32>
    %cst_85 = arith.constant 1.000000e+00 : f32
    %113 = vector.broadcast %cst_85 : f32 to vector<32x1xf32>
    %114 = arith.addf %113, %112 : vector<32x1xf32>
    %115 = arith.divf %113, %114 : vector<32x1xf32>
    %116 = vector.broadcast %115 : vector<32x1xf32> to vector<32x256xf32>
    %117 = arith.mulf %96, %116 : vector<32x256xf32>
    %cst_86 = arith.constant dense<0.000000e+00> : vector<256xf32>
    %118 = vector.multi_reduction <add>, %117, %cst_86 [0] : vector<32x256xf32> to vector<256xf32>
    %119 = vector.shape_cast %118 : vector<256xf32> to vector<1x256xf32>
    %cst_87 = arith.constant 3.125000e-02 : f32
    %120 = vector.broadcast %cst_87 : f32 to vector<1x256xf32>
    %121 = arith.mulf %119, %120 : vector<1x256xf32>
    %c3_88 = arith.constant 3 : index
    %c0_89 = arith.constant 0 : index
    %122 = vector.load %arg9[%c3_88, %c0_89] : memref<4x256xf32, #tpu.memory_space<vmem>>, vector<1x256xf32>
    tpu.vector_store %arg9[%c3_88, %c0_89], %121 {strides = array<i32>} : memref<4x256xf32, #tpu.memory_space<vmem>>, vector<1x256xf32>,
    %cst_90 = arith.constant dense<0xFF800000> : vector<256xf32>
    %123 = vector.multi_reduction <maximumf>, %117, %cst_90 [0] : vector<32x256xf32> to vector<256xf32>
    %124 = vector.shape_cast %123 : vector<256xf32> to vector<1x256xf32>
    %c3_91 = arith.constant 3 : index
    %c0_92 = arith.constant 0 : index
    %125 = vector.load %arg10[%c3_91, %c0_92] : memref<4x256xf32, #tpu.memory_space<vmem>>, vector<1x256xf32>
    tpu.vector_store %arg10[%c3_91, %c0_92], %124 {strides = array<i32>} : memref<4x256xf32, #tpu.memory_space<vmem>>, vector<1x256xf32>,
    %c0_93 = arith.constant 0 : index
    %c0_94 = arith.constant 0 : index
    %126 = vector.load %arg9[%c0_93, %c0_94] : memref<4x256xf32, #tpu.memory_space<vmem>>, vector<4x256xf32>
    %c0_95 = arith.constant 0 : index
    %c0_96 = arith.constant 0 : index
    %127 = vector.load %arg10[%c0_95, %c0_96] : memref<4x256xf32, #tpu.memory_space<vmem>>, vector<4x256xf32>
    %cst_97 = arith.constant 0.000000e+00 : f32
    %128 = vector.broadcast %cst_97 : f32 to vector<4x256xf32>
    %129 = vector.broadcast %0 : f32 to vector<4x256xf32>
    %130 = arith.addf %128, %129 : vector<4x256xf32>
    %c51_i32 = arith.constant 51 : i32
    %131 = tpu.dynamic_rotate %126 by %c51_i32 dim 1 : vector<4x256xf32>, i32 -> vector<4x256xf32>
    %c51_i32_98 = arith.constant 51 : i32
    %132 = tpu.dynamic_rotate %127 by %c51_i32_98 dim 1 : vector<4x256xf32>, i32 -> vector<4x256xf32>
    %c0_99 = arith.constant 0 : index
    %c0_100 = arith.constant 0 : index
    %133 = vector.load %arg6[%c0_99, %c0_100] : memref<98x256xf32, #tpu.memory_space<vmem>>, vector<1x256xf32>
    %134 = vector.broadcast %133 : vector<1x256xf32> to vector<4x256xf32>
    %135 = arith.mulf %134, %131 : vector<4x256xf32>
    %136 = arith.addf %130, %135 : vector<4x256xf32>
    %c49 = arith.constant 49 : index
    %c0_101 = arith.constant 0 : index
    %137 = vector.load %arg6[%c49, %c0_101] : memref<98x256xf32, #tpu.memory_space<vmem>>, vector<1x256xf32>
    %138 = vector.broadcast %137 : vector<1x256xf32> to vector<4x256xf32>
    %139 = arith.mulf %138, %132 : vector<4x256xf32>
    %140 = arith.addf %136, %139 : vector<4x256xf32>
    %c50_i32 = arith.constant 50 : i32
    %141 = tpu.dynamic_rotate %126 by %c50_i32 dim 1 : vector<4x256xf32>, i32 -> vector<4x256xf32>
    %c50_i32_102 = arith.constant 50 : i32
    %142 = tpu.dynamic_rotate %127 by %c50_i32_102 dim 1 : vector<4x256xf32>, i32 -> vector<4x256xf32>
    %c1_103 = arith.constant 1 : index
    %c0_104 = arith.constant 0 : index
    %143 = vector.load %arg6[%c1_103, %c0_104] : memref<98x256xf32, #tpu.memory_space<vmem>>, vector<1x256xf32>
    %144 = vector.broadcast %143 : vector<1x256xf32> to vector<4x256xf32>
    %145 = arith.mulf %144, %141 : vector<4x256xf32>
    %146 = arith.addf %140, %145 : vector<4x256xf32>
    %c50 = arith.constant 50 : index
    %c0_105 = arith.constant 0 : index
    %147 = vector.load %arg6[%c50, %c0_105] : memref<98x256xf32, #tpu.memory_space<vmem>>, vector<1x256xf32>
    %148 = vector.broadcast %147 : vector<1x256xf32> to vector<4x256xf32>
    %149 = arith.mulf %148, %142 : vector<4x256xf32>
    %150 = arith.addf %146, %149 : vector<4x256xf32>
    %c49_i32 = arith.constant 49 : i32
    %151 = tpu.dynamic_rotate %126 by %c49_i32 dim 1 : vector<4x256xf32>, i32 -> vector<4x256xf32>
    %c49_i32_106 = arith.constant 49 : i32
    %152 = tpu.dynamic_rotate %127 by %c49_i32_106 dim 1 : vector<4x256xf32>, i32 -> vector<4x256xf32>
    %c2_107 = arith.constant 2 : index
    %c0_108 = arith.constant 0 : index
    %153 = vector.load %arg6[%c2_107, %c0_108] : memref<98x256xf32, #tpu.memory_space<vmem>>, vector<1x256xf32>
    %154 = vector.broadcast %153 : vector<1x256xf32> to vector<4x256xf32>
    %155 = arith.mulf %154, %151 : vector<4x256xf32>
    %156 = arith.addf %150, %155 : vector<4x256xf32>
    %c51 = arith.constant 51 : index
    %c0_109 = arith.constant 0 : index
    %157 = vector.load %arg6[%c51, %c0_109] : memref<98x256xf32, #tpu.memory_space<vmem>>, vector<1x256xf32>
    %158 = vector.broadcast %157 : vector<1x256xf32> to vector<4x256xf32>
    %159 = arith.mulf %158, %152 : vector<4x256xf32>
    %160 = arith.addf %156, %159 : vector<4x256xf32>
    %c48_i32 = arith.constant 48 : i32
    %161 = tpu.dynamic_rotate %126 by %c48_i32 dim 1 : vector<4x256xf32>, i32 -> vector<4x256xf32>
    %c48_i32_110 = arith.constant 48 : i32
    %162 = tpu.dynamic_rotate %127 by %c48_i32_110 dim 1 : vector<4x256xf32>, i32 -> vector<4x256xf32>
    %c3_111 = arith.constant 3 : index
    %c0_112 = arith.constant 0 : index
    %163 = vector.load %arg6[%c3_111, %c0_112] : memref<98x256xf32, #tpu.memory_space<vmem>>, vector<1x256xf32>
    %164 = vector.broadcast %163 : vector<1x256xf32> to vector<4x256xf32>
    %165 = arith.mulf %164, %161 : vector<4x256xf32>
    %166 = arith.addf %160, %165 : vector<4x256xf32>
    %c52 = arith.constant 52 : index
    %c0_113 = arith.constant 0 : index
    %167 = vector.load %arg6[%c52, %c0_113] : memref<98x256xf32, #tpu.memory_space<vmem>>, vector<1x256xf32>
    %168 = vector.broadcast %167 : vector<1x256xf32> to vector<4x256xf32>
    %169 = arith.mulf %168, %162 : vector<4x256xf32>
    %170 = arith.addf %166, %169 : vector<4x256xf32>
    %c47_i32 = arith.constant 47 : i32
    %171 = tpu.dynamic_rotate %126 by %c47_i32 dim 1 : vector<4x256xf32>, i32 -> vector<4x256xf32>
    %c47_i32_114 = arith.constant 47 : i32
    %172 = tpu.dynamic_rotate %127 by %c47_i32_114 dim 1 : vector<4x256xf32>, i32 -> vector<4x256xf32>
    %c4 = arith.constant 4 : index
    %c0_115 = arith.constant 0 : index
    %173 = vector.load %arg6[%c4, %c0_115] : memref<98x256xf32, #tpu.memory_space<vmem>>, vector<1x256xf32>
    %174 = vector.broadcast %173 : vector<1x256xf32> to vector<4x256xf32>
    %175 = arith.mulf %174, %171 : vector<4x256xf32>
    %176 = arith.addf %170, %175 : vector<4x256xf32>
    %c53 = arith.constant 53 : index
    %c0_116 = arith.constant 0 : index
    %177 = vector.load %arg6[%c53, %c0_116] : memref<98x256xf32, #tpu.memory_space<vmem>>, vector<1x256xf32>
    %178 = vector.broadcast %177 : vector<1x256xf32> to vector<4x256xf32>
    %179 = arith.mulf %178, %172 : vector<4x256xf32>
    %180 = arith.addf %176, %179 : vector<4x256xf32>
    %c46_i32 = arith.constant 46 : i32
    %181 = tpu.dynamic_rotate %126 by %c46_i32 dim 1 : vector<4x256xf32>, i32 -> vector<4x256xf32>
    %c46_i32_117 = arith.constant 46 : i32
    %182 = tpu.dynamic_rotate %127 by %c46_i32_117 dim 1 : vector<4x256xf32>, i32 -> vector<4x256xf32>
    %c5 = arith.constant 5 : index
    %c0_118 = arith.constant 0 : index
    %183 = vector.load %arg6[%c5, %c0_118] : memref<98x256xf32, #tpu.memory_space<vmem>>, vector<1x256xf32>
    %184 = vector.broadcast %183 : vector<1x256xf32> to vector<4x256xf32>
    %185 = arith.mulf %184, %181 : vector<4x256xf32>
    %186 = arith.addf %180, %185 : vector<4x256xf32>
    %c54 = arith.constant 54 : index
    %c0_119 = arith.constant 0 : index
    %187 = vector.load %arg6[%c54, %c0_119] : memref<98x256xf32, #tpu.memory_space<vmem>>, vector<1x256xf32>
    %188 = vector.broadcast %187 : vector<1x256xf32> to vector<4x256xf32>
    %189 = arith.mulf %188, %182 : vector<4x256xf32>
    %190 = arith.addf %186, %189 : vector<4x256xf32>
    %c45_i32 = arith.constant 45 : i32
    %191 = tpu.dynamic_rotate %126 by %c45_i32 dim 1 : vector<4x256xf32>, i32 -> vector<4x256xf32>
    %c45_i32_120 = arith.constant 45 : i32
    %192 = tpu.dynamic_rotate %127 by %c45_i32_120 dim 1 : vector<4x256xf32>, i32 -> vector<4x256xf32>
    %c6 = arith.constant 6 : index
    %c0_121 = arith.constant 0 : index
    %193 = vector.load %arg6[%c6, %c0_121] : memref<98x256xf32, #tpu.memory_space<vmem>>, vector<1x256xf32>
    %194 = vector.broadcast %193 : vector<1x256xf32> to vector<4x256xf32>
    %195 = arith.mulf %194, %191 : vector<4x256xf32>
    %196 = arith.addf %190, %195 : vector<4x256xf32>
    %c55 = arith.constant 55 : index
    %c0_122 = arith.constant 0 : index
    %197 = vector.load %arg6[%c55, %c0_122] : memref<98x256xf32, #tpu.memory_space<vmem>>, vector<1x256xf32>
    %198 = vector.broadcast %197 : vector<1x256xf32> to vector<4x256xf32>
    %199 = arith.mulf %198, %192 : vector<4x256xf32>
    %200 = arith.addf %196, %199 : vector<4x256xf32>
    %c35_i32 = arith.constant 35 : i32
    %201 = tpu.dynamic_rotate %126 by %c35_i32 dim 1 : vector<4x256xf32>, i32 -> vector<4x256xf32>
    %c35_i32_123 = arith.constant 35 : i32
    %202 = tpu.dynamic_rotate %127 by %c35_i32_123 dim 1 : vector<4x256xf32>, i32 -> vector<4x256xf32>
    %c7 = arith.constant 7 : index
    %c0_124 = arith.constant 0 : index
    %203 = vector.load %arg6[%c7, %c0_124] : memref<98x256xf32, #tpu.memory_space<vmem>>, vector<1x256xf32>
    %204 = vector.broadcast %203 : vector<1x256xf32> to vector<4x256xf32>
    %205 = arith.mulf %204, %201 : vector<4x256xf32>
    %206 = arith.addf %200, %205 : vector<4x256xf32>
    %c56 = arith.constant 56 : index
    %c0_125 = arith.constant 0 : index
    %207 = vector.load %arg6[%c56, %c0_125] : memref<98x256xf32, #tpu.memory_space<vmem>>, vector<1x256xf32>
    %208 = vector.broadcast %207 : vector<1x256xf32> to vector<4x256xf32>
    %209 = arith.mulf %208, %202 : vector<4x256xf32>
    %210 = arith.addf %206, %209 : vector<4x256xf32>
    %c34_i32 = arith.constant 34 : i32
    %211 = tpu.dynamic_rotate %126 by %c34_i32 dim 1 : vector<4x256xf32>, i32 -> vector<4x256xf32>
    %c34_i32_126 = arith.constant 34 : i32
    %212 = tpu.dynamic_rotate %127 by %c34_i32_126 dim 1 : vector<4x256xf32>, i32 -> vector<4x256xf32>
    %c8 = arith.constant 8 : index
    %c0_127 = arith.constant 0 : index
    %213 = vector.load %arg6[%c8, %c0_127] : memref<98x256xf32, #tpu.memory_space<vmem>>, vector<1x256xf32>
    %214 = vector.broadcast %213 : vector<1x256xf32> to vector<4x256xf32>
    %215 = arith.mulf %214, %211 : vector<4x256xf32>
    %216 = arith.addf %210, %215 : vector<4x256xf32>
    %c57 = arith.constant 57 : index
    %c0_128 = arith.constant 0 : index
    %217 = vector.load %arg6[%c57, %c0_128] : memref<98x256xf32, #tpu.memory_space<vmem>>, vector<1x256xf32>
    %218 = vector.broadcast %217 : vector<1x256xf32> to vector<4x256xf32>
    %219 = arith.mulf %218, %212 : vector<4x256xf32>
    %220 = arith.addf %216, %219 : vector<4x256xf32>
    %c33_i32 = arith.constant 33 : i32
    %221 = tpu.dynamic_rotate %126 by %c33_i32 dim 1 : vector<4x256xf32>, i32 -> vector<4x256xf32>
    %c33_i32_129 = arith.constant 33 : i32
    %222 = tpu.dynamic_rotate %127 by %c33_i32_129 dim 1 : vector<4x256xf32>, i32 -> vector<4x256xf32>
    %c9 = arith.constant 9 : index
    %c0_130 = arith.constant 0 : index
    %223 = vector.load %arg6[%c9, %c0_130] : memref<98x256xf32, #tpu.memory_space<vmem>>, vector<1x256xf32>
    %224 = vector.broadcast %223 : vector<1x256xf32> to vector<4x256xf32>
    %225 = arith.mulf %224, %221 : vector<4x256xf32>
    %226 = arith.addf %220, %225 : vector<4x256xf32>
    %c58 = arith.constant 58 : index
    %c0_131 = arith.constant 0 : index
    %227 = vector.load %arg6[%c58, %c0_131] : memref<98x256xf32, #tpu.memory_space<vmem>>, vector<1x256xf32>
    %228 = vector.broadcast %227 : vector<1x256xf32> to vector<4x256xf32>
    %229 = arith.mulf %228, %222 : vector<4x256xf32>
    %230 = arith.addf %226, %229 : vector<4x256xf32>
    %c32_i32 = arith.constant 32 : i32
    %231 = tpu.dynamic_rotate %126 by %c32_i32 dim 1 : vector<4x256xf32>, i32 -> vector<4x256xf32>
    %c32_i32_132 = arith.constant 32 : i32
    %232 = tpu.dynamic_rotate %127 by %c32_i32_132 dim 1 : vector<4x256xf32>, i32 -> vector<4x256xf32>
    %c10 = arith.constant 10 : index
    %c0_133 = arith.constant 0 : index
    %233 = vector.load %arg6[%c10, %c0_133] : memref<98x256xf32, #tpu.memory_space<vmem>>, vector<1x256xf32>
    %234 = vector.broadcast %233 : vector<1x256xf32> to vector<4x256xf32>
    %235 = arith.mulf %234, %231 : vector<4x256xf32>
    %236 = arith.addf %230, %235 : vector<4x256xf32>
    %c59 = arith.constant 59 : index
    %c0_134 = arith.constant 0 : index
    %237 = vector.load %arg6[%c59, %c0_134] : memref<98x256xf32, #tpu.memory_space<vmem>>, vector<1x256xf32>
    %238 = vector.broadcast %237 : vector<1x256xf32> to vector<4x256xf32>
    %239 = arith.mulf %238, %232 : vector<4x256xf32>
    %240 = arith.addf %236, %239 : vector<4x256xf32>
    %c31_i32 = arith.constant 31 : i32
    %241 = tpu.dynamic_rotate %126 by %c31_i32 dim 1 : vector<4x256xf32>, i32 -> vector<4x256xf32>
    %c31_i32_135 = arith.constant 31 : i32
    %242 = tpu.dynamic_rotate %127 by %c31_i32_135 dim 1 : vector<4x256xf32>, i32 -> vector<4x256xf32>
    %c11 = arith.constant 11 : index
    %c0_136 = arith.constant 0 : index
    %243 = vector.load %arg6[%c11, %c0_136] : memref<98x256xf32, #tpu.memory_space<vmem>>, vector<1x256xf32>
    %244 = vector.broadcast %243 : vector<1x256xf32> to vector<4x256xf32>
    %245 = arith.mulf %244, %241 : vector<4x256xf32>
    %246 = arith.addf %240, %245 : vector<4x256xf32>
    %c60 = arith.constant 60 : index
    %c0_137 = arith.constant 0 : index
    %247 = vector.load %arg6[%c60, %c0_137] : memref<98x256xf32, #tpu.memory_space<vmem>>, vector<1x256xf32>
    %248 = vector.broadcast %247 : vector<1x256xf32> to vector<4x256xf32>
    %249 = arith.mulf %248, %242 : vector<4x256xf32>
    %250 = arith.addf %246, %249 : vector<4x256xf32>
    %c30_i32 = arith.constant 30 : i32
    %251 = tpu.dynamic_rotate %126 by %c30_i32 dim 1 : vector<4x256xf32>, i32 -> vector<4x256xf32>
    %c30_i32_138 = arith.constant 30 : i32
    %252 = tpu.dynamic_rotate %127 by %c30_i32_138 dim 1 : vector<4x256xf32>, i32 -> vector<4x256xf32>
    %c12 = arith.constant 12 : index
    %c0_139 = arith.constant 0 : index
    %253 = vector.load %arg6[%c12, %c0_139] : memref<98x256xf32, #tpu.memory_space<vmem>>, vector<1x256xf32>
    %254 = vector.broadcast %253 : vector<1x256xf32> to vector<4x256xf32>
    %255 = arith.mulf %254, %251 : vector<4x256xf32>
    %256 = arith.addf %250, %255 : vector<4x256xf32>
    %c61 = arith.constant 61 : index
    %c0_140 = arith.constant 0 : index
    %257 = vector.load %arg6[%c61, %c0_140] : memref<98x256xf32, #tpu.memory_space<vmem>>, vector<1x256xf32>
    %258 = vector.broadcast %257 : vector<1x256xf32> to vector<4x256xf32>
    %259 = arith.mulf %258, %252 : vector<4x256xf32>
    %260 = arith.addf %256, %259 : vector<4x256xf32>
    %c29_i32 = arith.constant 29 : i32
    %261 = tpu.dynamic_rotate %126 by %c29_i32 dim 1 : vector<4x256xf32>, i32 -> vector<4x256xf32>
    %c29_i32_141 = arith.constant 29 : i32
    %262 = tpu.dynamic_rotate %127 by %c29_i32_141 dim 1 : vector<4x256xf32>, i32 -> vector<4x256xf32>
    %c13 = arith.constant 13 : index
    %c0_142 = arith.constant 0 : index
    %263 = vector.load %arg6[%c13, %c0_142] : memref<98x256xf32, #tpu.memory_space<vmem>>, vector<1x256xf32>
    %264 = vector.broadcast %263 : vector<1x256xf32> to vector<4x256xf32>
    %265 = arith.mulf %264, %261 : vector<4x256xf32>
    %266 = arith.addf %260, %265 : vector<4x256xf32>
    %c62 = arith.constant 62 : index
    %c0_143 = arith.constant 0 : index
    %267 = vector.load %arg6[%c62, %c0_143] : memref<98x256xf32, #tpu.memory_space<vmem>>, vector<1x256xf32>
    %268 = vector.broadcast %267 : vector<1x256xf32> to vector<4x256xf32>
    %269 = arith.mulf %268, %262 : vector<4x256xf32>
    %270 = arith.addf %266, %269 : vector<4x256xf32>
    %c19_i32 = arith.constant 19 : i32
    %271 = tpu.dynamic_rotate %126 by %c19_i32 dim 1 : vector<4x256xf32>, i32 -> vector<4x256xf32>
    %c19_i32_144 = arith.constant 19 : i32
    %272 = tpu.dynamic_rotate %127 by %c19_i32_144 dim 1 : vector<4x256xf32>, i32 -> vector<4x256xf32>
    %c14 = arith.constant 14 : index
    %c0_145 = arith.constant 0 : index
    %273 = vector.load %arg6[%c14, %c0_145] : memref<98x256xf32, #tpu.memory_space<vmem>>, vector<1x256xf32>
    %274 = vector.broadcast %273 : vector<1x256xf32> to vector<4x256xf32>
    %275 = arith.mulf %274, %271 : vector<4x256xf32>
    %276 = arith.addf %270, %275 : vector<4x256xf32>
    %c63 = arith.constant 63 : index
    %c0_146 = arith.constant 0 : index
    %277 = vector.load %arg6[%c63, %c0_146] : memref<98x256xf32, #tpu.memory_space<vmem>>, vector<1x256xf32>
    %278 = vector.broadcast %277 : vector<1x256xf32> to vector<4x256xf32>
    %279 = arith.mulf %278, %272 : vector<4x256xf32>
    %280 = arith.addf %276, %279 : vector<4x256xf32>
    %c18_i32 = arith.constant 18 : i32
    %281 = tpu.dynamic_rotate %126 by %c18_i32 dim 1 : vector<4x256xf32>, i32 -> vector<4x256xf32>
    %c18_i32_147 = arith.constant 18 : i32
    %282 = tpu.dynamic_rotate %127 by %c18_i32_147 dim 1 : vector<4x256xf32>, i32 -> vector<4x256xf32>
    %c15 = arith.constant 15 : index
    %c0_148 = arith.constant 0 : index
    %283 = vector.load %arg6[%c15, %c0_148] : memref<98x256xf32, #tpu.memory_space<vmem>>, vector<1x256xf32>
    %284 = vector.broadcast %283 : vector<1x256xf32> to vector<4x256xf32>
    %285 = arith.mulf %284, %281 : vector<4x256xf32>
    %286 = arith.addf %280, %285 : vector<4x256xf32>
    %c64 = arith.constant 64 : index
    %c0_149 = arith.constant 0 : index
    %287 = vector.load %arg6[%c64, %c0_149] : memref<98x256xf32, #tpu.memory_space<vmem>>, vector<1x256xf32>
    %288 = vector.broadcast %287 : vector<1x256xf32> to vector<4x256xf32>
    %289 = arith.mulf %288, %282 : vector<4x256xf32>
    %290 = arith.addf %286, %289 : vector<4x256xf32>
    %c17_i32 = arith.constant 17 : i32
    %291 = tpu.dynamic_rotate %126 by %c17_i32 dim 1 : vector<4x256xf32>, i32 -> vector<4x256xf32>
    %c17_i32_150 = arith.constant 17 : i32
    %292 = tpu.dynamic_rotate %127 by %c17_i32_150 dim 1 : vector<4x256xf32>, i32 -> vector<4x256xf32>
    %c16 = arith.constant 16 : index
    %c0_151 = arith.constant 0 : index
    %293 = vector.load %arg6[%c16, %c0_151] : memref<98x256xf32, #tpu.memory_space<vmem>>, vector<1x256xf32>
    %294 = vector.broadcast %293 : vector<1x256xf32> to vector<4x256xf32>
    %295 = arith.mulf %294, %291 : vector<4x256xf32>
    %296 = arith.addf %290, %295 : vector<4x256xf32>
    %c65 = arith.constant 65 : index
    %c0_152 = arith.constant 0 : index
    %297 = vector.load %arg6[%c65, %c0_152] : memref<98x256xf32, #tpu.memory_space<vmem>>, vector<1x256xf32>
    %298 = vector.broadcast %297 : vector<1x256xf32> to vector<4x256xf32>
    %299 = arith.mulf %298, %292 : vector<4x256xf32>
    %300 = arith.addf %296, %299 : vector<4x256xf32>
    %c16_i32 = arith.constant 16 : i32
    %301 = tpu.dynamic_rotate %126 by %c16_i32 dim 1 : vector<4x256xf32>, i32 -> vector<4x256xf32>
    %c16_i32_153 = arith.constant 16 : i32
    %302 = tpu.dynamic_rotate %127 by %c16_i32_153 dim 1 : vector<4x256xf32>, i32 -> vector<4x256xf32>
    %c17 = arith.constant 17 : index
    %c0_154 = arith.constant 0 : index
    %303 = vector.load %arg6[%c17, %c0_154] : memref<98x256xf32, #tpu.memory_space<vmem>>, vector<1x256xf32>
    %304 = vector.broadcast %303 : vector<1x256xf32> to vector<4x256xf32>
    %305 = arith.mulf %304, %301 : vector<4x256xf32>
    %306 = arith.addf %300, %305 : vector<4x256xf32>
    %c66 = arith.constant 66 : index
    %c0_155 = arith.constant 0 : index
    %307 = vector.load %arg6[%c66, %c0_155] : memref<98x256xf32, #tpu.memory_space<vmem>>, vector<1x256xf32>
    %308 = vector.broadcast %307 : vector<1x256xf32> to vector<4x256xf32>
    %309 = arith.mulf %308, %302 : vector<4x256xf32>
    %310 = arith.addf %306, %309 : vector<4x256xf32>
    %c15_i32 = arith.constant 15 : i32
    %311 = tpu.dynamic_rotate %126 by %c15_i32 dim 1 : vector<4x256xf32>, i32 -> vector<4x256xf32>
    %c15_i32_156 = arith.constant 15 : i32
    %312 = tpu.dynamic_rotate %127 by %c15_i32_156 dim 1 : vector<4x256xf32>, i32 -> vector<4x256xf32>
    %c18 = arith.constant 18 : index
    %c0_157 = arith.constant 0 : index
    %313 = vector.load %arg6[%c18, %c0_157] : memref<98x256xf32, #tpu.memory_space<vmem>>, vector<1x256xf32>
    %314 = vector.broadcast %313 : vector<1x256xf32> to vector<4x256xf32>
    %315 = arith.mulf %314, %311 : vector<4x256xf32>
    %316 = arith.addf %310, %315 : vector<4x256xf32>
    %c67 = arith.constant 67 : index
    %c0_158 = arith.constant 0 : index
    %317 = vector.load %arg6[%c67, %c0_158] : memref<98x256xf32, #tpu.memory_space<vmem>>, vector<1x256xf32>
    %318 = vector.broadcast %317 : vector<1x256xf32> to vector<4x256xf32>
    %319 = arith.mulf %318, %312 : vector<4x256xf32>
    %320 = arith.addf %316, %319 : vector<4x256xf32>
    %c14_i32 = arith.constant 14 : i32
    %321 = tpu.dynamic_rotate %126 by %c14_i32 dim 1 : vector<4x256xf32>, i32 -> vector<4x256xf32>
    %c14_i32_159 = arith.constant 14 : i32
    %322 = tpu.dynamic_rotate %127 by %c14_i32_159 dim 1 : vector<4x256xf32>, i32 -> vector<4x256xf32>
    %c19 = arith.constant 19 : index
    %c0_160 = arith.constant 0 : index
    %323 = vector.load %arg6[%c19, %c0_160] : memref<98x256xf32, #tpu.memory_space<vmem>>, vector<1x256xf32>
    %324 = vector.broadcast %323 : vector<1x256xf32> to vector<4x256xf32>
    %325 = arith.mulf %324, %321 : vector<4x256xf32>
    %326 = arith.addf %320, %325 : vector<4x256xf32>
    %c68 = arith.constant 68 : index
    %c0_161 = arith.constant 0 : index
    %327 = vector.load %arg6[%c68, %c0_161] : memref<98x256xf32, #tpu.memory_space<vmem>>, vector<1x256xf32>
    %328 = vector.broadcast %327 : vector<1x256xf32> to vector<4x256xf32>
    %329 = arith.mulf %328, %322 : vector<4x256xf32>
    %330 = arith.addf %326, %329 : vector<4x256xf32>
    %c13_i32 = arith.constant 13 : i32
    %331 = tpu.dynamic_rotate %126 by %c13_i32 dim 1 : vector<4x256xf32>, i32 -> vector<4x256xf32>
    %c13_i32_162 = arith.constant 13 : i32
    %332 = tpu.dynamic_rotate %127 by %c13_i32_162 dim 1 : vector<4x256xf32>, i32 -> vector<4x256xf32>
    %c20 = arith.constant 20 : index
    %c0_163 = arith.constant 0 : index
    %333 = vector.load %arg6[%c20, %c0_163] : memref<98x256xf32, #tpu.memory_space<vmem>>, vector<1x256xf32>
    %334 = vector.broadcast %333 : vector<1x256xf32> to vector<4x256xf32>
    %335 = arith.mulf %334, %331 : vector<4x256xf32>
    %336 = arith.addf %330, %335 : vector<4x256xf32>
    %c69 = arith.constant 69 : index
    %c0_164 = arith.constant 0 : index
    %337 = vector.load %arg6[%c69, %c0_164] : memref<98x256xf32, #tpu.memory_space<vmem>>, vector<1x256xf32>
    %338 = vector.broadcast %337 : vector<1x256xf32> to vector<4x256xf32>
    %339 = arith.mulf %338, %332 : vector<4x256xf32>
    %340 = arith.addf %336, %339 : vector<4x256xf32>
    %c3_i32 = arith.constant 3 : i32
    %341 = tpu.dynamic_rotate %126 by %c3_i32 dim 1 : vector<4x256xf32>, i32 -> vector<4x256xf32>
    %c3_i32_165 = arith.constant 3 : i32
    %342 = tpu.dynamic_rotate %127 by %c3_i32_165 dim 1 : vector<4x256xf32>, i32 -> vector<4x256xf32>
    %c21 = arith.constant 21 : index
    %c0_166 = arith.constant 0 : index
    %343 = vector.load %arg6[%c21, %c0_166] : memref<98x256xf32, #tpu.memory_space<vmem>>, vector<1x256xf32>
    %344 = vector.broadcast %343 : vector<1x256xf32> to vector<4x256xf32>
    %345 = arith.mulf %344, %341 : vector<4x256xf32>
    %346 = arith.addf %340, %345 : vector<4x256xf32>
    %c70 = arith.constant 70 : index
    %c0_167 = arith.constant 0 : index
    %347 = vector.load %arg6[%c70, %c0_167] : memref<98x256xf32, #tpu.memory_space<vmem>>, vector<1x256xf32>
    %348 = vector.broadcast %347 : vector<1x256xf32> to vector<4x256xf32>
    %349 = arith.mulf %348, %342 : vector<4x256xf32>
    %350 = arith.addf %346, %349 : vector<4x256xf32>
    %c2_i32 = arith.constant 2 : i32
    %351 = tpu.dynamic_rotate %126 by %c2_i32 dim 1 : vector<4x256xf32>, i32 -> vector<4x256xf32>
    %c2_i32_168 = arith.constant 2 : i32
    %352 = tpu.dynamic_rotate %127 by %c2_i32_168 dim 1 : vector<4x256xf32>, i32 -> vector<4x256xf32>
    %c22 = arith.constant 22 : index
    %c0_169 = arith.constant 0 : index
    %353 = vector.load %arg6[%c22, %c0_169] : memref<98x256xf32, #tpu.memory_space<vmem>>, vector<1x256xf32>
    %354 = vector.broadcast %353 : vector<1x256xf32> to vector<4x256xf32>
    %355 = arith.mulf %354, %351 : vector<4x256xf32>
    %356 = arith.addf %350, %355 : vector<4x256xf32>
    %c71 = arith.constant 71 : index
    %c0_170 = arith.constant 0 : index
    %357 = vector.load %arg6[%c71, %c0_170] : memref<98x256xf32, #tpu.memory_space<vmem>>, vector<1x256xf32>
    %358 = vector.broadcast %357 : vector<1x256xf32> to vector<4x256xf32>
    %359 = arith.mulf %358, %352 : vector<4x256xf32>
    %360 = arith.addf %356, %359 : vector<4x256xf32>
    %c1_i32 = arith.constant 1 : i32
    %361 = tpu.dynamic_rotate %126 by %c1_i32 dim 1 : vector<4x256xf32>, i32 -> vector<4x256xf32>
    %c1_i32_171 = arith.constant 1 : i32
    %362 = tpu.dynamic_rotate %127 by %c1_i32_171 dim 1 : vector<4x256xf32>, i32 -> vector<4x256xf32>
    %c23 = arith.constant 23 : index
    %c0_172 = arith.constant 0 : index
    %363 = vector.load %arg6[%c23, %c0_172] : memref<98x256xf32, #tpu.memory_space<vmem>>, vector<1x256xf32>
    %364 = vector.broadcast %363 : vector<1x256xf32> to vector<4x256xf32>
    %365 = arith.mulf %364, %361 : vector<4x256xf32>
    %366 = arith.addf %360, %365 : vector<4x256xf32>
    %c72 = arith.constant 72 : index
    %c0_173 = arith.constant 0 : index
    %367 = vector.load %arg6[%c72, %c0_173] : memref<98x256xf32, #tpu.memory_space<vmem>>, vector<1x256xf32>
    %368 = vector.broadcast %367 : vector<1x256xf32> to vector<4x256xf32>
    %369 = arith.mulf %368, %362 : vector<4x256xf32>
    %370 = arith.addf %366, %369 : vector<4x256xf32>
    %c24 = arith.constant 24 : index
    %c0_174 = arith.constant 0 : index
    %371 = vector.load %arg6[%c24, %c0_174] : memref<98x256xf32, #tpu.memory_space<vmem>>, vector<1x256xf32>
    %372 = vector.broadcast %371 : vector<1x256xf32> to vector<4x256xf32>
    %373 = arith.mulf %372, %126 : vector<4x256xf32>
    %374 = arith.addf %370, %373 : vector<4x256xf32>
    %c73 = arith.constant 73 : index
    %c0_175 = arith.constant 0 : index
    %375 = vector.load %arg6[%c73, %c0_175] : memref<98x256xf32, #tpu.memory_space<vmem>>, vector<1x256xf32>
    %376 = vector.broadcast %375 : vector<1x256xf32> to vector<4x256xf32>
    %377 = arith.mulf %376, %127 : vector<4x256xf32>
    %378 = arith.addf %374, %377 : vector<4x256xf32>
    %c255_i32 = arith.constant 255 : i32
    %379 = tpu.dynamic_rotate %126 by %c255_i32 dim 1 : vector<4x256xf32>, i32 -> vector<4x256xf32>
    %c255_i32_176 = arith.constant 255 : i32
    %380 = tpu.dynamic_rotate %127 by %c255_i32_176 dim 1 : vector<4x256xf32>, i32 -> vector<4x256xf32>
    %c25 = arith.constant 25 : index
    %c0_177 = arith.constant 0 : index
    %381 = vector.load %arg6[%c25, %c0_177] : memref<98x256xf32, #tpu.memory_space<vmem>>, vector<1x256xf32>
    %382 = vector.broadcast %381 : vector<1x256xf32> to vector<4x256xf32>
    %383 = arith.mulf %382, %379 : vector<4x256xf32>
    %384 = arith.addf %378, %383 : vector<4x256xf32>
    %c74 = arith.constant 74 : index
    %c0_178 = arith.constant 0 : index
    %385 = vector.load %arg6[%c74, %c0_178] : memref<98x256xf32, #tpu.memory_space<vmem>>, vector<1x256xf32>
    %386 = vector.broadcast %385 : vector<1x256xf32> to vector<4x256xf32>
    %387 = arith.mulf %386, %380 : vector<4x256xf32>
    %388 = arith.addf %384, %387 : vector<4x256xf32>
    %c254_i32 = arith.constant 254 : i32
    %389 = tpu.dynamic_rotate %126 by %c254_i32 dim 1 : vector<4x256xf32>, i32 -> vector<4x256xf32>
    %c254_i32_179 = arith.constant 254 : i32
    %390 = tpu.dynamic_rotate %127 by %c254_i32_179 dim 1 : vector<4x256xf32>, i32 -> vector<4x256xf32>
    %c26 = arith.constant 26 : index
    %c0_180 = arith.constant 0 : index
    %391 = vector.load %arg6[%c26, %c0_180] : memref<98x256xf32, #tpu.memory_space<vmem>>, vector<1x256xf32>
    %392 = vector.broadcast %391 : vector<1x256xf32> to vector<4x256xf32>
    %393 = arith.mulf %392, %389 : vector<4x256xf32>
    %394 = arith.addf %388, %393 : vector<4x256xf32>
    %c75 = arith.constant 75 : index
    %c0_181 = arith.constant 0 : index
    %395 = vector.load %arg6[%c75, %c0_181] : memref<98x256xf32, #tpu.memory_space<vmem>>, vector<1x256xf32>
    %396 = vector.broadcast %395 : vector<1x256xf32> to vector<4x256xf32>
    %397 = arith.mulf %396, %390 : vector<4x256xf32>
    %398 = arith.addf %394, %397 : vector<4x256xf32>
    %c253_i32 = arith.constant 253 : i32
    %399 = tpu.dynamic_rotate %126 by %c253_i32 dim 1 : vector<4x256xf32>, i32 -> vector<4x256xf32>
    %c253_i32_182 = arith.constant 253 : i32
    %400 = tpu.dynamic_rotate %127 by %c253_i32_182 dim 1 : vector<4x256xf32>, i32 -> vector<4x256xf32>
    %c27 = arith.constant 27 : index
    %c0_183 = arith.constant 0 : index
    %401 = vector.load %arg6[%c27, %c0_183] : memref<98x256xf32, #tpu.memory_space<vmem>>, vector<1x256xf32>
    %402 = vector.broadcast %401 : vector<1x256xf32> to vector<4x256xf32>
    %403 = arith.mulf %402, %399 : vector<4x256xf32>
    %404 = arith.addf %398, %403 : vector<4x256xf32>
    %c76 = arith.constant 76 : index
    %c0_184 = arith.constant 0 : index
    %405 = vector.load %arg6[%c76, %c0_184] : memref<98x256xf32, #tpu.memory_space<vmem>>, vector<1x256xf32>
    %406 = vector.broadcast %405 : vector<1x256xf32> to vector<4x256xf32>
    %407 = arith.mulf %406, %400 : vector<4x256xf32>
    %408 = arith.addf %404, %407 : vector<4x256xf32>
    %c243_i32 = arith.constant 243 : i32
    %409 = tpu.dynamic_rotate %126 by %c243_i32 dim 1 : vector<4x256xf32>, i32 -> vector<4x256xf32>
    %c243_i32_185 = arith.constant 243 : i32
    %410 = tpu.dynamic_rotate %127 by %c243_i32_185 dim 1 : vector<4x256xf32>, i32 -> vector<4x256xf32>
    %c28 = arith.constant 28 : index
    %c0_186 = arith.constant 0 : index
    %411 = vector.load %arg6[%c28, %c0_186] : memref<98x256xf32, #tpu.memory_space<vmem>>, vector<1x256xf32>
    %412 = vector.broadcast %411 : vector<1x256xf32> to vector<4x256xf32>
    %413 = arith.mulf %412, %409 : vector<4x256xf32>
    %414 = arith.addf %408, %413 : vector<4x256xf32>
    %c77 = arith.constant 77 : index
    %c0_187 = arith.constant 0 : index
    %415 = vector.load %arg6[%c77, %c0_187] : memref<98x256xf32, #tpu.memory_space<vmem>>, vector<1x256xf32>
    %416 = vector.broadcast %415 : vector<1x256xf32> to vector<4x256xf32>
    %417 = arith.mulf %416, %410 : vector<4x256xf32>
    %418 = arith.addf %414, %417 : vector<4x256xf32>
    %c242_i32 = arith.constant 242 : i32
    %419 = tpu.dynamic_rotate %126 by %c242_i32 dim 1 : vector<4x256xf32>, i32 -> vector<4x256xf32>
    %c242_i32_188 = arith.constant 242 : i32
    %420 = tpu.dynamic_rotate %127 by %c242_i32_188 dim 1 : vector<4x256xf32>, i32 -> vector<4x256xf32>
    %c29 = arith.constant 29 : index
    %c0_189 = arith.constant 0 : index
    %421 = vector.load %arg6[%c29, %c0_189] : memref<98x256xf32, #tpu.memory_space<vmem>>, vector<1x256xf32>
    %422 = vector.broadcast %421 : vector<1x256xf32> to vector<4x256xf32>
    %423 = arith.mulf %422, %419 : vector<4x256xf32>
    %424 = arith.addf %418, %423 : vector<4x256xf32>
    %c78 = arith.constant 78 : index
    %c0_190 = arith.constant 0 : index
    %425 = vector.load %arg6[%c78, %c0_190] : memref<98x256xf32, #tpu.memory_space<vmem>>, vector<1x256xf32>
    %426 = vector.broadcast %425 : vector<1x256xf32> to vector<4x256xf32>
    %427 = arith.mulf %426, %420 : vector<4x256xf32>
    %428 = arith.addf %424, %427 : vector<4x256xf32>
    %c241_i32 = arith.constant 241 : i32
    %429 = tpu.dynamic_rotate %126 by %c241_i32 dim 1 : vector<4x256xf32>, i32 -> vector<4x256xf32>
    %c241_i32_191 = arith.constant 241 : i32
    %430 = tpu.dynamic_rotate %127 by %c241_i32_191 dim 1 : vector<4x256xf32>, i32 -> vector<4x256xf32>
    %c30 = arith.constant 30 : index
    %c0_192 = arith.constant 0 : index
    %431 = vector.load %arg6[%c30, %c0_192] : memref<98x256xf32, #tpu.memory_space<vmem>>, vector<1x256xf32>
    %432 = vector.broadcast %431 : vector<1x256xf32> to vector<4x256xf32>
    %433 = arith.mulf %432, %429 : vector<4x256xf32>
    %434 = arith.addf %428, %433 : vector<4x256xf32>
    %c79 = arith.constant 79 : index
    %c0_193 = arith.constant 0 : index
    %435 = vector.load %arg6[%c79, %c0_193] : memref<98x256xf32, #tpu.memory_space<vmem>>, vector<1x256xf32>
    %436 = vector.broadcast %435 : vector<1x256xf32> to vector<4x256xf32>
    %437 = arith.mulf %436, %430 : vector<4x256xf32>
    %438 = arith.addf %434, %437 : vector<4x256xf32>
    %c240_i32 = arith.constant 240 : i32
    %439 = tpu.dynamic_rotate %126 by %c240_i32 dim 1 : vector<4x256xf32>, i32 -> vector<4x256xf32>
    %c240_i32_194 = arith.constant 240 : i32
    %440 = tpu.dynamic_rotate %127 by %c240_i32_194 dim 1 : vector<4x256xf32>, i32 -> vector<4x256xf32>
    %c31 = arith.constant 31 : index
    %c0_195 = arith.constant 0 : index
    %441 = vector.load %arg6[%c31, %c0_195] : memref<98x256xf32, #tpu.memory_space<vmem>>, vector<1x256xf32>
    %442 = vector.broadcast %441 : vector<1x256xf32> to vector<4x256xf32>
    %443 = arith.mulf %442, %439 : vector<4x256xf32>
    %444 = arith.addf %438, %443 : vector<4x256xf32>
    %c80 = arith.constant 80 : index
    %c0_196 = arith.constant 0 : index
    %445 = vector.load %arg6[%c80, %c0_196] : memref<98x256xf32, #tpu.memory_space<vmem>>, vector<1x256xf32>
    %446 = vector.broadcast %445 : vector<1x256xf32> to vector<4x256xf32>
    %447 = arith.mulf %446, %440 : vector<4x256xf32>
    %448 = arith.addf %444, %447 : vector<4x256xf32>
    %c239_i32 = arith.constant 239 : i32
    %449 = tpu.dynamic_rotate %126 by %c239_i32 dim 1 : vector<4x256xf32>, i32 -> vector<4x256xf32>
    %c239_i32_197 = arith.constant 239 : i32
    %450 = tpu.dynamic_rotate %127 by %c239_i32_197 dim 1 : vector<4x256xf32>, i32 -> vector<4x256xf32>
    %c32 = arith.constant 32 : index
    %c0_198 = arith.constant 0 : index
    %451 = vector.load %arg6[%c32, %c0_198] : memref<98x256xf32, #tpu.memory_space<vmem>>, vector<1x256xf32>
    %452 = vector.broadcast %451 : vector<1x256xf32> to vector<4x256xf32>
    %453 = arith.mulf %452, %449 : vector<4x256xf32>
    %454 = arith.addf %448, %453 : vector<4x256xf32>
    %c81 = arith.constant 81 : index
    %c0_199 = arith.constant 0 : index
    %455 = vector.load %arg6[%c81, %c0_199] : memref<98x256xf32, #tpu.memory_space<vmem>>, vector<1x256xf32>
    %456 = vector.broadcast %455 : vector<1x256xf32> to vector<4x256xf32>
    %457 = arith.mulf %456, %450 : vector<4x256xf32>
    %458 = arith.addf %454, %457 : vector<4x256xf32>
    %c238_i32 = arith.constant 238 : i32
    %459 = tpu.dynamic_rotate %126 by %c238_i32 dim 1 : vector<4x256xf32>, i32 -> vector<4x256xf32>
    %c238_i32_200 = arith.constant 238 : i32
    %460 = tpu.dynamic_rotate %127 by %c238_i32_200 dim 1 : vector<4x256xf32>, i32 -> vector<4x256xf32>
    %c33 = arith.constant 33 : index
    %c0_201 = arith.constant 0 : index
    %461 = vector.load %arg6[%c33, %c0_201] : memref<98x256xf32, #tpu.memory_space<vmem>>, vector<1x256xf32>
    %462 = vector.broadcast %461 : vector<1x256xf32> to vector<4x256xf32>
    %463 = arith.mulf %462, %459 : vector<4x256xf32>
    %464 = arith.addf %458, %463 : vector<4x256xf32>
    %c82 = arith.constant 82 : index
    %c0_202 = arith.constant 0 : index
    %465 = vector.load %arg6[%c82, %c0_202] : memref<98x256xf32, #tpu.memory_space<vmem>>, vector<1x256xf32>
    %466 = vector.broadcast %465 : vector<1x256xf32> to vector<4x256xf32>
    %467 = arith.mulf %466, %460 : vector<4x256xf32>
    %468 = arith.addf %464, %467 : vector<4x256xf32>
    %c237_i32 = arith.constant 237 : i32
    %469 = tpu.dynamic_rotate %126 by %c237_i32 dim 1 : vector<4x256xf32>, i32 -> vector<4x256xf32>
    %c237_i32_203 = arith.constant 237 : i32
    %470 = tpu.dynamic_rotate %127 by %c237_i32_203 dim 1 : vector<4x256xf32>, i32 -> vector<4x256xf32>
    %c34 = arith.constant 34 : index
    %c0_204 = arith.constant 0 : index
    %471 = vector.load %arg6[%c34, %c0_204] : memref<98x256xf32, #tpu.memory_space<vmem>>, vector<1x256xf32>
    %472 = vector.broadcast %471 : vector<1x256xf32> to vector<4x256xf32>
    %473 = arith.mulf %472, %469 : vector<4x256xf32>
    %474 = arith.addf %468, %473 : vector<4x256xf32>
    %c83 = arith.constant 83 : index
    %c0_205 = arith.constant 0 : index
    %475 = vector.load %arg6[%c83, %c0_205] : memref<98x256xf32, #tpu.memory_space<vmem>>, vector<1x256xf32>
    %476 = vector.broadcast %475 : vector<1x256xf32> to vector<4x256xf32>
    %477 = arith.mulf %476, %470 : vector<4x256xf32>
    %478 = arith.addf %474, %477 : vector<4x256xf32>
    %c227_i32 = arith.constant 227 : i32
    %479 = tpu.dynamic_rotate %126 by %c227_i32 dim 1 : vector<4x256xf32>, i32 -> vector<4x256xf32>
    %c227_i32_206 = arith.constant 227 : i32
    %480 = tpu.dynamic_rotate %127 by %c227_i32_206 dim 1 : vector<4x256xf32>, i32 -> vector<4x256xf32>
    %c35 = arith.constant 35 : index
    %c0_207 = arith.constant 0 : index
    %481 = vector.load %arg6[%c35, %c0_207] : memref<98x256xf32, #tpu.memory_space<vmem>>, vector<1x256xf32>
    %482 = vector.broadcast %481 : vector<1x256xf32> to vector<4x256xf32>
    %483 = arith.mulf %482, %479 : vector<4x256xf32>
    %484 = arith.addf %478, %483 : vector<4x256xf32>
    %c84 = arith.constant 84 : index
    %c0_208 = arith.constant 0 : index
    %485 = vector.load %arg6[%c84, %c0_208] : memref<98x256xf32, #tpu.memory_space<vmem>>, vector<1x256xf32>
    %486 = vector.broadcast %485 : vector<1x256xf32> to vector<4x256xf32>
    %487 = arith.mulf %486, %480 : vector<4x256xf32>
    %488 = arith.addf %484, %487 : vector<4x256xf32>
    %c226_i32 = arith.constant 226 : i32
    %489 = tpu.dynamic_rotate %126 by %c226_i32 dim 1 : vector<4x256xf32>, i32 -> vector<4x256xf32>
    %c226_i32_209 = arith.constant 226 : i32
    %490 = tpu.dynamic_rotate %127 by %c226_i32_209 dim 1 : vector<4x256xf32>, i32 -> vector<4x256xf32>
    %c36 = arith.constant 36 : index
    %c0_210 = arith.constant 0 : index
    %491 = vector.load %arg6[%c36, %c0_210] : memref<98x256xf32, #tpu.memory_space<vmem>>, vector<1x256xf32>
    %492 = vector.broadcast %491 : vector<1x256xf32> to vector<4x256xf32>
    %493 = arith.mulf %492, %489 : vector<4x256xf32>
    %494 = arith.addf %488, %493 : vector<4x256xf32>
    %c85 = arith.constant 85 : index
    %c0_211 = arith.constant 0 : index
    %495 = vector.load %arg6[%c85, %c0_211] : memref<98x256xf32, #tpu.memory_space<vmem>>, vector<1x256xf32>
    %496 = vector.broadcast %495 : vector<1x256xf32> to vector<4x256xf32>
    %497 = arith.mulf %496, %490 : vector<4x256xf32>
    %498 = arith.addf %494, %497 : vector<4x256xf32>
    %c225_i32 = arith.constant 225 : i32
    %499 = tpu.dynamic_rotate %126 by %c225_i32 dim 1 : vector<4x256xf32>, i32 -> vector<4x256xf32>
    %c225_i32_212 = arith.constant 225 : i32
    %500 = tpu.dynamic_rotate %127 by %c225_i32_212 dim 1 : vector<4x256xf32>, i32 -> vector<4x256xf32>
    %c37 = arith.constant 37 : index
    %c0_213 = arith.constant 0 : index
    %501 = vector.load %arg6[%c37, %c0_213] : memref<98x256xf32, #tpu.memory_space<vmem>>, vector<1x256xf32>
    %502 = vector.broadcast %501 : vector<1x256xf32> to vector<4x256xf32>
    %503 = arith.mulf %502, %499 : vector<4x256xf32>
    %504 = arith.addf %498, %503 : vector<4x256xf32>
    %c86 = arith.constant 86 : index
    %c0_214 = arith.constant 0 : index
    %505 = vector.load %arg6[%c86, %c0_214] : memref<98x256xf32, #tpu.memory_space<vmem>>, vector<1x256xf32>
    %506 = vector.broadcast %505 : vector<1x256xf32> to vector<4x256xf32>
    %507 = arith.mulf %506, %500 : vector<4x256xf32>
    %508 = arith.addf %504, %507 : vector<4x256xf32>
    %c224_i32 = arith.constant 224 : i32
    %509 = tpu.dynamic_rotate %126 by %c224_i32 dim 1 : vector<4x256xf32>, i32 -> vector<4x256xf32>
    %c224_i32_215 = arith.constant 224 : i32
    %510 = tpu.dynamic_rotate %127 by %c224_i32_215 dim 1 : vector<4x256xf32>, i32 -> vector<4x256xf32>
    %c38 = arith.constant 38 : index
    %c0_216 = arith.constant 0 : index
    %511 = vector.load %arg6[%c38, %c0_216] : memref<98x256xf32, #tpu.memory_space<vmem>>, vector<1x256xf32>
    %512 = vector.broadcast %511 : vector<1x256xf32> to vector<4x256xf32>
    %513 = arith.mulf %512, %509 : vector<4x256xf32>
    %514 = arith.addf %508, %513 : vector<4x256xf32>
    %c87 = arith.constant 87 : index
    %c0_217 = arith.constant 0 : index
    %515 = vector.load %arg6[%c87, %c0_217] : memref<98x256xf32, #tpu.memory_space<vmem>>, vector<1x256xf32>
    %516 = vector.broadcast %515 : vector<1x256xf32> to vector<4x256xf32>
    %517 = arith.mulf %516, %510 : vector<4x256xf32>
    %518 = arith.addf %514, %517 : vector<4x256xf32>
    %c223_i32 = arith.constant 223 : i32
    %519 = tpu.dynamic_rotate %126 by %c223_i32 dim 1 : vector<4x256xf32>, i32 -> vector<4x256xf32>
    %c223_i32_218 = arith.constant 223 : i32
    %520 = tpu.dynamic_rotate %127 by %c223_i32_218 dim 1 : vector<4x256xf32>, i32 -> vector<4x256xf32>
    %c39 = arith.constant 39 : index
    %c0_219 = arith.constant 0 : index
    %521 = vector.load %arg6[%c39, %c0_219] : memref<98x256xf32, #tpu.memory_space<vmem>>, vector<1x256xf32>
    %522 = vector.broadcast %521 : vector<1x256xf32> to vector<4x256xf32>
    %523 = arith.mulf %522, %519 : vector<4x256xf32>
    %524 = arith.addf %518, %523 : vector<4x256xf32>
    %c88 = arith.constant 88 : index
    %c0_220 = arith.constant 0 : index
    %525 = vector.load %arg6[%c88, %c0_220] : memref<98x256xf32, #tpu.memory_space<vmem>>, vector<1x256xf32>
    %526 = vector.broadcast %525 : vector<1x256xf32> to vector<4x256xf32>
    %527 = arith.mulf %526, %520 : vector<4x256xf32>
    %528 = arith.addf %524, %527 : vector<4x256xf32>
    %c222_i32 = arith.constant 222 : i32
    %529 = tpu.dynamic_rotate %126 by %c222_i32 dim 1 : vector<4x256xf32>, i32 -> vector<4x256xf32>
    %c222_i32_221 = arith.constant 222 : i32
    %530 = tpu.dynamic_rotate %127 by %c222_i32_221 dim 1 : vector<4x256xf32>, i32 -> vector<4x256xf32>
    %c40 = arith.constant 40 : index
    %c0_222 = arith.constant 0 : index
    %531 = vector.load %arg6[%c40, %c0_222] : memref<98x256xf32, #tpu.memory_space<vmem>>, vector<1x256xf32>
    %532 = vector.broadcast %531 : vector<1x256xf32> to vector<4x256xf32>
    %533 = arith.mulf %532, %529 : vector<4x256xf32>
    %534 = arith.addf %528, %533 : vector<4x256xf32>
    %c89 = arith.constant 89 : index
    %c0_223 = arith.constant 0 : index
    %535 = vector.load %arg6[%c89, %c0_223] : memref<98x256xf32, #tpu.memory_space<vmem>>, vector<1x256xf32>
    %536 = vector.broadcast %535 : vector<1x256xf32> to vector<4x256xf32>
    %537 = arith.mulf %536, %530 : vector<4x256xf32>
    %538 = arith.addf %534, %537 : vector<4x256xf32>
    %c221_i32 = arith.constant 221 : i32
    %539 = tpu.dynamic_rotate %126 by %c221_i32 dim 1 : vector<4x256xf32>, i32 -> vector<4x256xf32>
    %c221_i32_224 = arith.constant 221 : i32
    %540 = tpu.dynamic_rotate %127 by %c221_i32_224 dim 1 : vector<4x256xf32>, i32 -> vector<4x256xf32>
    %c41 = arith.constant 41 : index
    %c0_225 = arith.constant 0 : index
    %541 = vector.load %arg6[%c41, %c0_225] : memref<98x256xf32, #tpu.memory_space<vmem>>, vector<1x256xf32>
    %542 = vector.broadcast %541 : vector<1x256xf32> to vector<4x256xf32>
    %543 = arith.mulf %542, %539 : vector<4x256xf32>
    %544 = arith.addf %538, %543 : vector<4x256xf32>
    %c90 = arith.constant 90 : index
    %c0_226 = arith.constant 0 : index
    %545 = vector.load %arg6[%c90, %c0_226] : memref<98x256xf32, #tpu.memory_space<vmem>>, vector<1x256xf32>
    %546 = vector.broadcast %545 : vector<1x256xf32> to vector<4x256xf32>
    %547 = arith.mulf %546, %540 : vector<4x256xf32>
    %548 = arith.addf %544, %547 : vector<4x256xf32>
    %c211_i32 = arith.constant 211 : i32
    %549 = tpu.dynamic_rotate %126 by %c211_i32 dim 1 : vector<4x256xf32>, i32 -> vector<4x256xf32>
    %c211_i32_227 = arith.constant 211 : i32
    %550 = tpu.dynamic_rotate %127 by %c211_i32_227 dim 1 : vector<4x256xf32>, i32 -> vector<4x256xf32>
    %c42 = arith.constant 42 : index
    %c0_228 = arith.constant 0 : index
    %551 = vector.load %arg6[%c42, %c0_228] : memref<98x256xf32, #tpu.memory_space<vmem>>, vector<1x256xf32>
    %552 = vector.broadcast %551 : vector<1x256xf32> to vector<4x256xf32>
    %553 = arith.mulf %552, %549 : vector<4x256xf32>
    %554 = arith.addf %548, %553 : vector<4x256xf32>
    %c91 = arith.constant 91 : index
    %c0_229 = arith.constant 0 : index
    %555 = vector.load %arg6[%c91, %c0_229] : memref<98x256xf32, #tpu.memory_space<vmem>>, vector<1x256xf32>
    %556 = vector.broadcast %555 : vector<1x256xf32> to vector<4x256xf32>
    %557 = arith.mulf %556, %550 : vector<4x256xf32>
    %558 = arith.addf %554, %557 : vector<4x256xf32>
    %c210_i32 = arith.constant 210 : i32
    %559 = tpu.dynamic_rotate %126 by %c210_i32 dim 1 : vector<4x256xf32>, i32 -> vector<4x256xf32>
    %c210_i32_230 = arith.constant 210 : i32
    %560 = tpu.dynamic_rotate %127 by %c210_i32_230 dim 1 : vector<4x256xf32>, i32 -> vector<4x256xf32>
    %c43 = arith.constant 43 : index
    %c0_231 = arith.constant 0 : index
    %561 = vector.load %arg6[%c43, %c0_231] : memref<98x256xf32, #tpu.memory_space<vmem>>, vector<1x256xf32>
    %562 = vector.broadcast %561 : vector<1x256xf32> to vector<4x256xf32>
    %563 = arith.mulf %562, %559 : vector<4x256xf32>
    %564 = arith.addf %558, %563 : vector<4x256xf32>
    %c92 = arith.constant 92 : index
    %c0_232 = arith.constant 0 : index
    %565 = vector.load %arg6[%c92, %c0_232] : memref<98x256xf32, #tpu.memory_space<vmem>>, vector<1x256xf32>
    %566 = vector.broadcast %565 : vector<1x256xf32> to vector<4x256xf32>
    %567 = arith.mulf %566, %560 : vector<4x256xf32>
    %568 = arith.addf %564, %567 : vector<4x256xf32>
    %c209_i32 = arith.constant 209 : i32
    %569 = tpu.dynamic_rotate %126 by %c209_i32 dim 1 : vector<4x256xf32>, i32 -> vector<4x256xf32>
    %c209_i32_233 = arith.constant 209 : i32
    %570 = tpu.dynamic_rotate %127 by %c209_i32_233 dim 1 : vector<4x256xf32>, i32 -> vector<4x256xf32>
    %c44 = arith.constant 44 : index
    %c0_234 = arith.constant 0 : index
    %571 = vector.load %arg6[%c44, %c0_234] : memref<98x256xf32, #tpu.memory_space<vmem>>, vector<1x256xf32>
    %572 = vector.broadcast %571 : vector<1x256xf32> to vector<4x256xf32>
    %573 = arith.mulf %572, %569 : vector<4x256xf32>
    %574 = arith.addf %568, %573 : vector<4x256xf32>
    %c93 = arith.constant 93 : index
    %c0_235 = arith.constant 0 : index
    %575 = vector.load %arg6[%c93, %c0_235] : memref<98x256xf32, #tpu.memory_space<vmem>>, vector<1x256xf32>
    %576 = vector.broadcast %575 : vector<1x256xf32> to vector<4x256xf32>
    %577 = arith.mulf %576, %570 : vector<4x256xf32>
    %578 = arith.addf %574, %577 : vector<4x256xf32>
    %c208_i32 = arith.constant 208 : i32
    %579 = tpu.dynamic_rotate %126 by %c208_i32 dim 1 : vector<4x256xf32>, i32 -> vector<4x256xf32>
    %c208_i32_236 = arith.constant 208 : i32
    %580 = tpu.dynamic_rotate %127 by %c208_i32_236 dim 1 : vector<4x256xf32>, i32 -> vector<4x256xf32>
    %c45 = arith.constant 45 : index
    %c0_237 = arith.constant 0 : index
    %581 = vector.load %arg6[%c45, %c0_237] : memref<98x256xf32, #tpu.memory_space<vmem>>, vector<1x256xf32>
    %582 = vector.broadcast %581 : vector<1x256xf32> to vector<4x256xf32>
    %583 = arith.mulf %582, %579 : vector<4x256xf32>
    %584 = arith.addf %578, %583 : vector<4x256xf32>
    %c94 = arith.constant 94 : index
    %c0_238 = arith.constant 0 : index
    %585 = vector.load %arg6[%c94, %c0_238] : memref<98x256xf32, #tpu.memory_space<vmem>>, vector<1x256xf32>
    %586 = vector.broadcast %585 : vector<1x256xf32> to vector<4x256xf32>
    %587 = arith.mulf %586, %580 : vector<4x256xf32>
    %588 = arith.addf %584, %587 : vector<4x256xf32>
    %c207_i32 = arith.constant 207 : i32
    %589 = tpu.dynamic_rotate %126 by %c207_i32 dim 1 : vector<4x256xf32>, i32 -> vector<4x256xf32>
    %c207_i32_239 = arith.constant 207 : i32
    %590 = tpu.dynamic_rotate %127 by %c207_i32_239 dim 1 : vector<4x256xf32>, i32 -> vector<4x256xf32>
    %c46 = arith.constant 46 : index
    %c0_240 = arith.constant 0 : index
    %591 = vector.load %arg6[%c46, %c0_240] : memref<98x256xf32, #tpu.memory_space<vmem>>, vector<1x256xf32>
    %592 = vector.broadcast %591 : vector<1x256xf32> to vector<4x256xf32>
    %593 = arith.mulf %592, %589 : vector<4x256xf32>
    %594 = arith.addf %588, %593 : vector<4x256xf32>
    %c95 = arith.constant 95 : index
    %c0_241 = arith.constant 0 : index
    %595 = vector.load %arg6[%c95, %c0_241] : memref<98x256xf32, #tpu.memory_space<vmem>>, vector<1x256xf32>
    %596 = vector.broadcast %595 : vector<1x256xf32> to vector<4x256xf32>
    %597 = arith.mulf %596, %590 : vector<4x256xf32>
    %598 = arith.addf %594, %597 : vector<4x256xf32>
    %c206_i32 = arith.constant 206 : i32
    %599 = tpu.dynamic_rotate %126 by %c206_i32 dim 1 : vector<4x256xf32>, i32 -> vector<4x256xf32>
    %c206_i32_242 = arith.constant 206 : i32
    %600 = tpu.dynamic_rotate %127 by %c206_i32_242 dim 1 : vector<4x256xf32>, i32 -> vector<4x256xf32>
    %c47 = arith.constant 47 : index
    %c0_243 = arith.constant 0 : index
    %601 = vector.load %arg6[%c47, %c0_243] : memref<98x256xf32, #tpu.memory_space<vmem>>, vector<1x256xf32>
    %602 = vector.broadcast %601 : vector<1x256xf32> to vector<4x256xf32>
    %603 = arith.mulf %602, %599 : vector<4x256xf32>
    %604 = arith.addf %598, %603 : vector<4x256xf32>
    %c96 = arith.constant 96 : index
    %c0_244 = arith.constant 0 : index
    %605 = vector.load %arg6[%c96, %c0_244] : memref<98x256xf32, #tpu.memory_space<vmem>>, vector<1x256xf32>
    %606 = vector.broadcast %605 : vector<1x256xf32> to vector<4x256xf32>
    %607 = arith.mulf %606, %600 : vector<4x256xf32>
    %608 = arith.addf %604, %607 : vector<4x256xf32>
    %c205_i32 = arith.constant 205 : i32
    %609 = tpu.dynamic_rotate %126 by %c205_i32 dim 1 : vector<4x256xf32>, i32 -> vector<4x256xf32>
    %c205_i32_245 = arith.constant 205 : i32
    %610 = tpu.dynamic_rotate %127 by %c205_i32_245 dim 1 : vector<4x256xf32>, i32 -> vector<4x256xf32>
    %c48 = arith.constant 48 : index
    %c0_246 = arith.constant 0 : index
    %611 = vector.load %arg6[%c48, %c0_246] : memref<98x256xf32, #tpu.memory_space<vmem>>, vector<1x256xf32>
    %612 = vector.broadcast %611 : vector<1x256xf32> to vector<4x256xf32>
    %613 = arith.mulf %612, %609 : vector<4x256xf32>
    %614 = arith.addf %608, %613 : vector<4x256xf32>
    %c97 = arith.constant 97 : index
    %c0_247 = arith.constant 0 : index
    %615 = vector.load %arg6[%c97, %c0_247] : memref<98x256xf32, #tpu.memory_space<vmem>>, vector<1x256xf32>
    %616 = vector.broadcast %615 : vector<1x256xf32> to vector<4x256xf32>
    %617 = arith.mulf %616, %610 : vector<4x256xf32>
    %618 = arith.addf %614, %617 : vector<4x256xf32>
    %619 = arith.negf %618 : vector<4x256xf32>
    %620 = math.exp %619 : vector<4x256xf32>
    %cst_248 = arith.constant 1.000000e+00 : f32
    %621 = vector.broadcast %cst_248 : f32 to vector<4x256xf32>
    %622 = arith.addf %621, %620 : vector<4x256xf32>
    %623 = arith.divf %621, %622 : vector<4x256xf32>
    %c0_249 = arith.constant 0 : index
    %c0_250 = arith.constant 0 : index
    %624 = vector.load %arg11[%c0_249, %c0_250] : memref<4x256xf32, #tpu.memory_space<vmem>>, vector<4x256xf32>
    tpu.vector_store %arg11[%c0_249, %c0_250], %623 {strides = array<i32>} : memref<4x256xf32, #tpu.memory_space<vmem>>, vector<4x256xf32>,
    %cst_251 = arith.constant 1.000000e+00 : f32
    %625 = arith.subf %cst_251, %1 : f32
    %626 = vector.broadcast %1 : f32 to vector<32x1xf32>
    %627 = arith.mulf %626, %22 : vector<32x1xf32>
    %c0_252 = arith.constant 0 : index
    %c0_253 = arith.constant 0 : index
    %628 = vector.load %arg11[%c0_252, %c0_253] : memref<4x256xf32, #tpu.memory_space<vmem>>, vector<1x256xf32>
    %629 = vector.broadcast %627 : vector<32x1xf32> to vector<32x256xf32>
    %630 = vector.broadcast %628 : vector<1x256xf32> to vector<32x256xf32>
    %631 = arith.mulf %629, %630 : vector<32x256xf32>
    %632 = vector.broadcast %625 : f32 to vector<32x256xf32>
    %633 = arith.addf %632, %631 : vector<32x256xf32>
    %c0_254 = arith.constant 0 : index
    %c0_255 = arith.constant 0 : index
    %c0_256 = arith.constant 0 : index
    %634 = vector.load %arg1[%c0_254, %c0_255, %c0_256] : memref<4x32x256xf32, #tpu.memory_space<vmem>>, vector<1x32x256xf32>
    %635 = vector.shape_cast %634 : vector<1x32x256xf32> to vector<32x256xf32>
    %636 = arith.mulf %635, %633 : vector<32x256xf32>
    %c0_257 = arith.constant 0 : index
    %c0_258 = arith.constant 0 : index
    %c0_259 = arith.constant 0 : index
    %637 = vector.load %arg8[%c0_257, %c0_258, %c0_259] : memref<4x32x256xf32, #tpu.memory_space<vmem>>, vector<1x32x256xf32>
    %638 = vector.shape_cast %637 : vector<1x32x256xf32> to vector<32x256xf32>
    %639 = vector.shape_cast %636 : vector<32x256xf32> to vector<1x32x256xf32>
    tpu.vector_store %arg8[%c0_257, %c0_258, %c0_259], %639 {strides = array<i32>} : memref<4x32x256xf32, #tpu.memory_space<vmem>>, vector<1x32x256xf32>,
    %640 = vector.broadcast %1 : f32 to vector<32x1xf32>
    %641 = arith.mulf %640, %53 : vector<32x1xf32>
    %c1_260 = arith.constant 1 : index
    %c0_261 = arith.constant 0 : index
    %642 = vector.load %arg11[%c1_260, %c0_261] : memref<4x256xf32, #tpu.memory_space<vmem>>, vector<1x256xf32>
    %643 = vector.broadcast %641 : vector<32x1xf32> to vector<32x256xf32>
    %644 = vector.broadcast %642 : vector<1x256xf32> to vector<32x256xf32>
    %645 = arith.mulf %643, %644 : vector<32x256xf32>
    %646 = vector.broadcast %625 : f32 to vector<32x256xf32>
    %647 = arith.addf %646, %645 : vector<32x256xf32>
    %c1_262 = arith.constant 1 : index
    %c0_263 = arith.constant 0 : index
    %c0_264 = arith.constant 0 : index
    %648 = vector.load %arg1[%c1_262, %c0_263, %c0_264] : memref<4x32x256xf32, #tpu.memory_space<vmem>>, vector<1x32x256xf32>
    %649 = vector.shape_cast %648 : vector<1x32x256xf32> to vector<32x256xf32>
    %650 = arith.mulf %649, %647 : vector<32x256xf32>
    %c1_265 = arith.constant 1 : index
    %c0_266 = arith.constant 0 : index
    %c0_267 = arith.constant 0 : index
    %651 = vector.load %arg8[%c1_265, %c0_266, %c0_267] : memref<4x32x256xf32, #tpu.memory_space<vmem>>, vector<1x32x256xf32>
    %652 = vector.shape_cast %651 : vector<1x32x256xf32> to vector<32x256xf32>
    %653 = vector.shape_cast %650 : vector<32x256xf32> to vector<1x32x256xf32>
    tpu.vector_store %arg8[%c1_265, %c0_266, %c0_267], %653 {strides = array<i32>} : memref<4x32x256xf32, #tpu.memory_space<vmem>>, vector<1x32x256xf32>,
    %654 = vector.broadcast %1 : f32 to vector<32x1xf32>
    %655 = arith.mulf %654, %84 : vector<32x1xf32>
    %c2_268 = arith.constant 2 : index
    %c0_269 = arith.constant 0 : index
    %656 = vector.load %arg11[%c2_268, %c0_269] : memref<4x256xf32, #tpu.memory_space<vmem>>, vector<1x256xf32>
    %657 = vector.broadcast %655 : vector<32x1xf32> to vector<32x256xf32>
    %658 = vector.broadcast %656 : vector<1x256xf32> to vector<32x256xf32>
    %659 = arith.mulf %657, %658 : vector<32x256xf32>
    %660 = vector.broadcast %625 : f32 to vector<32x256xf32>
    %661 = arith.addf %660, %659 : vector<32x256xf32>
    %c2_270 = arith.constant 2 : index
    %c0_271 = arith.constant 0 : index
    %c0_272 = arith.constant 0 : index
    %662 = vector.load %arg1[%c2_270, %c0_271, %c0_272] : memref<4x32x256xf32, #tpu.memory_space<vmem>>, vector<1x32x256xf32>
    %663 = vector.shape_cast %662 : vector<1x32x256xf32> to vector<32x256xf32>
    %664 = arith.mulf %663, %661 : vector<32x256xf32>
    %c2_273 = arith.constant 2 : index
    %c0_274 = arith.constant 0 : index
    %c0_275 = arith.constant 0 : index
    %665 = vector.load %arg8[%c2_273, %c0_274, %c0_275] : memref<4x32x256xf32, #tpu.memory_space<vmem>>, vector<1x32x256xf32>
    %666 = vector.shape_cast %665 : vector<1x32x256xf32> to vector<32x256xf32>
    %667 = vector.shape_cast %664 : vector<32x256xf32> to vector<1x32x256xf32>
    tpu.vector_store %arg8[%c2_273, %c0_274, %c0_275], %667 {strides = array<i32>} : memref<4x32x256xf32, #tpu.memory_space<vmem>>, vector<1x32x256xf32>,
    %668 = vector.broadcast %1 : f32 to vector<32x1xf32>
    %669 = arith.mulf %668, %115 : vector<32x1xf32>
    %c3_276 = arith.constant 3 : index
    %c0_277 = arith.constant 0 : index
    %670 = vector.load %arg11[%c3_276, %c0_277] : memref<4x256xf32, #tpu.memory_space<vmem>>, vector<1x256xf32>
    %671 = vector.broadcast %669 : vector<32x1xf32> to vector<32x256xf32>
    %672 = vector.broadcast %670 : vector<1x256xf32> to vector<32x256xf32>
    %673 = arith.mulf %671, %672 : vector<32x256xf32>
    %674 = vector.broadcast %625 : f32 to vector<32x256xf32>
    %675 = arith.addf %674, %673 : vector<32x256xf32>
    %c3_278 = arith.constant 3 : index
    %c0_279 = arith.constant 0 : index
    %c0_280 = arith.constant 0 : index
    %676 = vector.load %arg1[%c3_278, %c0_279, %c0_280] : memref<4x32x256xf32, #tpu.memory_space<vmem>>, vector<1x32x256xf32>
    %677 = vector.shape_cast %676 : vector<1x32x256xf32> to vector<32x256xf32>
    %678 = arith.mulf %677, %675 : vector<32x256xf32>
    %c3_281 = arith.constant 3 : index
    %c0_282 = arith.constant 0 : index
    %c0_283 = arith.constant 0 : index
    %679 = vector.load %arg8[%c3_281, %c0_282, %c0_283] : memref<4x32x256xf32, #tpu.memory_space<vmem>>, vector<1x32x256xf32>
    %680 = vector.shape_cast %679 : vector<1x32x256xf32> to vector<32x256xf32>
    %681 = vector.shape_cast %678 : vector<32x256xf32> to vector<1x32x256xf32>
    tpu.vector_store %arg8[%c3_281, %c0_282, %c0_283], %681 {strides = array<i32>} : memref<4x32x256xf32, #tpu.memory_space<vmem>>, vector<1x32x256xf32>,
    return
  }
  func.func @transform_0(%arg0: i32) -> (i32, i32, i32) {
    %c0_i32 = arith.constant 0 : i32
    %c0_i32_0 = arith.constant 0 : i32
    %c0_i32_1 = arith.constant 0 : i32
    return %arg0, %c0_i32, %c0_i32_0 : i32, i32, i32
  }
  func.func @transform_1(%arg0: i32) -> (i32, i32) {
    %c0_i32 = arith.constant 0 : i32
    %c0_i32_0 = arith.constant 0 : i32
    %c0_i32_1 = arith.constant 0 : i32
    return %c0_i32, %c0_i32_0 : i32, i32
  }
  func.func @transform_2(%arg0: i32) -> (i32, i32) {
    %c0_i32 = arith.constant 0 : i32
    %c0_i32_0 = arith.constant 0 : i32
    %c0_i32_1 = arith.constant 0 : i32
    return %c0_i32, %c0_i32_0 : i32, i32
  }
  func.func @transform_3(%arg0: i32) -> (i32, i32) {
    %c0_i32 = arith.constant 0 : i32
    %c0_i32_0 = arith.constant 0 : i32
    %c0_i32_1 = arith.constant 0 : i32
    return %c0_i32, %c0_i32_0 : i32, i32
  }
  func.func @transform_4(%arg0: i32) -> (i32, i32) {
    %c0_i32 = arith.constant 0 : i32
    %c0_i32_0 = arith.constant 0 : i32
    %c0_i32_1 = arith.constant 0 : i32
    return %c0_i32, %c0_i32_0 : i32, i32
  }
  func.func @transform_5(%arg0: i32) -> (i32, i32) {
    %c0_i32 = arith.constant 0 : i32
    %c0_i32_0 = arith.constant 0 : i32
    %c0_i32_1 = arith.constant 0 : i32
    return %c0_i32, %c0_i32_0 : i32, i32
  }
  func.func @transform_6(%arg0: i32) -> i32 {
    %c0_i32 = arith.constant 0 : i32
    %c0_i32_0 = arith.constant 0 : i32
    return %c0_i32 : i32
  }
  func.func @transform_7(%arg0: i32) -> (i32, i32, i32) {
    %c0_i32 = arith.constant 0 : i32
    %c0_i32_0 = arith.constant 0 : i32
    %c0_i32_1 = arith.constant 0 : i32
    return %arg0, %c0_i32, %c0_i32_0 : i32, i32, i32
  }
}

</mosaic_0001>

<bundles_post_ra>
// kernel: tpu_custom_call.1
= control target key start
LH: loop header
LB: loop body
LE: loop exit
PB: predicated region body
PF: predicated region fallthrough
CT: control target
= control target key end

     0   :  { %s6426_s0 = inlined_call_operand.hbm [shape: f32[8,32,256], index: 0, kind: input, shape index: {}]   ;;  %s6427_s1 = inlined_call_operand.vmem [shape: f32[4,32], index: 1, kind: input, shape index: {}]   ;;  %s6428_s2 = inlined_call_operand.vmem [shape: f32[4,1], index: 2, kind: input, shape index: {}]   ;;  %s6429_s3 = inlined_call_operand.vmem [shape: f32[32,4], index: 3, kind: input, shape index: {}]   ;;  %s6430_s4 = inlined_call_operand.vmem [shape: f32[32,1], index: 4, kind: input, shape index: {}]   ;;  %s6431_s5 = inlined_call_operand.hbm [shape: f32[98,256], index: 5, kind: input, shape index: {}]   ;;  %s6432_s6 = inlined_call_operand.vmem [shape: f32[2], index: 6, kind: input, shape index: {}]   ;;  %s6433_s7 = inlined_call_operand.hbm [shape: f32[8,32,256], index: 7, kind: output, shape index: {}]  }
   0x1   :  { %6454 = sst [smem:[#allocation34_spill]] %s6431_s5 }
   0x2   :  { %12 = vsyncpa [#allocation6], 0 }
   0x3   :  { %14 = vsyncpa [#allocation6 + $0x1], 0 }
   0x4   :  { %15 = vsyncpa [#allocation10], 0 }
   0x5   :  { %16 = vsyncpa [#allocation8], 0 }
   0x6   :  { %17 = vsyncpa [#allocation7], 0 }
   0x7   :  { %19 = vsyncpa [#allocation7 + $0x1], 0  ;;  %s4626_s24 = smov 0   ;;  %s4628_s25 = smov 0  }
   0x8   :  { %s4630_s26 = smov 0   ;;  %s4632_s27 = smov 0  }
   0x9 LB: > { %s4647_s28 = sadd.s32 4294967295, %s4530_s27   ;;  %s4020_s29 = sadd.s32 4294967294, %s4530_s27   ;;  %s4530_s27 = sphi %s4632_s27, %s6522_s27   ;;  %s4526_s26 = sphi %s4630_s26, %s6521_s26   ;;  %s4522_s25 = sphi %s4628_s25, %s6520_s25   ;;  %s4518_s24 = sphi %s4626_s24, %s6519_s24  }
   0xa   : > { %p45_p0 = scmp.ne.s32.totalorder %s4522_s25, %s4518_s24  ;;  %p46_p1 = scmp.eq.s32.totalorder %s4647_s28, 0 }
   0xb   : > { %p195_p2 = scmp.eq.s32.totalorder %s4647_s28, 1  ;;  %p201_p3 = scmp.eq.s32.totalorder %s4020_s29, 1 }
   0xc   : > { %p4656_p4 = por %p46_p1, %p45_p0  ;;  %p4021_p5 = scmp.ge.s32.totalorder %s4530_s27, 1 }
   0xd   : > { %p4661_p6 = por %p201_p3, %p45_p0  ;;  %p208_p7 = scmp.lt.s32.totalorder %s4530_s27, 3 }
   0xe   : > { %s6457_s5 = sld [smem:[#allocation34_spill]]  ;;  %s4532_s13 = smov [#allocation9]  }
   0xf   : > { %p4669_p8 = pnand %p4021_p5, %p208_p7  ;;  %s233_s14 = sshll.u32 %s4532_s13, 4  ;;  %s234_s14 = int_to_ptr.vmem [resolvable:$true] %s233_s14 }
  0x10   : > { %s246_s17 = sshll.u32 %s6432_s6, 4  ;;  %s6434_s18 = smov 256   ;;  %s247_s17 = int_to_ptr.vmem [resolvable:$true] %s246_s17 }
  0x11   : > { %p4173_p9 = pneg %p4669_p8  ;;  %s6435_s19 = smov 16  }
  0x12   : > { %s4535_s20 = smov [#allocation11]   ;;  %s4685_s21 = sadd.s32 1, %s4530_s27  }
  0x13   : > { %p4174_p10 = pnand %p4173_p9, %p46_p1  ;;  %s29_s22 = ssub.s32 %s4530_s27, %s4685_s21 }
  0x14   : > { %s231_s11 = sshll.u32 %s6457_s5, 4  ;;  %p30_p12 = scmp.eq.s32.totalorder %s29_s22, 0  ;;  %s232_s11 = int_to_ptr.hbm [resolvable:$true] %s231_s11 }
  0x15   : > { %4176 = dma.hbm_to_vmem [thread:$0]  (!%p4174_p10), %s232_s11, 3328, %s234_s14, [#allocation10], %s6434_s18, %s6434_s18, %s6435_s19  }
  0x16   : > { %4179 = dma.vmem_to_smem (!%p4174_p10), %s247_s17, 16, %s4535_s20, [#allocation8]  }
  0x17   : > { %s32_s23 = sadd.s32 1, %s4526_s26  ;;  %p39_p13 = scmp.ne.s32.totalorder %s4526_s26, %s4522_s25 }
  0x18   : > { %p40_p0 = scmp.eq.s32.totalorder %s4530_s27, 0  ;;  %p4190_p7 = scmp.lt.s32.totalorder %s4530_s27, 2 }
  0x19   : > { %s4694_s29 = scalar_select %p30_p12, %s4526_s26, %s32_s23  }
  0x1a   : > { %p41_p3 = por %p40_p0, %p39_p13  ;;  %p4698_p5 = por %p195_p2, %p39_p13 }
  0x1b   : > { %s257_s10 = sand.u32 1, %s4526_s26   ;;  %s4156_s13 = sshll.u32 %s4530_s27, 8 }
  0x1c   : > { %s4025_s11 = sshll.u32 %s257_s10, 8  ;;  %s267_s16 = scalar_lea.hbm %s6426_s0, %s4156_s13 }
  0x1d   : > { %s261_s17 = scalar_lea.vmem [#allocation5], %s4025_s11  ;;  %s268_s22 = sshll.u32 %s267_s16, 4  ;;  %s269_s22 = int_to_ptr.hbm [resolvable:$true] %s268_s22 }
  0x1e   : > { %s270_s20 = sshll.u32 %s261_s17, 4  ;;  %p4708_p9 = pnand %p4190_p7, %p41_p3  ;;  %s271_s20 = int_to_ptr.vmem [resolvable:$true] %s270_s20 }
  0x1f   : > { %s258_s18 = scalar_lea.sflag [#allocation6], %s257_s10  ;;  %s4426_s19 = sshra.s32 %s269_s22, 4  ;;  %s4427_s19 = int_to_ptr.hbm [resolvable:$true] %s4426_s19 }
  0x20   : > { %s4428_s5 = scalar_lea.hbm %s4427_s19, 256  ;;  %p4430_p10 = pneg %p4708_p9 }
  0x21   : > { %p4429_p2 = scmp.ne.s32.totalorder %s4427_s19, %s4428_s5  ;;  %s4433_s14 = scalar_lea.hbm %s6426_s0, 512 }
  0x22   : > { %p4434_p0 = scmp.lt.s32.totalorder %s4427_s19, %s6426_s0  ;;  %p4435_p3 = scmp.lt.s32.totalorder %s4433_s14, %s4428_s5 }
  0x23   : > { %p4431_p12 = pnand %p4430_p10, %p4429_p2 }
  0x24   : > { %p4436_p7 = por %p4435_p3, %p4434_p0 }
  0x25   : > { %p4432_p13 = pneg %p4431_p12 }
  0x27   : > { %p4437_p11 = pnand %p4436_p7, %p4432_p13 }
  0x29   : > { %4440 = shalt.err (!%p4437_p11)
}
  0x2a   : > { %s6461_s10 = smov 16   ;;  %s6462_s17 = smov 256  }
  0x2b   : > { %4183 = dma.hbm_to_vmem [thread:$0]  (!%p4708_p9), %s269_s22, 4096, %s271_s20, %s258_s18, %s6462_s17, %s6462_s17, %s6461_s10  }
  0x2c   : > { %282 = sbr.rel (%p4669_p8) target bundleno = 1678 (0x68e), region = 48 }
  0x31   : > { %s4728_s13 = sand.u32 1, %s4522_s25  }
  0x32   : > { %s4030_s5 = sshll.u32 %s4728_s13, 8  ;;  %s285_s19 = scalar_lea.sflag [#allocation6], %s4728_s13 }
  0x33   : > { %s4734_s11 = scalar_lea.vmem [#allocation5], %s4030_s5 }
  0x34   : > { %4501 = dma.done.wait (%p4656_p4), %s285_s19, 4096  }
  0x35   : > { %4503 = vsyncadd (%p4656_p4), %s285_s19, 4294963200 }
  0x36   : > { %4505 = dma.done.wait (%p46_p1), [#allocation10], 3328  }
  0x37   : > { %4507 = vsyncadd (%p46_p1), [#allocation10], 4294963968 }
  0x38   : > { %4509 = dma.done.wait (%p46_p1), [#allocation8], 16  }
  0x39   : > { %4511 = vsyncadd (%p46_p1), [#allocation8], 4294967280 }
  0x3a   : > { %304 = sfence }
  0x3b   : > { %v4051_v0 = vld [vmem:[%s4734_s11 + $0x70] sm:$0xff]  ;;  %v4052_v1 = vld [vmem:[%s4734_s11 + $0x78] sm:$0xff]  ;;  %v4045_v5 = vld [vmem:[%s4734_s11 + $0x40] sm:$0xff]  ;;  %vm361_vm0 = vcmask 261120   ;;  %vm407_vm1 = vcmask 1043456   ;;  %vm394_vm2 = vcmask 31744  }
  0x3c   : > { %v4047_v2 = vld [vmem:[%s4734_s11 + $0x50] sm:$0xff]  ;;  %v617_v3 = vadd.f32 %v4052_v1, %v4051_v0  ;;  %v4048_v4 = vld [vmem:[%s4734_s11 + $0x58] sm:$0xff]  ;;  %v4046_v6 = vld [vmem:[%s4734_s11 + $0x48] sm:$0xff]  ;;  %s4537_s16 = smov 51   ;;  %s4538_s10 = smov 50  }
  0x3d   : > { %v611_v7 = vadd.f32 %v4048_v4, %v4047_v2  ;;  %v608_v8 = vadd.f32 %v4046_v6, %v4045_v5  ;;  %v4049_v9 = vld [vmem:[%s4734_s11 + $0x60] sm:$0xff]  ;;  %v4050_v10 = vld [vmem:[%s4734_s11 + $0x68] sm:$0xff]  ;;  %v341_v11 = vld [vmem:[%s4734_s11 + $0x30] sm:$0xff]  ;;  %s4539_s17 = smov 49   ;;  %s4540_s19 = smov 48  }
  0x3e   : > { %618 = vadd.xlane.f32.xlu0 %v617_v3  ;;  %v342_v12 = vld [vmem:[%s4734_s11 + $0x38] sm:$0xff]  ;;  %v339_v13 = vld [vmem:[%s4734_s11 + $0x20] sm:$0xff]  ;;  %v340_v14 = vld [vmem:[%s4734_s11 + $0x28] sm:$0xff]  ;;  %v614_v15 = vadd.f32 %v4050_v10, %v4049_v9  ;;  %s4541_s30 = smov 47   ;;  %s4542_s12 = smov 46  }
  0x3f   : > { %612 = vadd.xlane.f32.xlu1 %v611_v7  ;;  %609 = vadd.xlane.f32.xlu2 %v608_v8  ;;  %v352_v16 = vadd.f32 %v342_v12, %v341_v11  ;;  %v349_v17 = vadd.f32 %v340_v14, %v339_v13  ;;  %v337_v18 = vld [vmem:[%s4734_s11 + $0x10] sm:$0xff]  ;;  %v338_v19 = vld [vmem:[%s4734_s11 + $0x18] sm:$0xff]  ;;  %v4763_v20 = vld [vmem:[%s4734_s11] sm:$0xff]  ;;  %s4543_s18 = smov 45   ;;  %s4544_s20 = smov 35  }
  0x40   : > { %v4766_v21 = vld [vmem:[%s4734_s11 + $0x8] sm:$0xff]  ;;  %v4069_v22 = vld [vmem:[%s4734_s11 + $0xb0] sm:$0xff]  ;;  %v4070_v23 = vld [vmem:[%s4734_s11 + $0xb8] sm:$0xff]  ;;  %v346_v24 = vadd.f32 %v338_v19, %v337_v18  ;;  %s4545_s22 = smov 34   ;;  %s4546_s23 = smov 33  }
  0x41   : > { %v343_v25 = vadd.f32 %v4766_v21, %v4763_v20  ;;  %v876_v26 = vadd.f32 %v4070_v23, %v4069_v22  ;;  %v4067_v27 = vld [vmem:[%s4734_s11 + $0xa0] sm:$0xff]  ;;  %v4068_v28 = vld [vmem:[%s4734_s11 + $0xa8] sm:$0xff]  ;;  %v4065_v29 = vld [vmem:[%s4734_s11 + $0x90] sm:$0xff]  ;;  %s4547_s14 = smov 32   ;;  %s4548_s15 = smov 31  }
  0x42   : > { %v4066_v30 = vld [vmem:[%s4734_s11 + $0x98] sm:$0xff]  ;;  %v4777_v31 = vld [vmem:[%s4734_s11 + $0x80] sm:$0xff]  ;;  %v4780_v32 = vld [vmem:[%s4734_s11 + $0x88] sm:$0xff]  ;;  %v873_v33 = vadd.f32 %v4068_v28, %v4067_v27 }
  0x43   : > { %v870_v34 = vadd.f32 %v4066_v30, %v4065_v29  ;;  %v867_v35 = vadd.f32 %v4780_v32, %v4777_v31  ;;  %v4087_v36 = vld [vmem:[%s4734_s11 + $0xf0] sm:$0xff]  ;;  %v4088_v37 = vld [vmem:[%s4734_s11 + $0xf8] sm:$0xff]  ;;  %v4085_v38 = vld [vmem:[%s4734_s11 + $0xe0] sm:$0xff] }
  0x44   : > { %v4086_v39 = vld [vmem:[%s4734_s11 + $0xe8] sm:$0xff]  ;;  %v4789_v40 = vld [vmem:[%s4734_s11 + $0xd0] sm:$0xff]  ;;  %v4792_v41 = vld [vmem:[%s4734_s11 + $0xd8] sm:$0xff]  ;;  %v1135_v42 = vadd.f32 %v4088_v37, %v4087_v36 }
  0x45   : > { %v1132_v43 = vadd.f32 %v4086_v39, %v4085_v38  ;;  %v1129_v44 = vadd.f32 %v4792_v41, %v4789_v40  ;;  %v4081_v45 = vld [vmem:[%s4734_s11 + $0xc0] sm:$0xff]  ;;  %v4082_v46 = vld [vmem:[%s4734_s11 + $0xc8] sm:$0xff]  ;;  %v388_v38 = vld [vmem:[%s6429_s3 + $0x10] sm:$0xff] }
  0x46   : > { %615 = vadd.xlane.f32.xlu0 %v614_v15  ;;  %v1126_v47 = vadd.f32 %v4082_v46, %v4081_v45  ;;  %v624_v60 = vld [vmem:[%s6427_s1] sm:$0xf]  ;;  %v387_v36 = vld [vmem:[%s6429_s3 + $0x8] sm:$0xff]  ;;  %v389_v45 = vld [vmem:[%s6429_s3 + $0x18] sm:$0xff] }
  0x47   : > { %353 = vadd.xlane.f32.xlu1 %v352_v16  ;;  %350 = vadd.xlane.f32.xlu2 %v349_v17  ;;  %v359_v2 = vld [vmem:[%s6427_s1] sm:$0xf] }
  0x48   : > { %v883_v10 = vld [vmem:[%s6427_s1] sm:$0xf] }
  0x49   : > { %v1142_v19 = vld [vmem:[%s6427_s1] sm:$0xf] }
  0x4a   : > { %v360_v22 = vld [vmem:[%s6428_s2] sm:$0xf] }
  0x4b   : > { %v625_v23 = vld [vmem:[%s6428_s2] sm:$0xf] }
  0x4c   : > { %v386_v30 = vld [vmem:[%s6429_s3] sm:$0xff] }
  0x4d   : > { %v1143_v39 = vld [vmem:[%s6428_s2] sm:$0xf] }
  0x4e   : > { %347 = vadd.xlane.f32.xlu0 %v346_v24  ;;  %v390_v46 = vld [vmem:[%s6430_s4] sm:$0xff] }
  0x4f   : > { %344 = vadd.xlane.f32.xlu1 %v343_v25  ;;  %877 = vadd.xlane.f32.xlu2 %v876_v26 }
  0x56   : > { %874 = vadd.xlane.f32.xlu0 %v873_v33  ;;  %v884_v33 = vld [vmem:[%s6428_s2] sm:$0xf] }
  0x57   : > { %871 = vadd.xlane.f32.xlu1 %v870_v34  ;;  %868 = vadd.xlane.f32.xlu2 %v867_v35 }
  0x5e   : > { %1136 = vadd.xlane.f32.xlu0 %v1135_v42 }
  0x5f   : > { %1133 = vadd.xlane.f32.xlu1 %v1132_v43  ;;  %1130 = vadd.xlane.f32.xlu2 %v1129_v44 }
  0x66   : > { %1127 = vadd.xlane.f32.xlu0 %v1126_v47 }
  0xb1   : > { %v619_v48 = vpop.xlane.xlu0 %618 }
  0xb2   : > { %v613_v49 = vpop.xlane.xlu1 %612  ;;  %v623_v50 = vmul.f32 0.00390625, %v619_v48  ;;  %v610_v51 = vpop.xlane.xlu2 %609 }
  0xb3   : > { %v621_v58 = vmul.f32 0.00390625, %v613_v49  ;;  %v620_v59 = vmul.f32 0.00390625, %v610_v51 }
  0xb4   : > { %641 = vmatpush.msra.mxu2 %v623_v50  ;;  %v4536_v50 = vmov 0  }
  0xb5   : > { %4280 = vset.pattern.permute.xlu1 %v4536_v50  ;;  %4282 = vset.pattern.permute.xlu0 %v4536_v50 }
  0xb6   : > { %4281 = vset.pattern.permute.xlu2 %v4536_v50 }
  0xb9   : > { %v616_v52 = vpop.xlane.xlu0 %615 }
  0xba   : > { %v354_v53 = vpop.xlane.xlu1 %353  ;;  %v622_v54 = vmul.f32 0.00390625, %v616_v52  ;;  %v351_v55 = vpop.xlane.xlu2 %350  ;;  %v4866_v52 = vld [vmem:[%s6430_s4 + $0x8] sm:$0xff] }
  0xbb   : > { %v358_v56 = vmul.f32 0.00390625, %v354_v53  ;;  %v357_v57 = vmul.f32 0.00390625, %v351_v55 }
  0xbc   : > { %642 = vmatpush.msra.mxu2 %v622_v54 }
  0xbd   : > { %377 = vmatpush.msra.mxu0 %v358_v56 }
  0xbe   : > { %643 = vmatpush.msra.mxu2 %v621_v58 }
  0xbf   : > { %378 = vmatpush.msra.mxu0 %v357_v57 }
  0xc0   : > { %644 = vmatpush.msra.mxu2 %v620_v59 }
  0xc1   : > { %4053 = vmatmul.msk.f32.vlgmr.msra.gmra.mxu2 %vm361_vm0, %v624_v60  ;;  %v348_v61 = vpop.xlane.xlu0 %347  ;;  %v4872_v60 = vld [vmem:[%s6430_s4 + $0x10] sm:$0xff] }
  0xc2   : > { %v345_v62 = vpop.xlane.xlu1 %344  ;;  %v356_v63 = vmul.f32 0.00390625, %v348_v61  ;;  %v878_v0 = vpop.xlane.xlu2 %877 }
  0xc3   : > { %v355_v1 = vmul.f32 0.00390625, %v345_v62  ;;  %v882_v3 = vmul.f32 0.00390625, %v878_v0 }
  0xc4   : > { %379 = vmatpush.msra.mxu0 %v356_v63 }
  0xc6   : > { %380 = vmatpush.msra.mxu0 %v355_v1 }
  0xc7   : > { %4035 = vmatmul.msk.f32.vlgmr.msra.gmra.mxu0 %vm361_vm0, %v359_v2 }
  0xc8   : > { %900 = vmatpush.msrb.mxu0 %v882_v3 }
  0xc9   : > { %v875_v4 = vpop.xlane.xlu0 %874 }
  0xca   : > { %v872_v5 = vpop.xlane.xlu1 %871  ;;  %v881_v6 = vmul.f32 0.00390625, %v875_v4  ;;  %v869_v7 = vpop.xlane.xlu2 %868 }
  0xcb   : > { %v880_v8 = vmul.f32 0.00390625, %v872_v5  ;;  %v879_v9 = vmul.f32 0.00390625, %v869_v7 }
  0xcc   : > { %901 = vmatpush.msrb.mxu0 %v881_v6 }
  0xce   : > { %902 = vmatpush.msrb.mxu0 %v880_v8 }
  0xd0   : > { %903 = vmatpush.msrb.mxu0 %v879_v9 }
  0xd1   : > { %v1137_v11 = vpop.xlane.xlu0 %1136  ;;  %4071 = vmatmul.msk.f32.vlgmr.msrb.gmra.mxu0 %vm361_vm0, %v883_v10 }
  0xd2   : > { %v1141_v12 = vmul.f32 0.00390625, %v1137_v11  ;;  %v1134_v13 = vpop.xlane.xlu1 %1133  ;;  %v1131_v14 = vpop.xlane.xlu2 %1130 }
  0xd3   : > { %v1140_v15 = vmul.f32 0.00390625, %v1134_v13  ;;  %v1139_v16 = vmul.f32 0.00390625, %v1131_v14  ;;  %v4885_v14 = vld [vmem:[%s6430_s4 + $0x18] sm:$0xff] }
  0xd4   : > { %1159 = vmatpush.msra.mxu0 %v1141_v12 }
  0xd6   : > { %1160 = vmatpush.msra.mxu0 %v1140_v15 }
  0xd8   : > { %1161 = vmatpush.msra.mxu0 %v1139_v16 }
  0xd9   : > { %v1128_v17 = vpop.xlane.xlu0 %1127 }
  0xda   : > { %v1138_v18 = vmul.f32 0.00390625, %v1128_v17 }
  0xdc   : > { %1162 = vmatpush.msra.mxu0 %v1138_v18 }
  0xdd   : > { %4089 = vmatmul.msk.f32.vlgmr.msra.gmra.mxu0 %vm361_vm0, %v1142_v19 }
 0x144   : > { %v382_v24 = vpop.f32.mrf.mxu0  ;;  %v646_v25 = vpop.f32.mrf.mxu2 }
 0x145   : > { %v383_v26 = vadd.f32 %v382_v24, %v360_v22  ;;  %v647_v27 = vadd.f32 %v646_v25, %v625_v23 }
 0x147   : > { %v385_v28 = vmax.f32 %v383_v26, 0.0  ;;  %v649_v29 = vmax.f32 %v647_v27, 0.0 }
 0x149   : > { %4036 = vmatpush.msk.msra.mxu1 %vm407_vm1, %v385_v28  ;;  %4054 = vmatpush.msk.msra.mxu3 %vm407_vm1, %v649_v29 }
 0x14a   : > { %4037 = vmatmul.msk.f32.vlgmr.msra.gmra.mxu1 %vm394_vm2, %v386_v30  ;;  %4055 = vmatmul.msk.f32.vlgmr.msra.gmra.mxu3 %vm394_vm2, %v386_v30 }
 0x14e   : > { %v905_v34 = vpop.f32.mrf.mxu0 }
 0x14f   : > { %v906_v35 = vadd.f32 %v905_v34, %v884_v33 }
 0x151   : > { %v908_v37 = vmax.f32 %v906_v35, 0.0 }
 0x152   : > { %4038 = vmatmul.msk.f32.gmra.mxu1 %vm394_vm2, %v387_v36  ;;  %4056 = vmatmul.msk.f32.gmra.mxu3 %vm394_vm2, %v387_v36 }
 0x153   : > { %4072 = vmatpush.msk.msrb.mxu2 %vm407_vm1, %v908_v37 }
 0x154   : > { %4073 = vmatmul.msk.f32.vlgmr.msrb.gmra.mxu2 %vm394_vm2, %v386_v30 }
 0x15a   : > { %4039 = vmatmul.msk.f32.gmra.mxu1 %vm394_vm2, %v388_v38  ;;  %v1164_v42 = vpop.f32.mrf.mxu0  ;;  %4057 = vmatmul.msk.f32.gmra.mxu3 %vm394_vm2, %v388_v38 }
 0x15b   : > { %v1165_v43 = vadd.f32 %v1164_v42, %v1143_v39 }
 0x15c   : > { %4074 = vmatmul.msk.f32.gmra.mxu2 %vm394_vm2, %v387_v36 }
 0x15d   : > { %v1167_v44 = vmax.f32 %v1165_v43, 0.0 }
 0x15f   : > { %4090 = vmatpush.msk.msrb.mxu0 %vm407_vm1, %v1167_v44  ;;  %4159 = vmatpush.msk.msrb.mxu1 %vm407_vm1, %v1167_v44 }
 0x160   : > { %4160 = vmatpush.msk.msrb.mxu3 %vm407_vm1, %v1167_v44  ;;  %4091 = vmatmul.msk.f32.vlgmr.msrb.gmra.mxu0 %vm394_vm2, %v386_v30 }
 0x162   : > { %4040 = vmatmul.msk.f32.gmra.mxu1 %vm394_vm2, %v389_v45  ;;  %4058 = vmatmul.msk.f32.gmra.mxu3 %vm394_vm2, %v389_v45 }
 0x164   : > { %4075 = vmatmul.msk.f32.gmra.mxu2 %vm394_vm2, %v388_v38 }
 0x168   : > { %4092 = vmatmul.msk.f32.gmra.mxu0 %vm394_vm2, %v387_v36 }
 0x16a   : > { %4094 = vmatmul.msk.f32.vlgmr.msrb.gmra.mxu3 %vm394_vm2, %v389_v45  ;;  %4093 = vmatmul.msk.f32.vlgmr.msrb.gmra.mxu1 %vm394_vm2, %v388_v38 }
 0x16c   : > { %4076 = vmatmul.msk.f32.gmra.mxu2 %vm394_vm2, %v389_v45 }
 0x1c7   : > { %v428_v47 = vpop.f32.mrf.mxu1 }
 0x1c8   : > { %v429_v48 = vadd.f32 %v428_v47, %v390_v46 }
 0x1ca   : > { %v4041_v49 = vmul.f32 -1.442695, %v429_v48 }
 0x1cc   : > { %4283 = vpow2.f32 %v4041_v49 }
 0x1cd   : > { %v690_v51 = vpop.f32.mrf.mxu3 }
 0x1ce   : > { %v691_v53 = vadd.f32 %v690_v51, %v390_v46 }
 0x1cf   : > { %v431_v54 = vpop.f32.mrf.mxu1 }
 0x1d0   : > { %v4059_v55 = vmul.f32 -1.442695, %v691_v53  ;;  %v432_v56 = vadd.f32 %v431_v54, %v4866_v52 }
 0x1d2   : > { %v4284_v57 = vpop.eup %4283  ;;  %4285 = vpow2.f32 %v4059_v55  ;;  %v4042_v58 = vmul.f32 -1.442695, %v432_v56 }
 0x1d3   : > { %v452_v59 = vadd.f32 1.0, %v4284_v57 }
 0x1d4   : > { %4287 = vpow2.f32 %v4042_v58 }
 0x1d5   : > { %4289 = vrcp.f32 %v452_v59  ;;  %v693_v61 = vpop.f32.mrf.mxu3  ;;  %v465_v10 = vand.u32 2147483647, %v452_v59  ;;  %v467_v11 = vand.u32 2147483648, %v452_v59  ;;  %vm461_vm3 = vweird.f32 %v452_v59 }
 0x1d6   : > { %v694_v62 = vadd.f32 %v693_v61, %v4866_v52 }
 0x1d7   : > { %v434_v63 = vpop.f32.mrf.mxu1  ;;  %v949_v0 = vpop.f32.mrf.mxu2  ;;  %vm4888_vm4 = vcmp.eq.f32.partialorder %v465_v10, 8.507059e+37  ;;  %v468_v24 = vor.u32 1.1754944e-38, %v467_v11 }
 0x1d8   : > { %v4286_v1 = vpop.eup %4285  ;;  %v435_v2 = vadd.f32 %v434_v63, %v4872_v60  ;;  %v4060_v3 = vmul.f32 -1.442695, %v694_v62  ;;  %v950_v4 = vadd.f32 %v949_v0, %v390_v46 }
 0x1d9   : > { %v4876_v5 = vadd.f32 1.0, %v4286_v1 }
 0x1da   : > { %v4288_v6 = vpop.eup %4287  ;;  %4291 = vpow2.f32 %v4060_v3  ;;  %v4077_v7 = vmul.f32 -1.442695, %v950_v4  ;;  %v4043_v12 = vmul.f32 -1.442695, %v435_v2 }
 0x1db   : > { %v4290_v8 = vpop.eup %4289  ;;  %4293 = vrcp.f32 %v4876_v5  ;;  %v4879_v9 = vadd.f32 1.0, %v4288_v6  ;;  %vm723_vm5 = vweird.f32 %v4876_v5  ;;  %v727_v25 = vand.u32 2147483647, %v4876_v5 }
 0x1dc   : > { %v457_v13 = vmul.f32 %v4290_v8, %v452_v59  ;;  %vm462_vm6 = vweird.f32 %v4290_v8  ;;  %v729_v39 = vand.u32 2147483648, %v4876_v5 }
 0x1dd   : > { %4295 = vrcp.f32 %v4879_v9  ;;  %v696_v15 = vpop.f32.mrf.mxu3  ;;  %v1208_v16 = vpop.f32.mrf.mxu0  ;;  %vm4906_vm7 = vcmp.eq.f32.partialorder %v727_v25, 8.507059e+37  ;;  %vm476_vm8 = vweird.f32 %v4879_v9  ;;  %v480_v45 = vand.u32 2147483647, %v4879_v9  ;;  %vm463_vm9 = vmor %vm461_vm3, %vm462_vm6 }
 0x1de   : > { %4297 = vpow2.f32 %v4077_v7  ;;  %v697_v17 = vadd.f32 %v696_v15, %v4872_v60  ;;  %v458_v18 = vsub.f32 1.0, %v457_v13  ;;  %v1209_v29 = vadd.f32 %v1208_v16, %v390_v46 }
 0x1df   : > { %v437_v19 = vpop.f32.mrf.mxu1  ;;  %v952_v22 = vpop.f32.mrf.mxu2  ;;  %4299 = vpow2.f32 %v4043_v12  ;;  %v482_v55 = vand.u32 2147483648, %v4879_v9  ;;  %vm4936_vm13 = vcmp.eq.f32.partialorder %v480_v45, 8.507059e+37 }
 0x1e0   : > { %v4292_v26 = vpop.eup %4291  ;;  %v438_v27 = vadd.f32 %v437_v19, %v4885_v14  ;;  %v953_v28 = vadd.f32 %v952_v22, %v4866_v52  ;;  %v4061_v34 = vmul.f32 -1.442695, %v697_v17  ;;  %v459_v35 = vmul.f32 %v4290_v8, %v458_v18 }
 0x1e1   : > { %v4896_v30 = vpop.eup %4293  ;;  %v4898_v33 = vadd.f32 1.0, %v4292_v26  ;;  %v4095_v47 = vmul.f32 -1.442695, %v1209_v29  ;;  %v483_v22 = vor.u32 1.1754944e-38, %v482_v55 }
 0x1e2   : > { %v4044_v36 = vmul.f32 -1.442695, %v438_v27  ;;  %v4078_v37 = vmul.f32 -1.442695, %v953_v28  ;;  %v719_v38 = vmul.f32 %v4896_v30, %v4876_v5  ;;  %v460_v43 = vadd.f32 %v4290_v8, %v459_v35 }
 0x1e3   : > { %v4903_v42 = vpop.eup %4295  ;;  %4301 = vrcp.f32 %v4898_v33  ;;  %vm724_vm10 = vweird.f32 %v4896_v30  ;;  %vm738_vm15 = vweird.f32 %v4898_v33 }
 0x1e4   : > { %v4298_v46 = vpop.eup %4297  ;;  %4303 = vpow2.f32 %v4044_v36  ;;  %v720_v48 = vsub.f32 1.0, %v719_v38  ;;  %v472_v49 = vmul.f32 %v4903_v42, %v4879_v9  ;;  %v464_v51 = vsel %vm463_vm9, %v4290_v8, %v460_v43  ;;  %vm725_vm12 = vmor %vm723_vm5, %vm724_vm10 }
 0x1e5   : > { %v4915_v50 = vadd.f32 1.0, %v4298_v46  ;;  %4305 = vpow2.f32 %v4061_v34  ;;  %v699_v53 = vpop.f32.mrf.mxu3  ;;  %v1211_v54 = vpop.f32.mrf.mxu0  ;;  %v4920_v57 = vsel %vm4888_vm4, %v468_v24, %v464_v51  ;;  %vm477_vm11 = vweird.f32 %v4903_v42 }
 0x1e6   : > { %v4300_v56 = vpop.eup %4299  ;;  %4307 = vpow2.f32 %v4078_v37  ;;  %6467 = vst [vmem:[#allocation17_spill] sm:$0xff] %v4920_v57  ;;  %v700_v58 = vadd.f32 %v699_v53, %v4885_v14  ;;  %v1212_v59 = vadd.f32 %v1211_v54, %v4866_v52  ;;  %518 = vperm.xlu1 %4280, %v4920_v57   ;;  %v721_v61 = vmul.f32 %v4896_v30, %v720_v48  ;;  %vm478_vm14 = vmor %vm476_vm8, %vm477_vm11 }
 0x1e7   : > { %4309 = vrcp.f32 %v4915_v50  ;;  %v473_v62 = vsub.f32 1.0, %v472_v49  ;;  %v955_v63 = vpop.f32.mrf.mxu2  ;;  %v730_v52 = vor.u32 1.1754944e-38, %v729_v39  ;;  %v1214_v11 = vpop.f32.mrf.mxu1  ;;  %v4942_v15 = vadd.f32 1.0, %v4300_v56 }
 0x1e8   : > { %4311 = vpow2.f32 %v4095_v47  ;;  %v4062_v0 = vmul.f32 -1.442695, %v700_v58  ;;  %v4096_v1 = vmul.f32 -1.442695, %v1212_v59  ;;  %v956_v2 = vadd.f32 %v955_v63, %v4872_v60 }
 0x1e9   : > { %v4929_v3 = vpop.eup %4301  ;;  %v722_v4 = vadd.f32 %v4896_v30, %v721_v61  ;;  %v474_v6 = vmul.f32 %v4903_v42, %v473_v62  ;;  %v1215_v27 = vadd.f32 %v1214_v11, %v4872_v60  ;;  %v744_v39 = vand.u32 2147483648, %v4898_v33 }
 0x1ea   : > { %v4304_v7 = vpop.eup %4303  ;;  %4313 = vpow2.f32 %v4062_v0  ;;  %v4079_v10 = vmul.f32 -1.442695, %v956_v2  ;;  %v734_v12 = vmul.f32 %v4929_v3, %v4898_v33  ;;  %vm739_vm0 = vweird.f32 %v4929_v3 }
 0x1eb   : > { %v4306_v13 = vpop.eup %4305  ;;  %v4944_v16 = vadd.f32 1.0, %v4304_v7  ;;  %v726_v17 = vsel %vm725_vm12, %v4896_v30, %v722_v4  ;;  %v475_v18 = vadd.f32 %v4903_v42, %v474_v6  ;;  %4315 = vpow2.f32 %v4096_v1  ;;  %vm4984_vm2 = vmor %vm738_vm15, %vm739_vm0 }
 0x1ec   : > { %v4308_v5 = vpop.eup %4307  ;;  %v4950_v19 = vsel %vm4906_vm7, %v730_v52, %v726_v17  ;;  %v735_v23 = vsub.f32 1.0, %v734_v12  ;;  %v4971_v35 = vadd.f32 1.0, %v4306_v13  ;;  %v4097_v45 = vmul.f32 -1.442695, %v1215_v27 }
 0x1ed   : > { %6470 = vst [vmem:[#allocation18_spill] sm:$0xff] %v4950_v19  ;;  %v4956_v24 = vpop.eup %4309  ;;  %4317 = vrcp.f32 %v4944_v16  ;;  %v4959_v25 = vadd.f32 1.0, %v4308_v5  ;;  %780 = vperm.xlu0 %4282, %v4950_v19   ;;  %v479_v26 = vsel %vm478_vm14, %v4903_v42, %v475_v18  ;;  %v1217_v28 = vpop.f32.mrf.mxu3  ;;  %v742_v42 = vand.u32 2147483647, %v4898_v33 }
 0x1ee   : > { %v4312_v29 = vpop.eup %4311  ;;  %v4966_v9 = vsel %vm4936_vm13, %v483_v22, %v479_v26  ;;  %4319 = vpow2.f32 %v4079_v10  ;;  %v1218_v30 = vadd.f32 %v1217_v28, %v4885_v14  ;;  %v736_v34 = vmul.f32 %v4929_v3, %v735_v23 }
 0x1ef   : > { %6471 = vst [vmem:[#allocation19_spill] sm:$0xff] %v4966_v9  ;;  %4321 = vrcp.f32 %v4942_v15  ;;  %523 = vperm.xlu2 %4281, %v4966_v9   ;;  %v4976_v36 = vadd.f32 1.0, %v4312_v29  ;;  %v978_v43 = vmul.f32 %v4956_v24, %v4915_v50  ;;  %v745_v54 = vor.u32 1.1754944e-38, %v744_v39  ;;  %v958_v56 = vpop.f32.mrf.mxu2 }
 0x1f0   : > { %v4314_v60 = vpop.eup %4313  ;;  %v4098_v37 = vmul.f32 -1.442695, %v1218_v30  ;;  %v737_v38 = vadd.f32 %v4929_v3, %v736_v34  ;;  %4323 = vrcp.f32 %v4959_v25  ;;  %v988_v55 = vand.u32 2147483648, %v4915_v50 }
 0x1f1   : > { %v4316_v44 = vpop.eup %4315  ;;  %v4991_v48 = vadd.f32 1.0, %v4314_v60  ;;  %v979_v49 = vsub.f32 1.0, %v978_v43  ;;  %vm743_vm3 = vcmp.eq.f32.partialorder %v742_v42, 8.507059e+37  ;;  %vm983_vm4 = vweird.f32 %v4956_v24 }
 0x1f2   : > { %4325 = vpow2.f32 %v4098_v37  ;;  %v741_v33 = vsel %vm4984_vm2, %v4929_v3, %v737_v38  ;;  %v4997_v53 = vadd.f32 1.0, %v4316_v44  ;;  %v986_v61 = vand.u32 2147483647, %v4915_v50 }
 0x1f3   : > { %v4988_v47 = vpop.eup %4317  ;;  %4327 = vrcp.f32 %v4971_v35  ;;  %v980_v59 = vmul.f32 %v4956_v24, %v979_v49  ;;  %v5005_v62 = vsel %vm743_vm3, %v745_v54, %v741_v33  ;;  %vm982_vm5 = vweird.f32 %v4915_v50 }
 0x1f4   : > { %v4320_v51 = vpop.eup %4319  ;;  %4329 = vrcp.f32 %v4976_v36  ;;  %6474 = vst [vmem:[#allocation20_spill] sm:$0xff] %v5005_v62  ;;  %v502_v63 = vmul.f32 %v4988_v47, %v4944_v16  ;;  %v959_v3 = vadd.f32 %v958_v56, %v4885_v14  ;;  %vm984_vm6 = vmor %vm982_vm5, %vm983_vm4  ;;  %v989_v50 = vor.u32 1.1754944e-38, %v988_v55 }
 0x1f5   : > { %v5000_v58 = vpop.eup %4321  ;;  %4331 = vpow2.f32 %v4097_v45  ;;  %v5013_v1 = vadd.f32 1.0, %v4320_v51  ;;  %v981_v2 = vadd.f32 %v4956_v24, %v980_v59  ;;  %v510_v6 = vand.u32 2147483647, %v4944_v16 }
 0x1f6   : > { %v5010_v0 = vpop.eup %4323  ;;  %4333 = vrcp.f32 %v4991_v48  ;;  %v503_v52 = vsub.f32 1.0, %v502_v63  ;;  %vm987_vm7 = vcmp.eq.f32.partialorder %v986_v61, 8.507059e+37  ;;  %vm506_vm8 = vweird.f32 %v4944_v16 }
 0x1f7   : > { %785 = vperm.xlu2 %4281, %v5005_v62   ;;  %4335 = vrcp.f32 %v4997_v53  ;;  %v985_v8 = vsel %vm984_vm6, %v4956_v24, %v981_v2  ;;  %v512_v10 = vand.u32 2147483648, %v4944_v16  ;;  %vm507_vm9 = vweird.f32 %v4988_v47 }
 0x1f8   : > { %v4326_v4 = vpop.eup %4325  ;;  %v5025_v12 = vsel %vm987_vm7, %v989_v50, %v985_v8  ;;  %v504_v14 = vmul.f32 %v4988_v47, %v503_v52  ;;  %v993_v13 = vmul.f32 %v5010_v0, %v4959_v25  ;;  %4337 = vrcp.f32 %v5013_v1  ;;  %vm508_vm11 = vmor %vm506_vm8, %vm507_vm9 }
 0x1f9   : > { %v5020_v7 = vpop.eup %4327  ;;  %6475 = vst [vmem:[#allocation21_spill] sm:$0xff] %v5025_v12  ;;  %v5032_v17 = vadd.f32 1.0, %v4326_v4  ;;  %1039 = vperm.xlu1 %4280, %v5025_v12   ;;  %v4080_v18 = vmul.f32 -1.442695, %v959_v3  ;;  %vm5036_vm10 = vcmp.eq.f32.partialorder %v510_v6, 8.507059e+37  ;;  %v513_v24 = vor.u32 1.1754944e-38, %v512_v10 }
 0x1fa   : > { %v4330_v11 = vpop.eup %4329  ;;  %v505_v22 = vadd.f32 %v4988_v47, %v504_v14  ;;  %v994_v26 = vsub.f32 1.0, %v993_v13  ;;  %vm997_vm12 = vweird.f32 %v4959_v25  ;;  %vm998_vm13 = vweird.f32 %v5010_v0 }
 0x1fb   : > { %v4332_v5 = vpop.eup %4331  ;;  %v1003_v28 = vand.u32 2147483648, %v4959_v25  ;;  %v1237_v29 = vmul.f32 %v4330_v11, %v4976_v36  ;;  %v1001_v37 = vand.u32 2147483647, %v4959_v25  ;;  %v1245_v38 = vand.u32 2147483647, %v4976_v36  ;;  %vm999_vm15 = vmor %vm997_vm12, %vm998_vm13 }
 0x1fc   : > { %v5040_v27 = vpop.eup %4333  ;;  %v509_v34 = vsel %vm508_vm11, %v4988_v47, %v505_v22  ;;  %v995_v60 = vmul.f32 %v5010_v0, %v994_v26  ;;  %v5054_v16 = vadd.f32 1.0, %v4332_v5  ;;  %4339 = vpow2.f32 %v4080_v18 }
 0x1fd   : > { %v5048_v30 = vpop.eup %4335  ;;  %v5058_v39 = vsel %vm5036_vm10, %v513_v24, %v509_v34  ;;  %v1238_v42 = vsub.f32 1.0, %v1237_v29  ;;  %4341 = vrcp.f32 %v5032_v17  ;;  %vm1241_vm14 = vweird.f32 %v4976_v36 }
 0x1fe   : > { %6478 = vst [vmem:[#allocation22_spill] sm:$0xff] %v5058_v39  ;;  %533 = vperm.xlu0 %4282, %v5058_v39   ;;  %v996_v43 = vadd.f32 %v5010_v0, %v995_v60  ;;  %v1247_v44 = vand.u32 2147483648, %v4976_v36  ;;  %v5065_v45 = vpop.eup %4337  ;;  %v1004_v46 = vor.u32 1.1754944e-38, %v1003_v28  ;;  %vm1242_vm0 = vweird.f32 %v4330_v11 }
 0x1ff   : > { %v1239_v47 = vmul.f32 %v4330_v11, %v1238_v42  ;;  %v749_v33 = vmul.f32 %v5020_v7, %v4971_v35  ;;  %vm1002_vm2 = vcmp.eq.f32.partialorder %v1001_v37, 8.507059e+37  ;;  %vm5074_vm3 = vcmp.eq.f32.partialorder %v1245_v38, 8.507059e+37  ;;  %vm1243_vm5 = vmor %vm1241_vm14, %vm1242_vm0 }
 0x200   : > { %v1000_v49 = vsel %vm999_vm15, %v5010_v0, %v996_v43  ;;  %vm753_vm4 = vweird.f32 %v4971_v35  ;;  %v1248_v25 = vor.u32 1.1754944e-38, %v1247_v44  ;;  %vm754_vm6 = vweird.f32 %v5020_v7 }
 0x201   : > { %v5079_v54 = vsel %vm1002_vm2, %v1004_v46, %v1000_v49  ;;  %v1240_v55 = vadd.f32 %v4330_v11, %v1239_v47  ;;  %v750_v56 = vsub.f32 1.0, %v749_v33  ;;  %v757_v59 = vand.u32 2147483647, %v4971_v35  ;;  %vm755_vm9 = vmor %vm753_vm4, %vm754_vm6 }
 0x202   : > { %6481 = vst [vmem:[#allocation23_spill] sm:$0xff] %v5079_v54  ;;  %1044 = vperm.xlu2 %4281, %v5079_v54   ;;  %v759_v61 = vand.u32 2147483648, %v4971_v35  ;;  %v1252_v63 = vmul.f32 %v5048_v30, %v4997_v53  ;;  %v4340_v0 = vpop.eup %4339  ;;  %vm1256_vm7 = vweird.f32 %v4997_v53  ;;  %vm1257_vm8 = vweird.f32 %v5048_v30  ;;  %v1497_v54 = vld [vmem:[#allocation9 + $0x2] ss:$8 sm:$0x3] }
 0x203   : > { %v1244_v2 = vsel %vm1243_vm5, %v4330_v11, %v1240_v55  ;;  %v751_v3 = vmul.f32 %v5020_v7, %v750_v56  ;;  %v4342_v4 = vpop.eup %4341  ;;  %v1260_v52 = vand.u32 2147483647, %v4997_v53  ;;  %v1262_v6 = vand.u32 2147483648, %v4997_v53  ;;  %vm5115_vm11 = vmor %vm1256_vm7, %vm1257_vm8 }
 0x204   : > { %v5094_v36 = vsel %vm5074_vm3, %v1248_v25, %v1244_v2  ;;  %v1253_v50 = vsub.f32 1.0, %v1252_v63  ;;  %4343 = vrcp.f32 %v5054_v16  ;;  %v487_v10 = vmul.f32 %v5000_v58, %v4942_v15 }
 0x205   : > { %6482 = vst [vmem:[#allocation24_spill] sm:$0xff] %v5094_v36  ;;  %1298 = vperm.xlu1 %4280, %v5094_v36   ;;  %v752_v8 = vadd.f32 %v5020_v7, %v751_v3  ;;  %v5103_v11 = vadd.f32 1.0, %v4340_v0  ;;  %vm758_vm10 = vcmp.eq.f32.partialorder %v757_v59, 8.507059e+37  ;;  %v760_v14 = vor.u32 1.1754944e-38, %v759_v61 }
 0x206   : > { %v1254_v13 = vmul.f32 %v5048_v30, %v1253_v50  ;;  %vm5119_vm12 = vcmp.eq.f32.partialorder %v1260_v52, 8.507059e+37  ;;  %v1263_v35 = vor.u32 1.1754944e-38, %v1262_v6  ;;  %v488_v23 = vsub.f32 1.0, %v487_v10 }
 0x207   : > { %v756_v18 = vsel %vm755_vm9, %v5020_v7, %v752_v8  ;;  %v497_v7 = vand.u32 2147483648, %v4942_v15  ;;  %v1282_v28 = vmul.f32 %v4342_v4, %v5032_v17  ;;  %vm491_vm13 = vweird.f32 %v4942_v15 }
 0x208   : > { %v5123_v24 = vsel %vm758_vm10, %v760_v14, %v756_v18  ;;  %v1255_v26 = vadd.f32 %v5048_v30, %v1254_v13  ;;  %v489_v53 = vmul.f32 %v5000_v58, %v488_v23  ;;  %vm492_vm14 = vweird.f32 %v5000_v58 }
 0x209   : > { %6487 = vst [vmem:[#allocation25_spill] sm:$0xff] %v5123_v24  ;;  %790 = vperm.xlu0 %4282, %v5123_v24   ;;  %v495_v29 = vand.u32 2147483647, %v4942_v15  ;;  %4345 = vrcp.f32 %v5103_v11  ;;  %v1283_v60 = vsub.f32 1.0, %v1282_v28  ;;  %vm1286_vm15 = vweird.f32 %v5032_v17  ;;  %vm493_vm0 = vmor %vm491_vm13, %vm492_vm14 }
 0x20a   : > { %v1259_v34 = vsel %vm5115_vm11, %v5048_v30, %v1255_v26  ;;  %v4344_v37 = vpop.eup %4343  ;;  %v490_v42 = vadd.f32 %v5000_v58, %v489_v53  ;;  %v1292_v43 = vand.u32 2147483648, %v5032_v17  ;;  %v1008_v15 = vmul.f32 %v5065_v45, %v5013_v1 }
 0x20b   : > { %v5140_v38 = vsel %vm5119_vm12, %v1263_v35, %v1259_v34  ;;  %v498_v44 = vor.u32 1.1754944e-38, %v497_v7  ;;  %v1284_v30 = vmul.f32 %v4342_v4, %v1283_v60  ;;  %vm1287_vm2 = vweird.f32 %v4342_v4 }
 0x20c   : > { %6488 = vst [vmem:[#allocation26_spill] sm:$0xff] %v5140_v38  ;;  %1303 = vperm.xlu2 %4281, %v5140_v38   ;;  %v1290_v46 = vand.u32 2147483647, %v5032_v17  ;;  %v494_v47 = vsel %vm493_vm0, %v5000_v58, %v490_v42  ;;  %vm496_vm3 = vcmp.eq.f32.partialorder %v495_v29, 8.507059e+37  ;;  %v1009_v33 = vsub.f32 1.0, %v1008_v15  ;;  %vm1288_vm5 = vmor %vm1286_vm15, %vm1287_vm2 }
 0x20d   : > { %vm1012_vm4 = vweird.f32 %v5013_v1  ;;  %v5150_v49 = vsel %vm496_vm3, %v498_v44, %v494_v47  ;;  %v1285_v51 = vadd.f32 %v4342_v4, %v1284_v30  ;;  %v1016_v55 = vand.u32 2147483647, %v5013_v1  ;;  %v1463_v38 = vld [vmem:[#allocation9 + $0x62] ss:$8 sm:$0x3] }
 0x20e   : > { %6489 = vst [vmem:[#allocation27_spill] sm:$0xff] %v5150_v49  ;;  %v1018_v25 = vand.u32 2147483648, %v5013_v1  ;;  %528 = vperm.xlu1 %4280, %v5150_v49   ;;  %v1293_v56 = vor.u32 1.1754944e-38, %v1292_v43  ;;  %v1010_v59 = vmul.f32 %v5065_v45, %v1009_v33  ;;  %vm1013_vm6 = vweird.f32 %v5065_v45 }
 0x20f   : > { %v1267_v58 = vmul.f32 %v4344_v37, %v5054_v16  ;;  %v4346_v61 = vpop.eup %4345  ;;  %v1289_v63 = vsel %vm1288_vm5, %v4342_v4, %v1285_v51  ;;  %vm1291_vm7 = vcmp.eq.f32.partialorder %v1290_v46, 8.507059e+37  ;;  %vm1271_vm8 = vweird.f32 %v5054_v16  ;;  %vm1014_vm9 = vmor %vm1012_vm4, %vm1013_vm6 }
 0x210   : > { %v5160_v0 = vsel %vm1291_vm7, %v1293_v56, %v1289_v63  ;;  %v1011_v2 = vadd.f32 %v5065_v45, %v1010_v59  ;;  %vm1017_vm10 = vcmp.eq.f32.partialorder %v1016_v55, 8.507059e+37  ;;  %v1019_v17 = vor.u32 1.1754944e-38, %v1018_v25  ;;  %v4355_v56 = vld [vmem:[%s4734_s11 + $0x10] sm:$0xff]  ;;  %v4357_v63 = vld [vmem:[%s4734_s11 + $0x48] sm:$0xff] }
 0x211   : > { %6490 = vst [vmem:[#allocation28_spill] sm:$0xff] %v5160_v0  ;;  %v1268_v3 = vsub.f32 1.0, %v1267_v58  ;;  %1313 = vperm.xlu0 %4282, %v5160_v0   ;;  %v1277_v50 = vand.u32 2147483648, %v5054_v16  ;;  %v764_v4 = vmul.f32 %v5040_v27, %v4991_v48  ;;  %vm1272_vm11 = vweird.f32 %v4344_v37  ;;  %v4356_v58 = vld [vmem:[%s4734_s11 + $0x40] sm:$0xff] }
 0x212   : > { %v1015_v52 = vsel %vm1014_vm9, %v5065_v45, %v1011_v2  ;;  %v1275_v8 = vand.u32 2147483647, %v5054_v16  ;;  %vm768_vm12 = vweird.f32 %v4991_v48  ;;  %v1023_v13 = vmul.f32 %v4346_v61, %v5103_v11  ;;  %vm1273_vm13 = vmor %vm1271_vm8, %vm1272_vm11 }
 0x213   : > { %v1269_v6 = vmul.f32 %v4344_v37, %v1268_v3  ;;  %v5172_v10 = vsel %vm1017_vm10, %v1019_v17, %v1015_v52  ;;  %v765_v14 = vsub.f32 1.0, %v764_v4  ;;  %v1278_v18 = vor.u32 1.1754944e-38, %v1277_v50  ;;  %v4358_v3 = vld [vmem:[%s4734_s11 + $0x18] sm:$0xff]  ;;  %v4359_v50 = vld [vmem:[%s4734_s11 + $0x50] sm:$0xff] }
 0x214   : > { %6491 = vst [vmem:[#allocation29_spill] sm:$0xff] %v5172_v10  ;;  %1049 = vperm.xlu2 %4281, %v5172_v10   ;;  %vm769_vm14 = vweird.f32 %v5040_v27  ;;  %v774_v5 = vand.u32 2147483648, %v4991_v48  ;;  %vm1276_vm15 = vcmp.eq.f32.partialorder %v1275_v8, 8.507059e+37  ;;  %v772_v35 = vand.u32 2147483647, %v4991_v48 }
 0x215   : > { %v1270_v1 = vadd.f32 %v4344_v37, %v1269_v6  ;;  %v766_v45 = vmul.f32 %v5040_v27, %v765_v14  ;;  %v1024_v23 = vsub.f32 1.0, %v1023_v13  ;;  %vm770_vm0 = vmor %vm768_vm12, %vm769_vm14  ;;  %vm1027_vm2 = vweird.f32 %v5103_v11 }
 0x216   : > { %vm1028_vm3 = vweird.f32 %v4346_v61  ;;  %v775_v53 = vor.u32 1.1754944e-38, %v774_v5  ;;  %v1033_v29 = vand.u32 2147483648, %v5103_v11  ;;  %vm773_vm4 = vcmp.eq.f32.partialorder %v772_v35, 8.507059e+37  ;;  %v4362_v5 = vld [vmem:[%s4734_s11 + $0x78] sm:$0xff] }
 0x217   : > { %v1274_v22 = vsel %vm1273_vm13, %v4344_v37, %v1270_v1  ;;  %v767_v7 = vadd.f32 %v5040_v27, %v766_v45  ;;  %v1025_v16 = vmul.f32 %v4346_v61, %v1024_v23  ;;  %v1031_v48 = vand.u32 2147483647, %v5103_v11  ;;  %vm1029_vm5 = vmor %vm1027_vm2, %vm1028_vm3  ;;  %v4363_v23 = vld [vmem:[%s4734_s11 + $0x90] sm:$0xff] }
 0x218   : > { %v5183_v26 = vsel %vm1276_vm15, %v1278_v18, %v1274_v22  ;;  %v1034_v42 = vor.u32 1.1754944e-38, %v1033_v29  ;;  %v4361_v18 = vld [vmem:[%s4734_s11 + $0x70] sm:$0xff]  ;;  %v6436_v35 = vlaneseq  ;;  %vm567_vm7 = vcmask 1040384  }
 0x219   : > { %6492 = vst [vmem:[#allocation30_spill] sm:$0xff] %v5183_v26  ;;  %1308 = vperm.xlu1 %4280, %v5183_v26   ;;  %v771_v28 = vsel %vm770_vm0, %v5040_v27, %v767_v7  ;;  %v1026_v34 = vadd.f32 %v4346_v61, %v1025_v16  ;;  %vm1032_vm6 = vcmp.eq.f32.partialorder %v1031_v48, 8.507059e+37  ;;  %v1499_v39 = vperm.slane %v1497_v54, 0 }
 0x21a   : > { %v5191_v60 = vsel %vm773_vm4, %v775_v53, %v771_v28  ;;  %vm5288_vm8 = vcmp.lt.s32.totalorder %v6436_v35, 256 }
 0x21b   : > { %6493 = vst [vmem:[#allocation31_spill] sm:$0xff] %v5191_v60  ;;  %v1030_v37 = vsel %vm1029_vm5, %v4346_v61, %v1026_v34  ;;  %v4365_v34 = vld [vmem:[%s4734_s11 + $0xa0] sm:$0xff] }
 0x21c   : > { %795 = vperm.xlu2 %4281, %v5191_v60   ;;  %v5194_v43 = vsel %vm1032_vm6, %v1034_v42, %v1030_v37  ;;  %v4366_v37 = vld [vmem:[%s4734_s11 + $0xa8] sm:$0xff] }
 0x21d   : > { %6494 = vst [vmem:[#allocation32_spill] sm:$0xff] %v5194_v43 }
 0x221   : > { %1054 = vperm.xlu1 %4280, %v5194_v43  }
 0x249   : > { %v524_v27 = vpop.permute.xlu2 %523 }
 0x24a   : > { %v5204_v59 = vmul.f32 %v4355_v56, %v524_v27  ;;  %v5209_v17 = vmul.f32 %v4358_v3, %v524_v27  ;;  %v4370_v56 = vld [vmem:[%s4734_s11 + $0x38] sm:$0xff] }
 0x251   : > { %v786_v15 = vpop.permute.xlu2 %785 }
 0x252   : > { %v800_v4 = vmul.f32 %v4359_v50, %v786_v15 }
 0x258   : > { %v519_v11 = vpop.permute.xlu1 %518 }
 0x259   : > { %v5198_v55 = vmul.f32 %v519_v11, %v4763_v20  ;;  %v5201_v25 = vmul.f32 %v519_v11, %v4766_v21  ;;  %v4360_v21 = vld [vmem:[%s4734_s11 + $0x58] sm:$0xff]  ;;  %v4367_v11 = vld [vmem:[%s4734_s11 + $0x60] sm:$0xff] }
 0x25a   : > { %v801_v6 = vmul.f32 %v4360_v21, %v786_v15 }
 0x25b   : > { %v5215_v8 = vadd.f32 %v5204_v59, %v5198_v55  ;;  %v5225_v13 = vadd.f32 %v5209_v17, %v5201_v25 }
 0x25c   : > { %v1045_v44 = vpop.permute.xlu2 %1044 }
 0x25d   : > { %v5230_v7 = vmul.f32 %v4363_v23, %v1045_v44  ;;  %v4371_v23 = vld [vmem:[%s4734_s11 + $0xc0] sm:$0xff] }
 0x25f   : > { %v781_v46 = vpop.permute.xlu0 %780 }
 0x260   : > { %v798_v61 = vmul.f32 %v4356_v58, %v781_v46  ;;  %v799_v2 = vmul.f32 %v4357_v63, %v781_v46  ;;  %v4368_v46 = vld [vmem:[%s4734_s11 + $0x68] sm:$0xff] }
 0x262   : > { %v815_v28 = vadd.f32 %v801_v6, %v799_v2 }
 0x266   : > { %v1304_v30 = vpop.permute.xlu2 %1303 }
 0x267   : > { %v5236_v53 = vmul.f32 %v4789_v40, %v1304_v30  ;;  %v5239_v29 = vmul.f32 %v4792_v41, %v1304_v30  ;;  %v4369_v30 = vld [vmem:[%s4734_s11 + $0x30] sm:$0xff] }
 0x26b   : > { %v1040_v47 = vpop.permute.xlu1 %1039 }
 0x26c   : > { %v5218_v14 = vmul.f32 %v4777_v31, %v1040_v47  ;;  %v5221_v1 = vmul.f32 %v4780_v32, %v1040_v47  ;;  %v4364_v31 = vld [vmem:[%s4734_s11 + $0x98] sm:$0xff]  ;;  %v806_v32 = vadd.f32 %v800_v4, %v798_v61 }
 0x26d   : > { %v5233_v16 = vmul.f32 %v4364_v31, %v1045_v44 }
 0x26e   : > { %v1050_v33 = vpop.permute.xlu2 %1049  ;;  %v1065_v15 = vadd.f32 %v5230_v7, %v5218_v14 }
 0x26f   : > { %v5242_v48 = vmul.f32 %v4365_v34, %v1050_v33  ;;  %v5245_v42 = vmul.f32 %v4366_v37, %v1050_v33  ;;  %v1074_v44 = vadd.f32 %v5233_v16, %v5221_v1  ;;  %v4372_v34 = vld [vmem:[%s4734_s11 + $0xc8] sm:$0xff] }
 0x270   : > { %v534_v51 = vpop.permute.xlu0 %533 }
 0x271   : > { %v542_v47 = vmul.f32 %v4369_v30, %v534_v51  ;;  %v543_v58 = vmul.f32 %v4370_v56, %v534_v51  ;;  %v4374_v30 = vld [vmem:[%s4734_s11 + $0x28] sm:$0xff] }
 0x276   : > { %v796_v20 = vpop.permute.xlu2 %795 }
 0x277   : > { %v1299_v52 = vpop.permute.xlu1 %1298  ;;  %v804_v45 = vmul.f32 %v4361_v18, %v796_v20  ;;  %v805_v22 = vmul.f32 %v4362_v5, %v796_v20 }
 0x278   : > { %v5260_v31 = vmul.f32 %v4371_v23, %v1299_v52  ;;  %v5263_v37 = vmul.f32 %v4372_v34, %v1299_v52 }
 0x279   : > { %v834_v63 = vmax.f32 %v800_v4, %v804_v45  ;;  %v843_v33 = vmax.f32 %v801_v6, %v805_v22 }
 0x27b   : > { %v791_v27 = vpop.permute.xlu0 %790 }
 0x27c   : > { %v802_v40 = vmul.f32 %v4367_v11, %v791_v27  ;;  %v803_v41 = vmul.f32 %v4368_v46, %v791_v27  ;;  %v5268_v27 = vadd.f32 %v1065_v15, %v5242_v48  ;;  %v5271_v11 = vadd.f32 %v1074_v44, %v5245_v42 }
 0x27e   : > { %v807_v3 = vadd.f32 %v806_v32, %v802_v40  ;;  %v816_v50 = vadd.f32 %v815_v28, %v803_v41  ;;  %v833_v20 = vmax.f32 %v798_v61, %v802_v40  ;;  %v842_v21 = vmax.f32 %v799_v2, %v803_v41 }
 0x27f   : > { %v576_v61 = vmax.f32 %v5204_v59, %v542_v47  ;;  %v585_v2 = vmax.f32 %v5209_v17, %v543_v58  ;;  %v5279_v59 = vadd.f32 %v5239_v29, %v5263_v37  ;;  %v4373_v17 = vld [vmem:[%s4734_s11 + $0x20] sm:$0xff] }
 0x280   : > { %v808_v51 = vadd.f32 %v807_v3, %v804_v45  ;;  %v817_v4 = vadd.f32 %v816_v50, %v805_v22  ;;  %v835_v6 = vmax.f32 %v833_v20, %v834_v63  ;;  %v844_v32 = vmax.f32 %v842_v21, %v843_v33  ;;  %v529_v28 = vpop.permute.xlu1 %528 }
 0x281   : > { %v5275_v45 = vadd.f32 %v5236_v53, %v5260_v31  ;;  %v540_v22 = vmul.f32 %v4373_v17, %v529_v28  ;;  %v541_v15 = vmul.f32 %v4374_v30, %v529_v28 }
 0x282   : > { %v809_v40 = vrot.slane %v808_v51, 4  ;;  %v818_v52 = vrot.slane %v817_v4, 4  ;;  %v836_v46 = vrot.slane %v835_v6, 4  ;;  %v845_v41 = vrot.slane %v844_v32, 4 }
 0x283   : > { %v545_v3 = vadd.f32 %v5215_v8, %v540_v22  ;;  %v554_v50 = vadd.f32 %v5225_v13, %v541_v15  ;;  %v575_v20 = vmax.f32 %v5198_v55, %v540_v22  ;;  %v584_v21 = vmax.f32 %v5201_v25, %v541_v15 }
 0x284   : > { %v810_v56 = vadd.f32 %v809_v40, %v808_v51  ;;  %v819_v63 = vadd.f32 %v818_v52, %v817_v4  ;;  %v837_v44 = vmax.f32 %v835_v6, %v836_v46  ;;  %v846_v33 = vmax.f32 %v844_v32, %v845_v41 }
 0x285   : > { %v546_v6 = vadd.f32 %v545_v3, %v542_v47  ;;  %v555_v32 = vadd.f32 %v554_v50, %v543_v58  ;;  %v577_v40 = vmax.f32 %v575_v20, %v576_v61  ;;  %v586_v52 = vmax.f32 %v584_v21, %v585_v2  ;;  %v1314_v58 = vpop.permute.xlu0 %1313 }
 0x286   : > { %v811_v34 = vrot.slane %v810_v56, 2  ;;  %v820_v28 = vrot.slane %v819_v63, 2  ;;  %v838_v51 = vrot.slane %v837_v44, 2  ;;  %v847_v4 = vrot.slane %v846_v33, 2 }
 0x287   : > { %v547_v55 = vrot.slane %v546_v6, 4  ;;  %v556_v17 = vrot.slane %v555_v32, 4  ;;  %v578_v25 = vrot.slane %v577_v40, 4  ;;  %v587_v22 = vrot.slane %v586_v52, 4 }
 0x288   : > { %v812_v8 = vadd.f32 %v811_v34, %v810_v56  ;;  %v821_v46 = vadd.f32 %v820_v28, %v819_v63  ;;  %v839_v13 = vmax.f32 %v837_v44, %v838_v51  ;;  %v848_v41 = vmax.f32 %v846_v33, %v847_v4  ;;  %v4375_v51 = vld [vmem:[%s4734_s11 + $0xf0] sm:$0xff] }
 0x289   : > { %v548_v18 = vadd.f32 %v547_v55, %v546_v6  ;;  %v557_v0 = vadd.f32 %v556_v17, %v555_v32  ;;  %v579_v26 = vmax.f32 %v577_v40, %v578_v25  ;;  %v588_v47 = vmax.f32 %v586_v52, %v587_v22  ;;  %v4377_v25 = vld [vmem:[%s4734_s11 + $0xe0] sm:$0xff] }
 0x28a   : > { %v813_v30 = vrot.slane %v812_v8, 1  ;;  %v822_v15 = vrot.slane %v821_v46, 1  ;;  %v840_v35 = vrot.slane %v839_v13, 1  ;;  %v849_v5 = vrot.slane %v848_v41, 1 }
 0x28b   : > { %v1309_v61 = vpop.permute.xlu1 %1308  ;;  %v549_v33 = vrot.slane %v548_v18, 2  ;;  %v558_v3 = vrot.slane %v557_v0, 2  ;;  %v580_v50 = vrot.slane %v579_v26, 2  ;;  %v589_v20 = vrot.slane %v588_v47, 2 }
 0x28c   : > { %v814_v2 = vadd.f32 %v813_v30, %v812_v8  ;;  %v823_v56 = vadd.f32 %v822_v15, %v821_v46  ;;  %v841_v63 = vmax.f32 %v839_v13, %v840_v35  ;;  %v850_v44 = vmax.f32 %v848_v41, %v849_v5  ;;  %v4376_v5 = vld [vmem:[%s4734_s11 + $0xf8] sm:$0xff]  ;;  %v4378_v30 = vld [vmem:[%s4734_s11 + $0xe8] sm:$0xff] }
 0x28d   : > { %v1322_v4 = vmul.f32 %v4375_v51, %v1314_v58  ;;  %v550_v6 = vadd.f32 %v549_v33, %v548_v18  ;;  %v559_v32 = vadd.f32 %v558_v3, %v557_v0  ;;  %v581_v40 = vmax.f32 %v579_v26, %v580_v50 }
 0x28e   : > { %v824_v21 = vmul.f32 0.03125, %v814_v2  ;;  %v825_v34 = vmul.f32 0.03125, %v823_v56  ;;  %v853_v28 = vrot.slane %v850_v44, 7  ;;  %v590_v52 = vmax.f32 %v588_v47, %v589_v20  ;;  %v4379_v20 = vld [vmem:[%s4734_s11 + $0xb0] sm:$0xff] }
 0x28f   : > { %v1323_v46 = vmul.f32 %v4376_v5, %v1314_v58  ;;  %v1352_v13 = vmax.f32 %v5236_v53, %v1322_v4  ;;  %v551_v41 = vrot.slane %v550_v6, 1  ;;  %v560_v55 = vrot.slane %v559_v32, 1 }
 0x290   : > { %v828_v8 = vrot.slane %v825_v34, 7  ;;  %v854_v35 = vsel %vm567_vm7, %v841_v63, %v853_v28  ;;  %v582_v17 = vrot.slane %v581_v40, 1  ;;  %v1320_v22 = vmul.f32 %v4377_v25, %v1309_v61 }
 0x291   : > { %857 = vst.msk [vmem:[#allocation3 + $0x1] ss:$4 sm:$0x3] %vm5288_vm8, %v854_v35  ;;  %v591_v26 = vrot.slane %v590_v52, 1  ;;  %v1361_v18 = vmax.f32 %v5239_v29, %v1323_v46  ;;  %v1321_v15 = vmul.f32 %v4378_v30, %v1309_v61  ;;  %v552_v53 = vadd.f32 %v551_v41, %v550_v6 }
 0x292   : > { %v829_v0 = vsel %vm567_vm7, %v824_v21, %v828_v8  ;;  %v561_v47 = vadd.f32 %v560_v55, %v559_v32  ;;  %v583_v58 = vmax.f32 %v581_v40, %v582_v17  ;;  %v1325_v2 = vadd.f32 %v5275_v45, %v1320_v22  ;;  %v4380_v40 = vld [vmem:[%s4734_s11 + $0xb8] sm:$0xff] }
 0x293   : > { %832 = vst.msk [vmem:[#allocation2 + $0x1] ss:$4 sm:$0x3] %vm5288_vm8, %v829_v0  ;;  %v1055_v56 = vpop.permute.xlu1 %1054  ;;  %v592_v63 = vmax.f32 %v590_v52, %v591_v26  ;;  %v1334_v44 = vadd.f32 %v5279_v59, %v1321_v15  ;;  %v1351_v33 = vmax.f32 %v5260_v31, %v1320_v22  ;;  %v1360_v29 = vmax.f32 %v5263_v37, %v1321_v15 }
 0x294   : > { %v562_v3 = vmul.f32 0.03125, %v552_v53  ;;  %v563_v50 = vmul.f32 0.03125, %v561_v47  ;;  %v1326_v61 = vadd.f32 %v1325_v2, %v1322_v4  ;;  %v1063_v21 = vmul.f32 %v4379_v20, %v1055_v56 }
 0x295   : > { %v595_v34 = vrot.slane %v592_v63, 7  ;;  %v1335_v28 = vadd.f32 %v1334_v44, %v1323_v46  ;;  %v1353_v51 = vmax.f32 %v1351_v33, %v1352_v13  ;;  %v1362_v6 = vmax.f32 %v1360_v29, %v1361_v18 }
 0x296   : > { %v566_v32 = vrot.slane %v563_v50, 7  ;;  %v1327_v45 = vrot.slane %v1326_v61, 4  ;;  %v1064_v8 = vmul.f32 %v4380_v40, %v1055_v56  ;;  %v1067_v52 = vadd.f32 %v5268_v27, %v1063_v21 }
 0x297   : > { %v596_v59 = vsel %vm567_vm7, %v583_v58, %v595_v34  ;;  %v1336_v31 = vrot.slane %v1335_v28, 4  ;;  %v1354_v35 = vrot.slane %v1353_v51, 4  ;;  %v1363_v37 = vrot.slane %v1362_v6, 4 }
 0x298   : > { %v568_v5 = vsel %vm567_vm7, %v562_v3, %v566_v32  ;;  %598 = vst.msk [vmem:[#allocation3] ss:$4 sm:$0x3] %vm5288_vm8, %v596_v59  ;;  %v1328_v4 = vadd.f32 %v1327_v45, %v1326_v61  ;;  %v1068_v46 = vrot.slane %v1067_v52, 4  ;;  %v1076_v13 = vadd.f32 %v5271_v11, %v1064_v8 }
 0x299   : > { %574 = vst.msk [vmem:[#allocation2] ss:$4 sm:$0x3] %vm5288_vm8, %v568_v5  ;;  %v1337_v41 = vadd.f32 %v1336_v31, %v1335_v28  ;;  %v1355_v55 = vmax.f32 %v1353_v51, %v1354_v35  ;;  %v1364_v27 = vmax.f32 %v1362_v6, %v1363_v37  ;;  %v1093_v17 = vmax.f32 %v5230_v7, %v1063_v21 }
 0x29a   : > { %v1329_v25 = vrot.slane %v1328_v4, 2  ;;  %v1069_v22 = vadd.f32 %v1068_v46, %v1067_v52  ;;  %v1077_v0 = vrot.slane %v1076_v13, 4  ;;  %v1102_v26 = vmax.f32 %v5233_v16, %v1064_v8 }
 0x29b   : > { %v1338_v18 = vrot.slane %v1337_v41, 2  ;;  %v1356_v30 = vrot.slane %v1355_v55, 2  ;;  %v1365_v15 = vrot.slane %v1364_v27, 2  ;;  %v6497_v53 = vmax.f32 %v5218_v14, %v5242_v48 }
 0x29c   : > { %v1330_v47 = vadd.f32 %v1329_v25, %v1328_v4  ;;  %v1070_v58 = vrot.slane %v1069_v22, 2  ;;  %v1078_v2 = vadd.f32 %v1077_v0, %v1076_v13  ;;  %v6498_v56 = vmax.f32 %v5221_v1, %v5245_v42 }
 0x29d   : > { %v1094_v11 = vmax.f32 %v6497_v53, %v1093_v17  ;;  %v1339_v7 = vadd.f32 %v1338_v18, %v1337_v41  ;;  %v1357_v44 = vmax.f32 %v1355_v55, %v1356_v30  ;;  %v1366_v33 = vmax.f32 %v1364_v27, %v1365_v15 }
 0x29e   : > { %v1103_v63 = vmax.f32 %v6498_v56, %v1102_v26  ;;  %v1331_v3 = vrot.slane %v1330_v47, 1  ;;  %v1071_v16 = vadd.f32 %v1070_v58, %v1069_v22  ;;  %v1079_v50 = vrot.slane %v1078_v2, 2 }
 0x29f   : > { %v1095_v29 = vrot.slane %v1094_v11, 4  ;;  %v1340_v20 = vrot.slane %v1339_v7, 1  ;;  %v1358_v21 = vrot.slane %v1357_v44, 1  ;;  %v1367_v34 = vrot.slane %v1366_v33, 1 }
 0x2a0   : > { %v1104_v61 = vrot.slane %v1103_v63, 4  ;;  %v1072_v48 = vrot.slane %v1071_v16, 1  ;;  %v1080_v28 = vadd.f32 %v1079_v50, %v1078_v2  ;;  %v1332_v6 = vadd.f32 %v1331_v3, %v1330_v47 }
 0x2a1   : > { %v1096_v14 = vmax.f32 %v1094_v11, %v1095_v29  ;;  %v1341_v32 = vadd.f32 %v1340_v20, %v1339_v7  ;;  %v1368_v45 = vmax.f32 %v1366_v33, %v1367_v34  ;;  %v1359_v52 = vmax.f32 %v1357_v44, %v1358_v21 }
 0x2a2   : > { %v1105_v51 = vmax.f32 %v1103_v63, %v1104_v61  ;;  %v1081_v42 = vrot.slane %v1080_v28, 1  ;;  %v1073_v35 = vadd.f32 %v1072_v48, %v1071_v16  ;;  %v1342_v4 = vmul.f32 0.03125, %v1332_v6 }
 0x2a3   : > { %v1097_v1 = vrot.slane %v1096_v14, 2  ;;  %v1343_v8 = vmul.f32 0.03125, %v1341_v32  ;;  %v1371_v59 = vrot.slane %v1368_v45, 7 }
 0x2a4   : > { %v1106_v40 = vrot.slane %v1105_v51, 2  ;;  %v1082_v37 = vadd.f32 %v1081_v42, %v1080_v28  ;;  %v1083_v25 = vmul.f32 0.03125, %v1073_v35 }
 0x2a5   : > { %v1098_v31 = vmax.f32 %v1096_v14, %v1097_v1  ;;  %v1346_v46 = vrot.slane %v1343_v8, 7  ;;  %v1372_v13 = vsel %vm567_vm7, %v1359_v52, %v1371_v59 }
 0x2a6   : > { %v1107_v5 = vmax.f32 %v1105_v51, %v1106_v40  ;;  %1375 = vst.msk [vmem:[#allocation3 + $0x3] ss:$4 sm:$0x3] %vm5288_vm8, %v1372_v13  ;;  %v1084_v41 = vmul.f32 0.03125, %v1082_v37 }
 0x2a7   : > { %v1099_v55 = vrot.slane %v1098_v31, 1  ;;  %v1347_v17 = vsel %vm567_vm7, %v1342_v4, %v1346_v46 }
 0x2a8   : > { %v1108_v27 = vrot.slane %v1107_v5, 1  ;;  %1350 = vst.msk [vmem:[#allocation2 + $0x3] ss:$4 sm:$0x3] %vm5288_vm8, %v1347_v17  ;;  %v1087_v22 = vrot.slane %v1084_v41, 7 }
 0x2a9   : > { %v1100_v18 = vmax.f32 %v1098_v31, %v1099_v55 }
 0x2aa   : > { %v1109_v0 = vmax.f32 %v1107_v5, %v1108_v27  ;;  %v1088_v26 = vsel %vm567_vm7, %v1083_v25, %v1087_v22 }
 0x2ab   : > { %1091 = vst.msk [vmem:[#allocation2 + $0x2] ss:$4 sm:$0x3] %vm5288_vm8, %v1088_v26 }
 0x2ac   : > { %v1112_v30 = vrot.slane %v1109_v0, 7 }
 0x2ae   : > { %v1113_v15 = vsel %vm567_vm7, %v1100_v18, %v1112_v30 }
 0x2af   : > { %1116 = vst.msk [vmem:[#allocation3 + $0x2] ss:$4 sm:$0x3] %vm5288_vm8, %v1113_v15 }
 0x2b2   : > { %v5338_v53 = vld [vmem:[#allocation2] sm:$0xff] }
 0x2b3   : > { %1381 = vst [vmem:[#allocation1] ss:$2 sm:$0xff] %v5338_v53 }
 0x2b6   : > { %v5341_v11 = vld [vmem:[#allocation3] sm:$0xff] }
 0x2ba   : > { %v1383_v47 = vld.sshfl [vmem:[#allocation1 + $0x8] sm:$0xff pattern:$0x75316420]  ;;  %v1382_v58 = vld.sshfl [vmem:[#allocation1] sm:$0xff pattern:$0x75316420] }
 0x2bb   : > { %1388 = vrot.lane.b32.xlu1 %v1383_v47, %s4537_s16  ;;  %1386 = vrot.lane.b32.xlu2 %v1382_v58, %s4537_s16  ;;  %1396 = vst [vmem:[#allocation1] ss:$2 sm:$0xff] %v5341_v11 }
 0x2c2   : > { %v1398_v2 = vld.sshfl [vmem:[#allocation1 + $0x8] sm:$0xff pattern:$0x75316420]  ;;  %v1397_v56 = vld.sshfl [vmem:[#allocation1] sm:$0xff pattern:$0x75316420] }
 0x2c3   : > { %1403 = vrot.lane.b32.xlu2 %v1398_v2, %s4537_s16  ;;  %1401 = vrot.lane.b32.xlu0 %v1397_v56, %s4537_s16  ;;  %1428 = vst [vmem:[#allocation1] ss:$2 sm:$0xff] %v5338_v53  ;;  %s4549_s16 = smov 30  }
 0x2ca   : > { %v1430_v23 = vld.sshfl [vmem:[#allocation1 + $0x8] sm:$0xff pattern:$0x75316420]  ;;  %v1429_v63 = vld.sshfl [vmem:[#allocation1] sm:$0xff pattern:$0x75316420] }
 0x2cb   : > { %1435 = vrot.lane.b32.xlu0 %v1430_v23, %s4538_s10  ;;  %1433 = vrot.lane.b32.xlu1 %v1429_v63, %s4538_s10  ;;  %1440 = vst [vmem:[#allocation1] ss:$2 sm:$0xff] %v5341_v11 }
 0x2d2   : > { %v1442_v7 = vld.sshfl [vmem:[#allocation1 + $0x8] sm:$0xff pattern:$0x75316420]  ;;  %v1441_v44 = vld.sshfl [vmem:[#allocation1] sm:$0xff pattern:$0x75316420] }
 0x2d3   : > { %1447 = vrot.lane.b32.xlu1 %v1442_v7, %s4538_s10  ;;  %1445 = vrot.lane.b32.xlu2 %v1441_v44, %s4538_s10  ;;  %1473 = vst [vmem:[#allocation1] ss:$2 sm:$0xff] %v5338_v53  ;;  %s4550_s10 = smov 29  }
 0x2da   : > { %v1475_v33 = vld.sshfl [vmem:[#allocation1 + $0x8] sm:$0xff pattern:$0x75316420]  ;;  %v1474_v29 = vld.sshfl [vmem:[#allocation1] sm:$0xff pattern:$0x75316420] }
 0x2db   : > { %1480 = vrot.lane.b32.xlu2 %v1475_v33, %s4539_s17  ;;  %1478 = vrot.lane.b32.xlu0 %v1474_v29, %s4539_s17  ;;  %1485 = vst [vmem:[#allocation1] ss:$2 sm:$0xff] %v5341_v11 }
 0x2e2   : > { %v1487_v3 = vld.sshfl [vmem:[#allocation1 + $0x8] sm:$0xff pattern:$0x75316420]  ;;  %v1486_v16 = vld.sshfl [vmem:[#allocation1] sm:$0xff pattern:$0x75316420] }
 0x2e3   : > { %1492 = vrot.lane.b32.xlu0 %v1487_v3, %s4539_s17  ;;  %1490 = vrot.lane.b32.xlu1 %v1486_v16, %s4539_s17  ;;  %1518 = vst [vmem:[#allocation1] ss:$2 sm:$0xff] %v5338_v53  ;;  %s4551_s17 = smov 19  }
 0x2ea   : > { %v1520_v50 = vld.sshfl [vmem:[#allocation1 + $0x8] sm:$0xff pattern:$0x75316420]  ;;  %v1519_v61 = vld.sshfl [vmem:[#allocation1] sm:$0xff pattern:$0x75316420] }
 0x2eb   : > { %1525 = vrot.lane.b32.xlu1 %v1520_v50, %s4540_s19  ;;  %1523 = vrot.lane.b32.xlu2 %v1519_v61, %s4540_s19  ;;  %1530 = vst [vmem:[#allocation1] ss:$2 sm:$0xff] %v5341_v11 }
 0x2f2   : > { %v1532_v20 = vld.sshfl [vmem:[#allocation1 + $0x8] sm:$0xff pattern:$0x75316420]  ;;  %v1531_v21 = vld.sshfl [vmem:[#allocation1] sm:$0xff pattern:$0x75316420] }
 0x2f3   : > { %1537 = vrot.lane.b32.xlu2 %v1532_v20, %s4540_s19  ;;  %1535 = vrot.lane.b32.xlu0 %v1531_v21, %s4540_s19  ;;  %1563 = vst [vmem:[#allocation1] ss:$2 sm:$0xff] %v5338_v53  ;;  %s4552_s19 = smov 18  }
 0x2fa   : > { %v1565_v34 = vld.sshfl [vmem:[#allocation1 + $0x8] sm:$0xff pattern:$0x75316420]  ;;  %v1564_v14 = vld.sshfl [vmem:[#allocation1] sm:$0xff pattern:$0x75316420] }
 0x2fb   : > { %1570 = vrot.lane.b32.xlu0 %v1565_v34, %s4541_s30  ;;  %1568 = vrot.lane.b32.xlu1 %v1564_v14, %s4541_s30  ;;  %1575 = vst [vmem:[#allocation1] ss:$2 sm:$0xff] %v5341_v11 }
 0x302   : > { %v1577_v48 = vld.sshfl [vmem:[#allocation1 + $0x8] sm:$0xff pattern:$0x75316420]  ;;  %v1576_v28 = vld.sshfl [vmem:[#allocation1] sm:$0xff pattern:$0x75316420] }
 0x303   : > { %1582 = vrot.lane.b32.xlu1 %v1577_v48, %s4541_s30  ;;  %1580 = vrot.lane.b32.xlu2 %v1576_v28, %s4541_s30  ;;  %1608 = vst [vmem:[#allocation1] ss:$2 sm:$0xff] %v5338_v53  ;;  %s4553_s30 = smov 17  }
 0x30a   : > { %v1610_v51 = vld.sshfl [vmem:[#allocation1 + $0x8] sm:$0xff pattern:$0x75316420]  ;;  %v1609_v6 = vld.sshfl [vmem:[#allocation1] sm:$0xff pattern:$0x75316420] }
 0x30b   : > { %1615 = vrot.lane.b32.xlu2 %v1610_v51, %s4542_s12  ;;  %1613 = vrot.lane.b32.xlu0 %v1609_v6, %s4542_s12  ;;  %1620 = vst [vmem:[#allocation1] ss:$2 sm:$0xff] %v5341_v11 }
 0x312   : > { %v1622_v32 = vld.sshfl [vmem:[#allocation1 + $0x8] sm:$0xff pattern:$0x75316420]  ;;  %v1621_v45 = vld.sshfl [vmem:[#allocation1] sm:$0xff pattern:$0x75316420] }
 0x313   : > { %1627 = vrot.lane.b32.xlu0 %v1622_v32, %s4542_s12  ;;  %1625 = vrot.lane.b32.xlu1 %v1621_v45, %s4542_s12  ;;  %1653 = vst [vmem:[#allocation1] ss:$2 sm:$0xff] %v5338_v53  ;;  %s4554_s12 = smov 16  }
 0x315   : > { %v5365_v26 = vpop.permute.xlu2 %1386 }
 0x31a   : > { %v1655_v1 = vld.sshfl [vmem:[#allocation1 + $0x8] sm:$0xff pattern:$0x75316420]  ;;  %v1654_v42 = vld.sshfl [vmem:[#allocation1] sm:$0xff pattern:$0x75316420] }
 0x31b   : > { %1660 = vrot.lane.b32.xlu1 %v1655_v1, %s4543_s18  ;;  %1658 = vrot.lane.b32.xlu2 %v1654_v42, %s4543_s18  ;;  %1665 = vst [vmem:[#allocation1] ss:$2 sm:$0xff] %v5341_v11 }
 0x31d   : > { %v5372_v58 = vpop.permute.xlu2 %1403 }
 0x322   : > { %v1667_v40 = vld.sshfl [vmem:[#allocation1 + $0x8] sm:$0xff pattern:$0x75316420]  ;;  %v1666_v8 = vld.sshfl [vmem:[#allocation1] sm:$0xff pattern:$0x75316420] }
 0x323   : > { %1672 = vrot.lane.b32.xlu2 %v1667_v40, %s4543_s18  ;;  %1670 = vrot.lane.b32.xlu0 %v1666_v8, %s4543_s18  ;;  %1698 = vst [vmem:[#allocation1] ss:$2 sm:$0xff] %v5338_v53  ;;  %s5460_s18 = sld [smem:[#allocation11]] }
 0x329   : > { %v1378_v36 = vstv %s5460_s18  ;;  %s4565_s18 = smov 114  }
 0x32a   : > { %v1700_v52 = vld.sshfl [vmem:[#allocation1 + $0x8] sm:$0xff pattern:$0x75316420]  ;;  %v1699_v59 = vld.sshfl [vmem:[#allocation1] sm:$0xff pattern:$0x75316420] }
 0x32b   : > { %1705 = vrot.lane.b32.xlu0 %v1700_v52, %s4544_s20  ;;  %1703 = vrot.lane.b32.xlu1 %v1699_v59, %s4544_s20  ;;  %1710 = vst [vmem:[#allocation1] ss:$2 sm:$0xff] %v5341_v11 }
 0x32d   : > { %v5367_v15 = vpop.permute.xlu1 %1388  ;;  %v5377_v63 = vpop.permute.xlu2 %1445 }
 0x332   : > { %v1712_v31 = vld.sshfl [vmem:[#allocation1 + $0x8] sm:$0xff pattern:$0x75316420]  ;;  %v1711_v35 = vld.sshfl [vmem:[#allocation1] sm:$0xff pattern:$0x75316420] }
 0x333   : > { %1717 = vrot.lane.b32.xlu1 %v1712_v31, %s4544_s20  ;;  %1715 = vrot.lane.b32.xlu2 %v1711_v35, %s4544_s20  ;;  %1743 = vst [vmem:[#allocation1] ss:$2 sm:$0xff] %v5338_v53  ;;  %s4555_s20 = smov 15  }
 0x335   : > { %v5370_v47 = vpop.permute.xlu0 %1401  ;;  %v5386_v61 = vpop.permute.xlu2 %1480 }
 0x33a   : > { %v1745_v37 = vld.sshfl [vmem:[#allocation1 + $0x8] sm:$0xff pattern:$0x75316420]  ;;  %v1744_v5 = vld.sshfl [vmem:[#allocation1] sm:$0xff pattern:$0x75316420] }
 0x33b   : > { %1750 = vrot.lane.b32.xlu2 %v1745_v37, %s4545_s22  ;;  %1748 = vrot.lane.b32.xlu0 %v1744_v5, %s4545_s22  ;;  %1755 = vst [vmem:[#allocation1] ss:$2 sm:$0xff] %v5341_v11 }
 0x33d   : > { %v5374_v23 = vpop.permute.xlu1 %1433  ;;  %v5379_v7 = vpop.permute.xlu0 %1435 }
 0x342   : > { %v1757_v4 = vld.sshfl [vmem:[#allocation1 + $0x8] sm:$0xff pattern:$0x75316420]  ;;  %v1756_v46 = vld.sshfl [vmem:[#allocation1] sm:$0xff pattern:$0x75316420] }
 0x343   : > { %1762 = vrot.lane.b32.xlu0 %v1757_v4, %s4545_s22  ;;  %1760 = vrot.lane.b32.xlu1 %v1756_v46, %s4545_s22  ;;  %1788 = vst [vmem:[#allocation1] ss:$2 sm:$0xff] %v5338_v53  ;;  %s4556_s22 = smov 14  }
 0x345   : > { %v5382_v29 = vpop.permute.xlu1 %1447  ;;  %v5391_v14 = vpop.permute.xlu2 %1523 }
 0x34a   : > { %v1790_v13 = vld.sshfl [vmem:[#allocation1 + $0x8] sm:$0xff pattern:$0x75316420]  ;;  %v1789_v41 = vld.sshfl [vmem:[#allocation1] sm:$0xff pattern:$0x75316420] }
 0x34b   : > { %1795 = vrot.lane.b32.xlu1 %v1790_v13, %s4546_s23  ;;  %1793 = vrot.lane.b32.xlu2 %v1789_v41, %s4546_s23  ;;  %1800 = vst [vmem:[#allocation1] ss:$2 sm:$0xff] %v5341_v11 }
 0x34d   : > { %v5384_v3 = vpop.permute.xlu0 %1478  ;;  %v5401_v45 = vpop.permute.xlu2 %1537 }
 0x352   : > { %v1802_v55 = vld.sshfl [vmem:[#allocation1 + $0x8] sm:$0xff pattern:$0x75316420]  ;;  %v1801_v27 = vld.sshfl [vmem:[#allocation1] sm:$0xff pattern:$0x75316420] }
 0x353   : > { %1807 = vrot.lane.b32.xlu2 %v1802_v55, %s4546_s23  ;;  %1805 = vrot.lane.b32.xlu0 %v1801_v27, %s4546_s23  ;;  %1833 = vst [vmem:[#allocation1] ss:$2 sm:$0xff] %v5338_v53  ;;  %s4557_s23 = smov 13  }
 0x355   : > { %v5389_v20 = vpop.permute.xlu1 %1490  ;;  %v5393_v48 = vpop.permute.xlu0 %1492 }
 0x35a   : > { %v1835_v17 = vld.sshfl [vmem:[#allocation1 + $0x8] sm:$0xff pattern:$0x75316420]  ;;  %v1834_v25 = vld.sshfl [vmem:[#allocation1] sm:$0xff pattern:$0x75316420] }
 0x35b   : > { %1840 = vrot.lane.b32.xlu0 %v1835_v17, %s4547_s14  ;;  %1838 = vrot.lane.b32.xlu1 %v1834_v25, %s4547_s14  ;;  %1845 = vst [vmem:[#allocation1] ss:$2 sm:$0xff] %v5341_v11 }
 0x35d   : > { %v5396_v28 = vpop.permute.xlu1 %1525  ;;  %v5406_v8 = vpop.permute.xlu2 %1580 }
 0x362   : > { %v1847_v22 = vld.sshfl [vmem:[#allocation1 + $0x8] sm:$0xff pattern:$0x75316420]  ;;  %v1846_v0 = vld.sshfl [vmem:[#allocation1] sm:$0xff pattern:$0x75316420] }
 0x363   : > { %1852 = vrot.lane.b32.xlu1 %v1847_v22, %s4547_s14  ;;  %1850 = vrot.lane.b32.xlu2 %v1846_v0, %s4547_s14  ;;  %1878 = vst [vmem:[#allocation1] ss:$2 sm:$0xff] %v5338_v53  ;;  %s4558_s14 = smov 3  }
 0x365   : > { %v5398_v32 = vpop.permute.xlu0 %1535  ;;  %v5415_v5 = vpop.permute.xlu2 %1615 }
 0x36a   : > { %v1880_v18 = vld.sshfl [vmem:[#allocation1 + $0x8] sm:$0xff pattern:$0x75316420]  ;;  %v1879_v30 = vld.sshfl [vmem:[#allocation1] sm:$0xff pattern:$0x75316420] }
 0x36b   : > { %1885 = vrot.lane.b32.xlu2 %v1880_v18, %s4548_s15  ;;  %1883 = vrot.lane.b32.xlu0 %v1879_v30, %s4548_s15  ;;  %1890 = vst [vmem:[#allocation1] ss:$2 sm:$0xff] %v5341_v11 }
 0x36d   : > { %v5403_v1 = vpop.permute.xlu1 %1568  ;;  %v5408_v52 = vpop.permute.xlu0 %1570 }
 0x372   : > { %v1892_v2 = vld.sshfl [vmem:[#allocation1 + $0x8] sm:$0xff pattern:$0x75316420]  ;;  %v1891_v56 = vld.sshfl [vmem:[#allocation1] sm:$0xff pattern:$0x75316420] }
 0x373   : > { %1897 = vrot.lane.b32.xlu0 %v1892_v2, %s4548_s15  ;;  %1895 = vrot.lane.b32.xlu1 %v1891_v56, %s4548_s15  ;;  %1923 = vst [vmem:[#allocation1] ss:$2 sm:$0xff] %v5338_v53  ;;  %s4559_s15 = smov 2  }
 0x375   : > { %v5410_v59 = vpop.permute.xlu1 %1582  ;;  %v5420_v41 = vpop.permute.xlu2 %1658 }
 0x37a   : > { %v1925_v44 = vld.sshfl [vmem:[#allocation1 + $0x8] sm:$0xff pattern:$0x75316420]  ;;  %v1924_v33 = vld.sshfl [vmem:[#allocation1] sm:$0xff pattern:$0x75316420] }
 0x37b   : > { %1930 = vrot.lane.b32.xlu1 %v1925_v44, %s4549_s16  ;;  %1928 = vrot.lane.b32.xlu2 %v1924_v33, %s4549_s16  ;;  %1935 = vst [vmem:[#allocation1] ss:$2 sm:$0xff] %v5341_v11 }
 0x37d   : > { %v5413_v37 = vpop.permute.xlu0 %1613  ;;  %v5429_v0 = vpop.permute.xlu2 %1672 }
 0x382   : > { %v1937_v16 = vld.sshfl [vmem:[#allocation1 + $0x8] sm:$0xff pattern:$0x75316420]  ;;  %v1936_v50 = vld.sshfl [vmem:[#allocation1] sm:$0xff pattern:$0x75316420] }
 0x383   : > { %1942 = vrot.lane.b32.xlu2 %v1937_v16, %s4549_s16  ;;  %1940 = vrot.lane.b32.xlu0 %v1936_v50, %s4549_s16  ;;  %1968 = vst [vmem:[#allocation1] ss:$2 sm:$0xff] %v5338_v53  ;;  %s4560_s16 = smov 1  }
 0x385   : > { %v5417_v4 = vpop.permute.xlu1 %1625  ;;  %v5422_v55 = vpop.permute.xlu0 %1627 }
 0x38a   : > { %v1970_v21 = vld.sshfl [vmem:[#allocation1 + $0x8] sm:$0xff pattern:$0x75316420]  ;;  %v1969_v34 = vld.sshfl [vmem:[#allocation1] sm:$0xff pattern:$0x75316420] }
 0x38b   : > { %1975 = vrot.lane.b32.xlu0 %v1970_v21, %s4550_s10  ;;  %1973 = vrot.lane.b32.xlu1 %v1969_v34, %s4550_s10  ;;  %1980 = vst [vmem:[#allocation1] ss:$2 sm:$0xff] %v5341_v11 }
 0x38d   : > { %v5424_v25 = vpop.permute.xlu1 %1660  ;;  %v5434_v56 = vpop.permute.xlu2 %1715 }
 0x392   : > { %v1982_v51 = vld.sshfl [vmem:[#allocation1 + $0x8] sm:$0xff pattern:$0x75316420]  ;;  %v1981_v6 = vld.sshfl [vmem:[#allocation1] sm:$0xff pattern:$0x75316420] }
 0x393   : > { %1987 = vrot.lane.b32.xlu1 %v1982_v51, %s4550_s10  ;;  %1985 = vrot.lane.b32.xlu2 %v1981_v6, %s4550_s10  ;;  %2013 = vst [vmem:[#allocation1] ss:$2 sm:$0xff] %v5338_v53  ;;  %s4561_s10 = smov 127  }
 0x395   : > { %v5427_v22 = vpop.permute.xlu0 %1670  ;;  %v5443_v6 = vpop.permute.xlu2 %1750 }
 0x39a   : > { %v2015_v42 = vld.sshfl [vmem:[#allocation1 + $0x8] sm:$0xff pattern:$0x75316420]  ;;  %v2014_v40 = vld.sshfl [vmem:[#allocation1] sm:$0xff pattern:$0x75316420] }
 0x39b   : > { %2020 = vrot.lane.b32.xlu2 %v2015_v42, %s4551_s17  ;;  %2018 = vrot.lane.b32.xlu0 %v2014_v40, %s4551_s17  ;;  %2025 = vst [vmem:[#allocation1] ss:$2 sm:$0xff] %v5341_v11 }
 0x39d   : > { %v5431_v2 = vpop.permute.xlu1 %1703  ;;  %v5436_v44 = vpop.permute.xlu0 %1705 }
 0x3a2   : > { %v2027_v31 = vld.sshfl [vmem:[#allocation1 + $0x8] sm:$0xff pattern:$0x75316420]  ;;  %v2026_v35 = vld.sshfl [vmem:[#allocation1] sm:$0xff pattern:$0x75316420] }
 0x3a3   : > { %2032 = vrot.lane.b32.xlu0 %v2027_v31, %s4551_s17  ;;  %2030 = vrot.lane.b32.xlu1 %v2026_v35, %s4551_s17  ;;  %2058 = vst [vmem:[#allocation1] ss:$2 sm:$0xff] %v5338_v53  ;;  %s4562_s17 = smov 126  }
 0x3a5   : > { %v5439_v50 = vpop.permute.xlu1 %1717  ;;  %v5450_v35 = vpop.permute.xlu2 %1793 }
 0x3aa   : > { %v2060_v46 = vld.sshfl [vmem:[#allocation1 + $0x8] sm:$0xff pattern:$0x75316420]  ;;  %v2059_v13 = vld.sshfl [vmem:[#allocation1] sm:$0xff pattern:$0x75316420] }
 0x3ab   : > { %2065 = vrot.lane.b32.xlu1 %v2060_v46, %s4552_s19  ;;  %2063 = vrot.lane.b32.xlu2 %v2059_v13, %s4552_s19  ;;  %2070 = vst [vmem:[#allocation1] ss:$2 sm:$0xff] %v5341_v11  ;;  %v6499_v13 = vlaneseq }
 0x3ad   : > { %v5441_v21 = vpop.permute.xlu0 %1748 }
 0x3b2   : > { %v2072_v27 = vld.sshfl [vmem:[#allocation1 + $0x8] sm:$0xff pattern:$0x75316420]  ;;  %v2071_v17 = vld.sshfl [vmem:[#allocation1] sm:$0xff pattern:$0x75316420] }
 0x3b3   : > { %2077 = vrot.lane.b32.xlu2 %v2072_v27, %s4552_s19  ;;  %2075 = vrot.lane.b32.xlu0 %v2071_v17, %s4552_s19  ;;  %2103 = vst [vmem:[#allocation1] ss:$2 sm:$0xff] %v5338_v53  ;;  %v5458_v27 = vand.u32 127, %v6499_v13  ;;  %s4563_s19 = smov 125  }
 0x3b5   : > { %v5448_v42 = vpop.permute.xlu1 %1760  ;;  %v5452_v46 = vpop.permute.xlu0 %1762  ;;  %vm1392_vm9 = vcmp.lt.s32.totalorder %v5458_v27, 51  ;;  %vm1437_vm10 = vcmp.lt.s32.totalorder %v5458_v27, 50  ;;  %vm1482_vm11 = vcmp.lt.s32.totalorder %v5458_v27, 49  ;;  %vm1527_vm12 = vcmp.lt.s32.totalorder %v5458_v27, 48 }
 0x3b6   : > { %v1394_v13 = vsel %vm1392_vm9, %v5367_v15, %v5365_v26  ;;  %v1393_v43 = vsel %vm1392_vm9, %v5365_v26, %v5367_v15  ;;  %v1405_v24 = vsel %vm1392_vm9, %v5370_v47, %v5372_v58  ;;  %v1465_v15 = vperm.slane %v1463_v38, 0 }
 0x3b7   : > { %vm1572_vm13 = vcmp.lt.s32.totalorder %v5458_v27, 47  ;;  %vm1617_vm14 = vcmp.lt.s32.totalorder %v5458_v27, 46  ;;  %vm1662_vm15 = vcmp.lt.s32.totalorder %v5458_v27, 45  ;;  %vm1707_vm0 = vcmp.lt.s32.totalorder %v5458_v27, 35 }
 0x3b8   : > { %vm1752_vm2 = vcmp.lt.s32.totalorder %v5458_v27, 34  ;;  %vm1797_vm3 = vcmp.lt.s32.totalorder %v5458_v27, 33  ;;  %vm1842_vm4 = vcmp.lt.s32.totalorder %v5458_v27, 32  ;;  %vm1887_vm5 = vcmp.lt.s32.totalorder %v5458_v27, 31 }
 0x3b9   : > { %vm1932_vm6 = vcmp.lt.s32.totalorder %v5458_v27, 30  ;;  %vm1977_vm7 = vcmp.lt.s32.totalorder %v5458_v27, 29  ;;  %vm2022_vm8 = vcmp.lt.s32.totalorder %v5458_v27, 19 }
 0x3ba   : > { %v2105_v18 = vld.sshfl [vmem:[#allocation1 + $0x8] sm:$0xff pattern:$0x75316420]  ;;  %v2104_v30 = vld.sshfl [vmem:[#allocation1] sm:$0xff pattern:$0x75316420] }
 0x3bb   : > { %2110 = vrot.lane.b32.xlu0 %v2105_v18, %s4553_s30  ;;  %2108 = vrot.lane.b32.xlu1 %v2104_v30, %s4553_s30  ;;  %2115 = vst [vmem:[#allocation1] ss:$2 sm:$0xff] %v5341_v11  ;;  %v1407_v18 = vld [vmem:[#allocation9] ss:$8 sm:$0x3] }
 0x3bc   : > { %v1418_v30 = vld [vmem:[#allocation9 + $0x61] ss:$8 sm:$0x3] }
 0x3bd   : > { %v5462_v17 = vpop.permute.xlu1 %1795  ;;  %v1420_v10 = vperm.slane %v1418_v30, 0 }
 0x3c2   : > { %v2117_v33 = vld.sshfl [vmem:[#allocation1 + $0x8] sm:$0xff pattern:$0x75316420]  ;;  %v2116_v16 = vld.sshfl [vmem:[#allocation1] sm:$0xff pattern:$0x75316420] }
 0x3c3   : > { %2122 = vrot.lane.b32.xlu1 %v2117_v33, %s4553_s30  ;;  %2120 = vrot.lane.b32.xlu2 %v2116_v16, %s4553_s30  ;;  %2148 = vst [vmem:[#allocation1] ss:$2 sm:$0xff] %v5338_v53  ;;  %s4564_s30 = smov 115  }
 0x3ca   : > { %v2150_v34 = vld.sshfl [vmem:[#allocation1 + $0x8] sm:$0xff pattern:$0x75316420]  ;;  %v2149_v51 = vld.sshfl [vmem:[#allocation1] sm:$0xff pattern:$0x75316420] }
 0x3cb   : > { %2155 = vrot.lane.b32.xlu2 %v2150_v34, %s4554_s12  ;;  %2153 = vrot.lane.b32.xlu0 %v2149_v51, %s4554_s12  ;;  %2160 = vst [vmem:[#allocation1] ss:$2 sm:$0xff] %v5341_v11  ;;  %v1409_v34 = vperm.slane %v1407_v18, 0  ;;  %v1452_v51 = vld [vmem:[#allocation9 + $0x1] ss:$8 sm:$0x3] }
 0x3cc   : > { %v1454_v60 = vperm.slane %v1452_v51, 0  ;;  %v1455_v26 = vperm.slane %v1452_v51, 1  ;;  %v1508_v51 = vld [vmem:[#allocation9 + $0x63] ss:$8 sm:$0x3] }
 0x3cd   : > { %v1413_v12 = vmul.f32 %v1409_v34, %v1394_v13  ;;  %v5490_v62 = vpop.permute.xlu1 %1838  ;;  %v1438_v34 = vsel %vm1437_vm10, %v5374_v23, %v5379_v7 }
 0x3d2   : > { %v2162_v40 = vld.sshfl [vmem:[#allocation1 + $0x8] sm:$0xff pattern:$0x75316420]  ;;  %v2161_v31 = vld.sshfl [vmem:[#allocation1] sm:$0xff pattern:$0x75316420] }
 0x3d3   : > { %2167 = vrot.lane.b32.xlu0 %v2162_v40, %s4554_s12  ;;  %2165 = vrot.lane.b32.xlu1 %v2161_v31, %s4554_s12  ;;  %2193 = vst [vmem:[#allocation1] ss:$2 sm:$0xff] %v5338_v53  ;;  %v5465_v40 = vpop.permute.xlu0 %1805  ;;  %v1410_v31 = vperm.slane %v1407_v18, 1  ;;  %v1406_v18 = vsel %vm1392_vm9, %v5372_v58, %v5370_v47  ;;  %v1439_v47 = vsel %vm1437_vm10, %v5379_v7, %v5374_v23  ;;  %v1500_v58 = vperm.slane %v1497_v54, 1 }
 0x3d4   : > { %v1424_v49 = vmul.f32 %v1420_v10, %v1406_v18  ;;  %v1449_v10 = vsel %vm1437_vm10, %v5377_v63, %v5382_v29  ;;  %v1459_v23 = vmul.f32 %v1455_v26, %v1438_v34  ;;  %v1542_v7 = vld [vmem:[#allocation9 + $0x3] ss:$8 sm:$0x3]  ;;  %v1483_v18 = vsel %vm1482_vm11, %v5384_v3, %v5386_v61 }
 0x3d5   : > { %v1414_v19 = vmul.f32 %v1410_v31, %v1393_v43  ;;  %v1450_v31 = vsel %vm1437_vm10, %v5382_v29, %v5377_v63  ;;  %v1511_v63 = vperm.slane %v1508_v51, 1  ;;  %v1545_v26 = vperm.slane %v1542_v7, 1 }
 0x3d6   : > { %vm2067_vm9 = vcmp.lt.s32.totalorder %v5458_v27, 18  ;;  %vm2112_vm10 = vcmp.lt.s32.totalorder %v5458_v27, 17 }
 0x3d7   : > { %v1416_v54 = vadd.f32 %v1414_v19, %v1378_v36 }
 0x3da   : > { %v2195_v33 = vld.sshfl [vmem:[#allocation1 + $0x8] sm:$0xff pattern:$0x75316420]  ;;  %v2194_v16 = vld.sshfl [vmem:[#allocation1] sm:$0xff pattern:$0x75316420] }
 0x3db   : > { %2200 = vrot.lane.b32.xlu1 %v2195_v33, %s4555_s20  ;;  %2198 = vrot.lane.b32.xlu2 %v2194_v16, %s4555_s20  ;;  %2205 = vst [vmem:[#allocation1] ss:$2 sm:$0xff] %v5341_v11  ;;  %v5479_v33 = vpop.permute.xlu2 %1807  ;;  %v1421_v16 = vperm.slane %v1418_v30, 1  ;;  %v1466_v30 = vperm.slane %v1463_v38, 1  ;;  %v1415_v38 = vadd.f32 %v1413_v12, %v1378_v36  ;;  %v1510_v12 = vperm.slane %v1508_v51, 0 }
 0x3dc   : > { %v1469_v36 = vmul.f32 %v1465_v15, %v1450_v31  ;;  %v1553_v15 = vld [vmem:[#allocation9 + $0x64] ss:$8 sm:$0x3]  ;;  %v5537_v31 = vpop.permute.xlu1 %1852 }
 0x3dd   : > { %v1425_v13 = vmul.f32 %v1421_v16, %v1405_v24  ;;  %v1458_v24 = vmul.f32 %v1454_v60, %v1439_v47  ;;  %v1426_v16 = vadd.f32 %v1424_v49, %v1415_v38  ;;  %v1470_v60 = vmul.f32 %v1466_v30, %v1449_v10  ;;  %v1587_v38 = vld [vmem:[#allocation9 + $0x4] ss:$8 sm:$0x3]  ;;  %v1598_v10 = vld [vmem:[#allocation9 + $0x65] ss:$8 sm:$0x3] }
 0x3de   : > { %v1494_v49 = vsel %vm1482_vm11, %v5389_v20, %v5393_v48  ;;  %v1529_v30 = vsel %vm1527_vm12, %v5396_v28, %v5391_v14 }
 0x3df   : > { %v1427_v19 = vadd.f32 %v1425_v13, %v1416_v54  ;;  %v1460_v34 = vadd.f32 %v1458_v24, %v1426_v16  ;;  %v1504_v13 = vmul.f32 %v1500_v58, %v1483_v18  ;;  %v1555_v58 = vperm.slane %v1553_v15, 0 }
 0x3e0   : > { %v1556_v24 = vperm.slane %v1553_v15, 1  ;;  %v1540_v18 = vsel %vm1527_vm12, %v5401_v45, %v5398_v32  ;;  %v1584_v15 = vsel %vm1572_vm13, %v5406_v8, %v5410_v59 }
 0x3e1   : > { %v1461_v47 = vadd.f32 %v1459_v23, %v1427_v19  ;;  %v1471_v54 = vadd.f32 %v1469_v36, %v1460_v34  ;;  %v1632_v19 = vld [vmem:[#allocation9 + $0x5] ss:$8 sm:$0x3]  ;;  %v1559_v34 = vmul.f32 %v1555_v58, %v1540_v18  ;;  %v1629_v18 = vsel %vm1617_vm14, %v5417_v4, %v5422_v55 }
 0x3e2   : > { %v2207_v9 = vld.sshfl [vmem:[#allocation1 + $0x8] sm:$0xff pattern:$0x75316420]  ;;  %v2206_v43 = vld.sshfl [vmem:[#allocation1] sm:$0xff pattern:$0x75316420] }
 0x3e3   : > { %2212 = vrot.lane.b32.xlu2 %v2207_v9, %s4555_s20  ;;  %2210 = vrot.lane.b32.xlu0 %v2206_v43, %s4555_s20  ;;  %2238 = vst [vmem:[#allocation1] ss:$2 sm:$0xff] %v5338_v53  ;;  %v1484_v9 = vsel %vm1482_vm11, %v5386_v61, %v5384_v3  ;;  %v5520_v29 = vpop.permute.xlu2 %1850  ;;  %v5522_v43 = vpop.permute.xlu0 %1840  ;;  %v1495_v3 = vsel %vm1482_vm11, %v5393_v48, %v5389_v20  ;;  %v1544_v61 = vperm.slane %v1542_v7, 0  ;;  %vm2157_vm11 = vcmp.lt.s32.totalorder %v5458_v27, 16  ;;  %s4566_s20 = smov 113  }
 0x3e4   : > { %6500 = vst [vmem:[#allocation33_spill] sm:$0xff] %v5520_v29  ;;  %v1503_v51 = vmul.f32 %v1499_v39, %v1484_v9  ;;  %v1472_v57 = vadd.f32 %v1470_v60, %v1461_v47  ;;  %v1514_v29 = vmul.f32 %v1510_v12, %v1495_v3  ;;  %v1515_v20 = vmul.f32 %v1511_v63, %v1494_v49 }
 0x3e5   : > { %v1528_v39 = vsel %vm1527_vm12, %v5391_v14, %v5396_v28  ;;  %v1548_v16 = vmul.f32 %v1544_v61, %v1529_v30  ;;  %v1539_v14 = vsel %vm1527_vm12, %v5398_v32, %v5401_v45  ;;  %v1589_v28 = vperm.slane %v1587_v38, 0  ;;  %v1643_v61 = vld [vmem:[#allocation9 + $0x66] ss:$8 sm:$0x3] }
 0x3e6   : > { %v1505_v23 = vadd.f32 %v1503_v51, %v1471_v54  ;;  %v1506_v12 = vadd.f32 %v1504_v13, %v1472_v57  ;;  %v1590_v9 = vperm.slane %v1587_v38, 1  ;;  %v1600_v63 = vperm.slane %v1598_v10, 0 }
 0x3e7   : > { %v1549_v57 = vmul.f32 %v1545_v26, %v1528_v39  ;;  %v1601_v3 = vperm.slane %v1598_v10, 1  ;;  %v1573_v47 = vsel %vm1572_vm13, %v5403_v1, %v5408_v52  ;;  %v1574_v32 = vsel %vm1572_vm13, %v5408_v52, %v5403_v1  ;;  %v1677_v52 = vld [vmem:[#allocation9 + $0x6] ss:$8 sm:$0x3]  ;;  %v5576_v10 = vpop.permute.xlu1 %1895 }
 0x3e8   : > { %v1516_v60 = vadd.f32 %v1514_v29, %v1505_v23  ;;  %v1517_v49 = vadd.f32 %v1515_v20, %v1506_v12  ;;  %v1560_v51 = vmul.f32 %v1556_v24, %v1539_v14  ;;  %v1634_v26 = vperm.slane %v1632_v19, 0 }
 0x3e9   : > { %v1635_v13 = vperm.slane %v1632_v19, 1  ;;  %v1585_v30 = vsel %vm1572_vm13, %v5410_v59, %v5406_v8  ;;  %v1645_v38 = vperm.slane %v1643_v61, 0  ;;  %v1646_v1 = vperm.slane %v1643_v61, 1 }
 0x3ea   : > { %v2240_v48 = vld.sshfl [vmem:[#allocation1 + $0x8] sm:$0xff pattern:$0x75316420]  ;;  %v2239_v7 = vld.sshfl [vmem:[#allocation1] sm:$0xff pattern:$0x75316420]  ;;  %v1550_v29 = vadd.f32 %v1548_v16, %v1516_v60  ;;  %v1551_v54 = vadd.f32 %v1549_v57, %v1517_v49  ;;  %v1593_v20 = vmul.f32 %v1589_v28, %v1574_v32  ;;  %v1618_v24 = vsel %vm1617_vm14, %v5413_v37, %v5415_v5 }
 0x3eb   : > { %2245 = vrot.lane.b32.xlu0 %v2240_v48, %s4556_s22  ;;  %2243 = vrot.lane.b32.xlu1 %v2239_v7, %s4556_s22  ;;  %2250 = vst [vmem:[#allocation1] ss:$2 sm:$0xff] %v5341_v11  ;;  %v5555_v36 = vpop.permute.xlu0 %1883  ;;  %v5566_v45 = vpop.permute.xlu2 %1885  ;;  %v1594_v48 = vmul.f32 %v1590_v9, %v1573_v47  ;;  %v1619_v8 = vsel %vm1617_vm14, %v5415_v5, %v5413_v37  ;;  %v1688_v16 = vld [vmem:[#allocation9 + $0x67] ss:$8 sm:$0x3]  ;;  %v1679_v5 = vperm.slane %v1677_v52, 0 }
 0x3ec   : > { %v1561_v58 = vadd.f32 %v1559_v34, %v1550_v29  ;;  %v1562_v59 = vadd.f32 %v1560_v51, %v1551_v54  ;;  %v1604_v23 = vmul.f32 %v1600_v63, %v1585_v30  ;;  %v1605_v12 = vmul.f32 %v1601_v3, %v1584_v15  ;;  %v1722_v60 = vld [vmem:[#allocation9 + $0x7] ss:$8 sm:$0x3]  ;;  %v1733_v29 = vld [vmem:[#allocation9 + $0x70] ss:$8 sm:$0x3] }
 0x3ed   : > { %v1630_v37 = vsel %vm1617_vm14, %v5422_v55, %v5417_v4  ;;  %v1680_v14 = vperm.slane %v1677_v52, 1  ;;  %v1638_v19 = vmul.f32 %v1634_v26, %v1619_v8  ;;  %v1639_v63 = vmul.f32 %v1635_v13, %v1618_v24 }
 0x3ee   : > { %v1595_v28 = vadd.f32 %v1593_v20, %v1561_v58  ;;  %v1596_v9 = vadd.f32 %v1594_v48, %v1562_v59  ;;  %v1663_v49 = vsel %vm1662_vm15, %v5420_v41, %v5424_v25  ;;  %v1664_v57 = vsel %vm1662_vm15, %v5424_v25, %v5420_v41  ;;  %v1767_v41 = vld [vmem:[#allocation9 + $0x10] ss:$8 sm:$0x3] }
 0x3ef   : > { %v1690_v3 = vperm.slane %v1688_v16, 0  ;;  %v1649_v47 = vmul.f32 %v1645_v38, %v1630_v37  ;;  %v1650_v32 = vmul.f32 %v1646_v1, %v1629_v18  ;;  %v1691_v51 = vperm.slane %v1688_v16, 1  ;;  %v1812_v16 = vld [vmem:[#allocation9 + $0x11] ss:$8 sm:$0x3] }
 0x3f0   : > { %v1606_v55 = vadd.f32 %v1604_v23, %v1595_v28  ;;  %v1607_v34 = vadd.f32 %v1605_v12, %v1596_v9  ;;  %v1675_v26 = vsel %vm1662_vm15, %v5429_v0, %v5427_v22  ;;  %v1724_v13 = vperm.slane %v1722_v60, 0 }
 0x3f1   : > { %v1683_v30 = vmul.f32 %v1679_v5, %v1664_v57  ;;  %v1684_v52 = vmul.f32 %v1680_v14, %v1663_v49  ;;  %v1674_v38 = vsel %vm1662_vm15, %v5427_v22, %v5429_v0  ;;  %v1725_v1 = vperm.slane %v1722_v60, 1  ;;  %v1778_v0 = vld [vmem:[#allocation9 + $0x71] ss:$8 sm:$0x3] }
 0x3f2   : > { %v2252_v7 = vld.sshfl [vmem:[#allocation1 + $0x8] sm:$0xff pattern:$0x75316420]  ;;  %v2251_v39 = vld.sshfl [vmem:[#allocation1] sm:$0xff pattern:$0x75316420]  ;;  %v1640_v25 = vadd.f32 %v1638_v19, %v1606_v55  ;;  %v1641_v15 = vadd.f32 %v1639_v63, %v1607_v34  ;;  %v1694_v8 = vmul.f32 %v1690_v3, %v1675_v26  ;;  %v1709_v22 = vsel %vm1707_vm0, %v5436_v44, %v5431_v2 }
 0x3f3   : > { %2257 = vrot.lane.b32.xlu1 %v2252_v7, %s4556_s22  ;;  %2255 = vrot.lane.b32.xlu2 %v2251_v39, %s4556_s22  ;;  %2283 = vst [vmem:[#allocation1] ss:$2 sm:$0xff] %v5338_v53  ;;  %v5606_v61 = vpop.permute.xlu2 %1928  ;;  %v5608_v4 = vpop.permute.xlu0 %1897  ;;  %v1735_v48 = vperm.slane %v1733_v29, 0  ;;  %v1736_v7 = vperm.slane %v1733_v29, 1  ;;  %v1708_v59 = vsel %vm1707_vm0, %v5431_v2, %v5436_v44  ;;  %v1769_v23 = vperm.slane %v1767_v41, 0  ;;  %s4567_s22 = smov 112  }
 0x3f4   : > { %v5619_v39 = vpop.permute.xlu1 %1930  ;;  %v1651_v58 = vadd.f32 %v1649_v47, %v1640_v25  ;;  %v1652_v24 = vadd.f32 %v1650_v32, %v1641_v15  ;;  %v1770_v12 = vperm.slane %v1767_v41, 1  ;;  %v1695_v5 = vmul.f32 %v1691_v51, %v1674_v38  ;;  %v1823_v55 = vld [vmem:[#allocation9 + $0x72] ss:$8 sm:$0x3] }
 0x3f5   : > { %v1720_v14 = vsel %vm1707_vm0, %v5439_v50, %v5434_v56  ;;  %v1728_v28 = vmul.f32 %v1724_v13, %v1709_v22  ;;  %v1719_v9 = vsel %vm1707_vm0, %v5434_v56, %v5439_v50  ;;  %v1780_v2 = vperm.slane %v1778_v0, 0 }
 0x3f6   : > { %v1685_v18 = vadd.f32 %v1683_v30, %v1651_v58  ;;  %v1686_v37 = vadd.f32 %v1684_v52, %v1652_v24  ;;  %v1781_v44 = vperm.slane %v1778_v0, 1  ;;  %v1729_v60 = vmul.f32 %v1725_v1, %v1708_v59  ;;  %v1857_v52 = vld [vmem:[#allocation9 + $0x12] ss:$8 sm:$0x3] }
 0x3f7   : > { %v1814_v49 = vperm.slane %v1812_v16, 0  ;;  %v1739_v57 = vmul.f32 %v1735_v48, %v1720_v14  ;;  %v1753_v3 = vsel %vm1752_vm2, %v5441_v21, %v5443_v6  ;;  %v1754_v56 = vsel %vm1752_vm2, %v5443_v6, %v5441_v21  ;;  %v1902_v59 = vld [vmem:[#allocation9 + $0x13] ss:$8 sm:$0x3] }
 0x3f8   : > { %v1696_v63 = vadd.f32 %v1694_v8, %v1685_v18  ;;  %v1815_v50 = vperm.slane %v1812_v16, 1  ;;  %v1697_v47 = vadd.f32 %v1695_v5, %v1686_v37  ;;  %v1740_v32 = vmul.f32 %v1736_v7, %v1719_v9  ;;  %v1868_v7 = vld [vmem:[#allocation9 + $0x73] ss:$8 sm:$0x3] }
 0x3f9   : > { %v1764_v13 = vsel %vm1752_vm2, %v5448_v42, %v5452_v46  ;;  %v1765_v41 = vsel %vm1752_vm2, %v5452_v46, %v5448_v42  ;;  %v1773_v25 = vmul.f32 %v1769_v23, %v1754_v56  ;;  %v1774_v15 = vmul.f32 %v1770_v12, %v1753_v3  ;;  %v1913_v18 = vld [vmem:[#allocation9 + $0x74] ss:$8 sm:$0x3] }
 0x3fa   : > { %v2285_v54 = vld.sshfl [vmem:[#allocation1 + $0x8] sm:$0xff pattern:$0x75316420]  ;;  %v2284_v20 = vld.sshfl [vmem:[#allocation1] sm:$0xff pattern:$0x75316420]  ;;  %v1730_v26 = vadd.f32 %v1728_v28, %v1696_v63  ;;  %v1731_v6 = vadd.f32 %v1729_v60, %v1697_v47  ;;  %v1799_v42 = vsel %vm1797_vm3, %v5462_v17, %v5450_v35  ;;  %v1784_v1 = vmul.f32 %v1780_v2, %v1765_v41 }
 0x3fb   : > { %2290 = vrot.lane.b32.xlu2 %v2285_v54, %s4557_s23  ;;  %2288 = vrot.lane.b32.xlu0 %v2284_v20, %s4557_s23  ;;  %2295 = vst [vmem:[#allocation1] ss:$2 sm:$0xff] %v5341_v11  ;;  %v5641_v19 = vpop.permute.xlu0 %1940  ;;  %v5652_v34 = vpop.permute.xlu2 %1942  ;;  %v1825_v30 = vperm.slane %v1823_v55, 0  ;;  %v1798_v20 = vsel %vm1797_vm3, %v5450_v35, %v5462_v17  ;;  %v1826_v46 = vperm.slane %v1823_v55, 1  ;;  %v1785_v48 = vmul.f32 %v1781_v44, %v1764_v13  ;;  %v6501_v56 = vld [vmem:[#allocation33_spill] sm:$0xff] }
 0x3fc   : > { %v1741_v54 = vadd.f32 %v1739_v57, %v1730_v26  ;;  %v1742_v38 = vadd.f32 %v1740_v32, %v1731_v6  ;;  %v1809_v58 = vsel %vm1797_vm3, %v5465_v40, %v5479_v33  ;;  %v1810_v24 = vsel %vm1797_vm3, %v5479_v33, %v5465_v40  ;;  %v1958_v6 = vld [vmem:[#allocation9 + $0x75] ss:$8 sm:$0x3] }
 0x3fd   : > { %v5662_v21 = vpop.permute.xlu1 %1973  ;;  %v1859_v8 = vperm.slane %v1857_v52, 0  ;;  %v1818_v17 = vmul.f32 %v1814_v49, %v1799_v42  ;;  %v1819_v0 = vmul.f32 %v1815_v50, %v1798_v20  ;;  %v1860_v23 = vperm.slane %v1857_v52, 1 }
 0x3fe   : > { %v1775_v22 = vadd.f32 %v1773_v25, %v1741_v54  ;;  %v1776_v35 = vadd.f32 %v1774_v15, %v1742_v38  ;;  %v1844_v12 = vsel %vm1842_vm4, %v5522_v43, %v5490_v62  ;;  %v1870_v16 = vperm.slane %v1868_v7, 0 }
 0x3ff   : > { %v1829_v33 = vmul.f32 %v1825_v30, %v1810_v24  ;;  %v1830_v28 = vmul.f32 %v1826_v46, %v1809_v58  ;;  %v1843_v44 = vsel %vm1842_vm4, %v5490_v62, %v5522_v43  ;;  %v1871_v63 = vperm.slane %v1868_v7, 1  ;;  %v1947_v62 = vld [vmem:[#allocation9 + $0x14] ss:$8 sm:$0x3] }
 0x400   : > { %v1786_v14 = vadd.f32 %v1784_v1, %v1775_v22  ;;  %v1787_v40 = vadd.f32 %v1785_v48, %v1776_v35  ;;  %v1904_v60 = vperm.slane %v1902_v59, 0  ;;  %v1863_v3 = vmul.f32 %v1859_v8, %v1844_v12 }
 0x401   : > { %v1855_v50 = vsel %vm1842_vm4, %v5537_v31, %v6501_v56  ;;  %v1854_v43 = vsel %vm1842_vm4, %v6501_v56, %v5537_v31  ;;  %v1905_v55 = vperm.slane %v1902_v59, 1  ;;  %v1915_v47 = vperm.slane %v1913_v18, 0 }
 0x402   : > { %v2297_v29 = vld.sshfl [vmem:[#allocation1 + $0x8] sm:$0xff pattern:$0x75316420]  ;;  %v2296_v51 = vld.sshfl [vmem:[#allocation1] sm:$0xff pattern:$0x75316420]  ;;  %v1820_v49 = vadd.f32 %v1818_v17, %v1786_v14  ;;  %v1821_v57 = vadd.f32 %v1819_v0, %v1787_v40  ;;  %v1864_v13 = vmul.f32 %v1860_v23, %v1843_v44  ;;  %v1889_v41 = vsel %vm1887_vm5, %v5566_v45, %v5555_v36 }
 0x403   : > { %2302 = vrot.lane.b32.xlu0 %v2297_v29, %s4557_s23  ;;  %2300 = vrot.lane.b32.xlu1 %v2296_v51, %s4557_s23  ;;  %2328 = vst [vmem:[#allocation1] ss:$2 sm:$0xff] %v5338_v53  ;;  %v5688_v37 = vpop.permute.xlu2 %1985  ;;  %v5690_v5 = vpop.permute.xlu0 %1975  ;;  %v1916_v32 = vperm.slane %v1913_v18, 1  ;;  %v1874_v25 = vmul.f32 %v1870_v16, %v1855_v50  ;;  %v1888_v15 = vsel %vm1887_vm5, %v5555_v36, %v5566_v45  ;;  %v1949_v31 = vperm.slane %v1947_v62, 0  ;;  %s4568_s23 = smov 111  }
 0x404   : > { %v1831_v51 = vadd.f32 %v1829_v33, %v1820_v49  ;;  %v1832_v26 = vadd.f32 %v1830_v28, %v1821_v57  ;;  %v1875_v52 = vmul.f32 %v1871_v63, %v1854_v43  ;;  %v1900_v54 = vsel %vm1887_vm5, %v5608_v4, %v5576_v10  ;;  %v1992_v36 = vld [vmem:[#allocation9 + $0x15] ss:$8 sm:$0x3]  ;;  %v2003_v0 = vld [vmem:[#allocation9 + $0x76] ss:$8 sm:$0x3] }
 0x405   : > { %v1988_v29 = vpop.permute.xlu1 %1987  ;;  %v1950_v20 = vperm.slane %v1947_v62, 1  ;;  %v1908_v42 = vmul.f32 %v1904_v60, %v1889_v41  ;;  %v1899_v46 = vsel %vm1887_vm5, %v5576_v10, %v5608_v4  ;;  %v1960_v38 = vperm.slane %v1958_v6, 0  ;;  %v2048_v50 = vld [vmem:[#allocation9 + $0x77] ss:$8 sm:$0x3] }
 0x406   : > { %v1865_v30 = vadd.f32 %v1863_v3, %v1831_v51  ;;  %v1961_v1 = vperm.slane %v1958_v6, 1  ;;  %v1866_v48 = vadd.f32 %v1864_v13, %v1832_v26  ;;  %v1909_v7 = vmul.f32 %v1905_v55, %v1888_v15 }
 0x407   : > { %v1919_v22 = vmul.f32 %v1915_v47, %v1900_v54  ;;  %v1934_v35 = vsel %vm1932_vm6, %v5619_v39, %v5606_v61  ;;  %v1920_v4 = vmul.f32 %v1916_v32, %v1899_v46  ;;  %v1933_v59 = vsel %vm1932_vm6, %v5606_v61, %v5619_v39  ;;  %v2037_v61 = vld [vmem:[#allocation9 + $0x16] ss:$8 sm:$0x3]  ;;  %v2093_v54 = vld [vmem:[#allocation9 + $0x80] ss:$8 sm:$0x3] }
 0x408   : > { %v1876_v8 = vadd.f32 %v1874_v25, %v1865_v30  ;;  %v1877_v10 = vadd.f32 %v1875_v52, %v1866_v48  ;;  %v1945_v12 = vsel %vm1932_vm6, %v5652_v34, %v5641_v19  ;;  %v1994_v16 = vperm.slane %v1992_v36, 0  ;;  %v2082_v25 = vld [vmem:[#allocation9 + $0x17] ss:$8 sm:$0x3] }
 0x409   : > { %v1995_v18 = vperm.slane %v1992_v36, 1  ;;  %v1953_v33 = vmul.f32 %v1949_v31, %v1934_v35  ;;  %v1944_v28 = vsel %vm1932_vm6, %v5641_v19, %v5652_v34  ;;  %v1979_v44 = vsel %vm1977_vm7, %v5690_v5, %v5662_v21 }
 0x40a   : > { %v2330_v9 = vld.sshfl [vmem:[#allocation1 + $0x8] sm:$0xff pattern:$0x75316420]  ;;  %v2329_v2 = vld.sshfl [vmem:[#allocation1] sm:$0xff pattern:$0x75316420]  ;;  %v1910_v23 = vadd.f32 %v1908_v42, %v1876_v8  ;;  %v1911_v40 = vadd.f32 %v1909_v7, %v1877_v10  ;;  %v1964_v49 = vmul.f32 %v1960_v38, %v1945_v12  ;;  %v1978_v57 = vsel %vm1977_vm7, %v5662_v21, %v5690_v5 }
 0x40b   : > { %2335 = vrot.lane.b32.xlu1 %v2330_v9, %s4558_s14  ;;  %2333 = vrot.lane.b32.xlu2 %v2329_v2, %s4558_s14  ;;  %2340 = vst [vmem:[#allocation1] ss:$2 sm:$0xff] %v5341_v11  ;;  %v2021_v17 = vpop.permute.xlu2 %2020  ;;  %v2005_v9 = vperm.slane %v2003_v0, 0  ;;  %v1954_v2 = vmul.f32 %v1950_v20, %v1933_v59  ;;  %v2006_v63 = vperm.slane %v2003_v0, 1  ;;  %v1965_v19 = vmul.f32 %v1961_v1, %v1944_v28 }
 0x40c   : > { %v1921_v39 = vadd.f32 %v1919_v22, %v1910_v23  ;;  %v1922_v60 = vadd.f32 %v1920_v4, %v1911_v40  ;;  %v1990_v34 = vsel %vm1977_vm7, %v1988_v29, %v5688_v37  ;;  %v2039_v3 = vperm.slane %v2037_v61, 0 }
 0x40d   : > { %v2019_v45 = vpop.permute.xlu0 %2018  ;;  %v2040_v56 = vperm.slane %v2037_v61, 1  ;;  %v1998_v43 = vmul.f32 %v1994_v16, %v1979_v44  ;;  %v1989_v55 = vsel %vm1977_vm7, %v5688_v37, %v1988_v29  ;;  %v1999_v21 = vmul.f32 %v1995_v18, %v1978_v57 }
 0x40e   : > { %v1955_v62 = vadd.f32 %v1953_v33, %v1921_v39  ;;  %v1956_v51 = vadd.f32 %v1954_v2, %v1922_v60  ;;  %v2024_v26 = vsel %vm2022_vm8, %v2021_v17, %v2019_v45  ;;  %v2009_v6 = vmul.f32 %v2005_v9, %v1990_v34 }
 0x40f   : > { %v2023_v37 = vsel %vm2022_vm8, %v2019_v45, %v2021_v17  ;;  %v2050_v29 = vperm.slane %v2048_v50, 0  ;;  %v2010_v31 = vmul.f32 %v2006_v63, %v1989_v55  ;;  %v2051_v30 = vperm.slane %v2048_v50, 1  ;;  %v2127_v63 = vld [vmem:[#allocation9 + $0x20] ss:$8 sm:$0x3] }
 0x410   : > { %v1966_v41 = vadd.f32 %v1964_v49, %v1955_v62  ;;  %v1967_v15 = vadd.f32 %v1965_v19, %v1956_v51  ;;  %v2043_v42 = vmul.f32 %v2039_v3, %v2024_v26  ;;  %v2044_v36 = vmul.f32 %v2040_v56, %v2023_v37 }
 0x411   : > { %v2084_v45 = vperm.slane %v2082_v25, 0  ;;  %v2085_v48 = vperm.slane %v2082_v25, 1  ;;  %v2095_v8 = vperm.slane %v2093_v54, 0  ;;  %v2096_v0 = vperm.slane %v2093_v54, 1 }
 0x412   : > { %v2342_v58 = vld.sshfl [vmem:[#allocation1 + $0x8] sm:$0xff pattern:$0x75316420]  ;;  %v2341_v24 = vld.sshfl [vmem:[#allocation1] sm:$0xff pattern:$0x75316420]  ;;  %v2000_v20 = vadd.f32 %v1998_v43, %v1966_v41  ;;  %v2001_v1 = vadd.f32 %v1999_v21, %v1967_v15 }
 0x413   : > { %2347 = vrot.lane.b32.xlu2 %v2342_v58, %s4558_s14  ;;  %2345 = vrot.lane.b32.xlu0 %v2341_v24, %s4558_s14  ;;  %2373 = vst [vmem:[#allocation1] ss:$2 sm:$0xff] %v5338_v53  ;;  %v2064_v5 = vpop.permute.xlu2 %2063  ;;  %v2129_v34 = vperm.slane %v2127_v63, 0  ;;  %v2130_v3 = vperm.slane %v2127_v63, 1  ;;  %vm2202_vm12 = vcmp.lt.s32.totalorder %v5458_v27, 15  ;;  %vm2247_vm13 = vcmp.lt.s32.totalorder %v5458_v27, 14 }
 0x414   : > { %v2011_v7 = vadd.f32 %v2009_v6, %v2000_v20  ;;  %v2012_v22 = vadd.f32 %v2010_v31, %v2001_v1  ;;  %vm2292_vm14 = vcmp.lt.s32.totalorder %v5458_v27, 13  ;;  %vm2337_vm15 = vcmp.lt.s32.totalorder %v5458_v27, 3  ;;  %s4569_s14 = smov 110  }
 0x415   : > { %v2031_v14 = vpop.permute.xlu1 %2030  ;;  %v2033_v13 = vpop.permute.xlu0 %2032  ;;  %vm2382_vm0 = vcmp.lt.s32.totalorder %v5458_v27, 2  ;;  %vm2427_vm2 = vcmp.lt.s32.totalorder %v5458_v27, 1  ;;  %vm2504_vm3 = vcmp.lt.s32.totalorder %v5458_v27, 127  ;;  %vm2549_vm4 = vcmp.lt.s32.totalorder %v5458_v27, 126 }
 0x416   : > { %v2034_v46 = vsel %vm2022_vm8, %v2031_v14, %v2033_v13  ;;  %v2035_v38 = vsel %vm2022_vm8, %v2033_v13, %v2031_v14  ;;  %v2045_v10 = vadd.f32 %v2043_v42, %v2011_v7  ;;  %v2046_v23 = vadd.f32 %v2044_v36, %v2012_v22 }
 0x417   : > { %v2054_v35 = vmul.f32 %v2050_v29, %v2035_v38  ;;  %v2055_v17 = vmul.f32 %v2051_v30, %v2034_v46  ;;  %v2172_v30 = vld [vmem:[#allocation9 + $0x21] ss:$8 sm:$0x3]  ;;  %vm2594_vm5 = vcmp.lt.s32.totalorder %v5458_v27, 125  ;;  %vm2639_vm6 = vcmp.lt.s32.totalorder %v5458_v27, 115 }
 0x418   : > { %v2174_v46 = vperm.slane %v2172_v30, 0  ;;  %v2175_v38 = vperm.slane %v2172_v30, 1  ;;  %vm2684_vm7 = vcmp.lt.s32.totalorder %v5458_v27, 114  ;;  %vm2729_vm8 = vcmp.lt.s32.totalorder %v5458_v27, 113 }
 0x419   : > { %v2056_v14 = vadd.f32 %v2054_v35, %v2045_v10  ;;  %v2057_v40 = vadd.f32 %v2055_v17, %v2046_v23 }
 0x41a   : > { %v2375_v47 = vld.sshfl [vmem:[#allocation1 + $0x8] sm:$0xff pattern:$0x75316420]  ;;  %v2374_v32 = vld.sshfl [vmem:[#allocation1] sm:$0xff pattern:$0x75316420] }
 0x41b   : > { %2380 = vrot.lane.b32.xlu0 %v2375_v47, %s4559_s15  ;;  %2378 = vrot.lane.b32.xlu1 %v2374_v32, %s4559_s15  ;;  %2385 = vst [vmem:[#allocation1] ss:$2 sm:$0xff] %v5341_v11  ;;  %v2078_v18 = vpop.permute.xlu2 %2077  ;;  %v2138_v32 = vld [vmem:[#allocation9 + $0x81] ss:$8 sm:$0x3] }
 0x41c   : > { %v2140_v41 = vperm.slane %v2138_v32, 0  ;;  %v2141_v6 = vperm.slane %v2138_v32, 1 }
 0x41d   : > { %v2066_v52 = vpop.permute.xlu1 %2065 }
 0x41e   : > { %v2068_v58 = vsel %vm2067_vm9, %v2064_v5, %v2066_v52  ;;  %v2069_v24 = vsel %vm2067_vm9, %v2066_v52, %v2064_v5 }
 0x41f   : > { %v2088_v12 = vmul.f32 %v2084_v45, %v2069_v24  ;;  %v2089_v16 = vmul.f32 %v2085_v48, %v2068_v58  ;;  %v2183_v24 = vld [vmem:[#allocation9 + $0x82] ss:$8 sm:$0x3] }
 0x420   : > { %v2186_v10 = vperm.slane %v2183_v24, 1 }
 0x421   : > { %v2090_v61 = vadd.f32 %v2088_v12, %v2056_v14  ;;  %v2091_v39 = vadd.f32 %v2089_v16, %v2057_v40  ;;  %v2217_v14 = vld [vmem:[#allocation9 + $0x22] ss:$8 sm:$0x3] }
 0x422   : > { %v2387_v4 = vld.sshfl [vmem:[#allocation1 + $0x8] sm:$0xff pattern:$0x75316420]  ;;  %v2386_v59 = vld.sshfl [vmem:[#allocation1] sm:$0xff pattern:$0x75316420] }
 0x423   : > { %2392 = vrot.lane.b32.xlu1 %v2387_v4, %s4559_s15  ;;  %2390 = vrot.lane.b32.xlu2 %v2386_v59, %s4559_s15  ;;  %2418 = vst [vmem:[#allocation1] ss:$2 sm:$0xff] %v5338_v53  ;;  %v2121_v13 = vpop.permute.xlu2 %2120  ;;  %s4570_s15 = smov 109  }
 0x425   : > { %v2076_v33 = vpop.permute.xlu0 %2075 }
 0x426   : > { %v2079_v28 = vsel %vm2067_vm9, %v2076_v33, %v2078_v18  ;;  %v2080_v9 = vsel %vm2067_vm9, %v2078_v18, %v2076_v33  ;;  %vm2774_vm9 = vcmp.lt.s32.totalorder %v5458_v27, 112 }
 0x427   : > { %v2099_v2 = vmul.f32 %v2095_v8, %v2080_v9  ;;  %v2100_v44 = vmul.f32 %v2096_v0, %v2079_v28  ;;  %v2185_v0 = vperm.slane %v2183_v24, 0 }
 0x429   : > { %v2101_v60 = vadd.f32 %v2099_v2, %v2090_v61  ;;  %v2102_v49 = vadd.f32 %v2100_v44, %v2091_v39  ;;  %v2219_v39 = vperm.slane %v2217_v14, 0  ;;  %v2220_v2 = vperm.slane %v2217_v14, 1 }
 0x42a   : > { %v2420_v57 = vld.sshfl [vmem:[#allocation1 + $0x8] sm:$0xff pattern:$0x75316420]  ;;  %v2419_v19 = vld.sshfl [vmem:[#allocation1] sm:$0xff pattern:$0x75316420] }
 0x42b   : > { %2425 = vrot.lane.b32.xlu2 %v2420_v57, %s4560_s16  ;;  %2423 = vrot.lane.b32.xlu0 %v2419_v19, %s4560_s16  ;;  %2430 = vst [vmem:[#allocation1] ss:$2 sm:$0xff] %v5341_v11  ;;  %v2156_v1 = vpop.permute.xlu2 %2155  ;;  %v2228_v19 = vld [vmem:[#allocation9 + $0x83] ss:$8 sm:$0x3] }
 0x42d   : > { %v2111_v56 = vpop.permute.xlu0 %2110  ;;  %v2109_v50 = vpop.permute.xlu1 %2108 }
 0x42e   : > { %v2113_v62 = vsel %vm2112_vm10, %v2109_v50, %v2111_v56  ;;  %v2114_v43 = vsel %vm2112_vm10, %v2111_v56, %v2109_v50 }
 0x42f   : > { %v2133_v55 = vmul.f32 %v2129_v34, %v2114_v43  ;;  %v2134_v47 = vmul.f32 %v2130_v3, %v2113_v62  ;;  %v2230_v62 = vperm.slane %v2228_v19, 0  ;;  %v2231_v43 = vperm.slane %v2228_v19, 1 }
 0x431   : > { %v2135_v51 = vadd.f32 %v2133_v55, %v2101_v60  ;;  %v2136_v21 = vadd.f32 %v2134_v47, %v2102_v49 }
 0x432   : > { %v2432_v5 = vld.sshfl [vmem:[#allocation1 + $0x8] sm:$0xff pattern:$0x75316420]  ;;  %v2431_v26 = vld.sshfl [vmem:[#allocation1] sm:$0xff pattern:$0x75316420] }
 0x433   : > { %2437 = vrot.lane.b32.xlu0 %v2432_v5, %s4560_s16  ;;  %2470 = vst [vmem:[#allocation1] ss:$2 sm:$0xff] %v5338_v53  ;;  %2435 = vrot.lane.b32.xlu1 %v2431_v26, %s4560_s16  ;;  %v2262_v26 = vld [vmem:[#allocation9 + $0x23] ss:$8 sm:$0x3]  ;;  %s4571_s16 = smov 99  }
 0x435   : > { %v2123_v37 = vpop.permute.xlu1 %2122  ;;  %v2199_v61 = vpop.permute.xlu2 %2198 }
 0x436   : > { %v2124_v29 = vsel %vm2112_vm10, %v2121_v13, %v2123_v37  ;;  %v2125_v25 = vsel %vm2112_vm10, %v2123_v37, %v2121_v13  ;;  %vm2819_vm10 = vcmp.lt.s32.totalorder %v5458_v27, 111 }
 0x437   : > { %v2144_v15 = vmul.f32 %v2140_v41, %v2125_v25  ;;  %v2145_v31 = vmul.f32 %v2141_v6, %v2124_v29  ;;  %v2264_v29 = vperm.slane %v2262_v26, 0  ;;  %v2265_v25 = vperm.slane %v2262_v26, 1 }
 0x439   : > { %v2146_v52 = vadd.f32 %v2144_v15, %v2135_v51  ;;  %v2147_v54 = vadd.f32 %v2145_v31, %v2136_v21 }
 0x43a   : > { %v5794_v20 = vld.sshfl [vmem:[#allocation1] sm:$0xff pattern:$0x75316420]  ;;  %v5796_v42 = vld.sshfl [vmem:[#allocation1 + $0x8] sm:$0xff pattern:$0x75316420] }
 0x43b   : > { %2486 = vst [vmem:[#allocation1] ss:$2 sm:$0xff] %v5341_v11 }
 0x43d   : > { %v2154_v36 = vpop.permute.xlu0 %2153  ;;  %v2213_v55 = vpop.permute.xlu2 %2212 }
 0x43e   : > { %v2158_v45 = vsel %vm2157_vm11, %v2154_v36, %v2156_v1  ;;  %v2159_v48 = vsel %vm2157_vm11, %v2156_v1, %v2154_v36 }
 0x43f   : > { %v2178_v7 = vmul.f32 %v2174_v46, %v2159_v48  ;;  %v2179_v58 = vmul.f32 %v2175_v38, %v2158_v45  ;;  %v2273_v38 = vld [vmem:[#allocation9 + $0x84] ss:$8 sm:$0x3] }
 0x440   : > { %v2276_v24 = vperm.slane %v2273_v38, 1 }
 0x441   : > { %v2180_v8 = vadd.f32 %v2178_v7, %v2146_v52  ;;  %v2181_v22 = vadd.f32 %v2179_v58, %v2147_v54  ;;  %v2275_v58 = vperm.slane %v2273_v38, 0 }
 0x442   : > { %v5804_v35 = vld.sshfl [vmem:[#allocation1] sm:$0xff pattern:$0x75316420]  ;;  %v5806_v17 = vld.sshfl [vmem:[#allocation1 + $0x8] sm:$0xff pattern:$0x75316420] }
 0x443   : > { %2495 = vst [vmem:[#allocation1] ss:$2 sm:$0xff] %v5338_v53 }
 0x445   : > { %v2168_v4 = vpop.permute.xlu0 %2167  ;;  %v2166_v59 = vpop.permute.xlu1 %2165 }
 0x446   : > { %v2169_v23 = vsel %vm2157_vm11, %v2166_v59, %v2168_v4  ;;  %v2170_v12 = vsel %vm2157_vm11, %v2168_v4, %v2166_v59  ;;  %v2307_v59 = vld [vmem:[#allocation9 + $0x24] ss:$8 sm:$0x3]  ;;  %vm2864_vm11 = vcmp.lt.s32.totalorder %v5458_v27, 110 }
 0x447   : > { %v2189_v16 = vmul.f32 %v2185_v0, %v2170_v12  ;;  %v2190_v18 = vmul.f32 %v2186_v10, %v2169_v23  ;;  %v2309_v14 = vperm.slane %v2307_v59, 0 }
 0x449   : > { %v2191_v40 = vadd.f32 %v2189_v16, %v2180_v8  ;;  %v2192_v33 = vadd.f32 %v2190_v18, %v2181_v22 }
 0x44a   : > { %v2497_v28 = vld.sshfl [vmem:[#allocation1 + $0x8] sm:$0xff pattern:$0x75316420]  ;;  %v2496_v9 = vld.sshfl [vmem:[#allocation1] sm:$0xff pattern:$0x75316420] }
 0x44b   : > { %2502 = vrot.lane.b32.xlu1 %v2497_v28, %s4561_s10  ;;  %2500 = vrot.lane.b32.xlu2 %v2496_v9, %s4561_s10  ;;  %2507 = vst [vmem:[#allocation1] ss:$2 sm:$0xff] %v5341_v11 }
 0x44d   : > { %v2201_v44 = vpop.permute.xlu1 %2200  ;;  %v2256_v7 = vpop.permute.xlu2 %2255 }
 0x44e   : > { %v2203_v63 = vsel %vm2202_vm12, %v2199_v61, %v2201_v44  ;;  %v2204_v60 = vsel %vm2202_vm12, %v2201_v44, %v2199_v61  ;;  %v2318_v44 = vld [vmem:[#allocation9 + $0x85] ss:$8 sm:$0x3] }
 0x44f   : > { %v2223_v49 = vmul.f32 %v2219_v39, %v2204_v60  ;;  %v2224_v57 = vmul.f32 %v2220_v2, %v2203_v63  ;;  %v2320_v19 = vperm.slane %v2318_v44, 0 }
 0x451   : > { %v2225_v34 = vadd.f32 %v2223_v49, %v2191_v40  ;;  %v2226_v3 = vadd.f32 %v2224_v57, %v2192_v33  ;;  %v2310_v40 = vperm.slane %v2307_v59, 1 }
 0x452   : > { %v2509_v56 = vld.sshfl [vmem:[#allocation1 + $0x8] sm:$0xff pattern:$0x75316420]  ;;  %v2508_v50 = vld.sshfl [vmem:[#allocation1] sm:$0xff pattern:$0x75316420] }
 0x453   : > { %2514 = vrot.lane.b32.xlu2 %v2509_v56, %s4561_s10  ;;  %2512 = vrot.lane.b32.xlu0 %v2508_v50, %s4561_s10  ;;  %2540 = vst [vmem:[#allocation1] ss:$2 sm:$0xff] %v5338_v53  ;;  %s4572_s10 = smov 98  }
 0x455   : > { %v2211_v47 = vpop.permute.xlu0 %2210  ;;  %v2291_v33 = vpop.permute.xlu2 %2290 }
 0x456   : > { %v2214_v32 = vsel %vm2202_vm12, %v2211_v47, %v2213_v55  ;;  %v2215_v51 = vsel %vm2202_vm12, %v2213_v55, %v2211_v47  ;;  %v2352_v47 = vld [vmem:[#allocation9 + $0x25] ss:$8 sm:$0x3]  ;;  %vm2909_vm12 = vcmp.lt.s32.totalorder %v5458_v27, 109 }
 0x457   : > { %v2234_v21 = vmul.f32 %v2230_v62, %v2215_v51  ;;  %v2235_v5 = vmul.f32 %v2231_v43, %v2214_v32 }
 0x459   : > { %v2236_v13 = vadd.f32 %v2234_v21, %v2225_v34  ;;  %v2237_v41 = vadd.f32 %v2235_v5, %v2226_v3  ;;  %v2321_v34 = vperm.slane %v2318_v44, 1 }
 0x45a   : > { %v2542_v6 = vld.sshfl [vmem:[#allocation1 + $0x8] sm:$0xff pattern:$0x75316420]  ;;  %v2541_v37 = vld.sshfl [vmem:[#allocation1] sm:$0xff pattern:$0x75316420] }
 0x45b   : > { %2547 = vrot.lane.b32.xlu0 %v2542_v6, %s4562_s17  ;;  %2545 = vrot.lane.b32.xlu1 %v2541_v37, %s4562_s17  ;;  %2552 = vst [vmem:[#allocation1] ss:$2 sm:$0xff] %v5341_v11 }
 0x45d   : > { %v2246_v15 = vpop.permute.xlu0 %2245  ;;  %v2244_v31 = vpop.permute.xlu1 %2243 }
 0x45e   : > { %v2248_v30 = vsel %vm2247_vm13, %v2244_v31, %v2246_v15  ;;  %v2249_v52 = vsel %vm2247_vm13, %v2246_v15, %v2244_v31  ;;  %v2363_v31 = vld [vmem:[#allocation9 + $0x86] ss:$8 sm:$0x3] }
 0x45f   : > { %v2268_v54 = vmul.f32 %v2264_v29, %v2249_v52  ;;  %v2269_v46 = vmul.f32 %v2265_v25, %v2248_v30  ;;  %v2365_v38 = vperm.slane %v2363_v31, 0 }
 0x461   : > { %v2270_v1 = vadd.f32 %v2268_v54, %v2236_v13  ;;  %v2271_v36 = vadd.f32 %v2269_v46, %v2237_v41  ;;  %v2354_v13 = vperm.slane %v2352_v47, 0  ;;  %v2355_v41 = vperm.slane %v2352_v47, 1 }
 0x462   : > { %v2554_v45 = vld.sshfl [vmem:[#allocation1 + $0x8] sm:$0xff pattern:$0x75316420]  ;;  %v2553_v48 = vld.sshfl [vmem:[#allocation1] sm:$0xff pattern:$0x75316420] }
 0x463   : > { %2559 = vrot.lane.b32.xlu1 %v2554_v45, %s4562_s17  ;;  %2557 = vrot.lane.b32.xlu2 %v2553_v48, %s4562_s17  ;;  %2585 = vst [vmem:[#allocation1] ss:$2 sm:$0xff] %v5338_v53  ;;  %s4573_s17 = smov 97  }
 0x465   : > { %v2258_v8 = vpop.permute.xlu1 %2257  ;;  %v2334_v26 = vpop.permute.xlu2 %2333 }
 0x466   : > { %v2259_v22 = vsel %vm2247_vm13, %v2256_v7, %v2258_v8  ;;  %v2260_v0 = vsel %vm2247_vm13, %v2258_v8, %v2256_v7  ;;  %v2397_v8 = vld [vmem:[#allocation9 + $0x26] ss:$8 sm:$0x3]  ;;  %vm2954_vm13 = vcmp.lt.s32.totalorder %v5458_v27, 99 }
 0x467   : > { %v2279_v10 = vmul.f32 %v2275_v58, %v2260_v0  ;;  %v2280_v4 = vmul.f32 %v2276_v24, %v2259_v22  ;;  %v2399_v59 = vperm.slane %v2397_v8, 0 }
 0x469   : > { %v2281_v23 = vadd.f32 %v2279_v10, %v2270_v1  ;;  %v2282_v12 = vadd.f32 %v2280_v4, %v2271_v36  ;;  %v2366_v1 = vperm.slane %v2363_v31, 1 }
 0x46a   : > { %v2587_v16 = vld.sshfl [vmem:[#allocation1 + $0x8] sm:$0xff pattern:$0x75316420]  ;;  %v2586_v18 = vld.sshfl [vmem:[#allocation1] sm:$0xff pattern:$0x75316420] }
 0x46b   : > { %2592 = vrot.lane.b32.xlu2 %v2587_v16, %s4563_s19  ;;  %2590 = vrot.lane.b32.xlu0 %v2586_v18, %s4563_s19  ;;  %2597 = vst [vmem:[#allocation1] ss:$2 sm:$0xff] %v5341_v11 }
 0x46d   : > { %v2289_v28 = vpop.permute.xlu0 %2288  ;;  %v2348_v36 = vpop.permute.xlu2 %2347 }
 0x46e   : > { %v2293_v9 = vsel %vm2292_vm14, %v2289_v28, %v2291_v33  ;;  %v2294_v61 = vsel %vm2292_vm14, %v2291_v33, %v2289_v28  ;;  %v2408_v28 = vld [vmem:[#allocation9 + $0x87] ss:$8 sm:$0x3] }
 0x46f   : > { %v2313_v39 = vmul.f32 %v2309_v14, %v2294_v61  ;;  %v2314_v2 = vmul.f32 %v2310_v40, %v2293_v9 }
 0x471   : > { %v2315_v63 = vadd.f32 %v2313_v39, %v2281_v23  ;;  %v2316_v60 = vadd.f32 %v2314_v2, %v2282_v12  ;;  %v2400_v23 = vperm.slane %v2397_v8, 1 }
 0x472   : > { %v2599_v49 = vld.sshfl [vmem:[#allocation1 + $0x8] sm:$0xff pattern:$0x75316420]  ;;  %v2598_v57 = vld.sshfl [vmem:[#allocation1] sm:$0xff pattern:$0x75316420] }
 0x473   : > { %2604 = vrot.lane.b32.xlu0 %v2599_v49, %s4563_s19  ;;  %2602 = vrot.lane.b32.xlu1 %v2598_v57, %s4563_s19  ;;  %2630 = vst [vmem:[#allocation1] ss:$2 sm:$0xff] %v5338_v53  ;;  %s4574_s19 = smov 96  }
 0x475   : > { %v2303_v3 = vpop.permute.xlu0 %2302  ;;  %v2301_v56 = vpop.permute.xlu1 %2300 }
 0x476   : > { %v2304_v50 = vsel %vm2292_vm14, %v2301_v56, %v2303_v3  ;;  %v2305_v62 = vsel %vm2292_vm14, %v2303_v3, %v2301_v56  ;;  %v2442_v56 = vld [vmem:[#allocation9 + $0x27] ss:$8 sm:$0x3]  ;;  %vm2999_vm14 = vcmp.lt.s32.totalorder %v5458_v27, 98 }
 0x477   : > { %v2324_v43 = vmul.f32 %v2320_v19, %v2305_v62  ;;  %v2325_v55 = vmul.f32 %v2321_v34, %v2304_v50  ;;  %v2444_v47 = vperm.slane %v2442_v56, 0 }
 0x479   : > { %v2326_v32 = vadd.f32 %v2324_v43, %v2315_v63  ;;  %v2327_v51 = vadd.f32 %v2325_v55, %v2316_v60  ;;  %v2410_v63 = vperm.slane %v2408_v28, 0  ;;  %v2411_v60 = vperm.slane %v2408_v28, 1 }
 0x47a   : > { %v2632_v21 = vld.sshfl [vmem:[#allocation1 + $0x8] sm:$0xff pattern:$0x75316420]  ;;  %v2631_v5 = vld.sshfl [vmem:[#allocation1] sm:$0xff pattern:$0x75316420] }
 0x47b   : > { %2637 = vrot.lane.b32.xlu1 %v2632_v21, %s4564_s30  ;;  %2635 = vrot.lane.b32.xlu2 %v2631_v5, %s4564_s30  ;;  %2642 = vst [vmem:[#allocation1] ss:$2 sm:$0xff] %v5341_v11 }
 0x47d   : > { %v2336_v6 = vpop.permute.xlu1 %2335  ;;  %v2391_v44 = vpop.permute.xlu2 %2390 }
 0x47e   : > { %v2338_v37 = vsel %vm2337_vm15, %v2334_v26, %v2336_v6  ;;  %v2339_v29 = vsel %vm2337_vm15, %v2336_v6, %v2334_v26  ;;  %v2453_v6 = vld [vmem:[#allocation9 + $0x90] ss:$8 sm:$0x3] }
 0x47f   : > { %v2358_v25 = vmul.f32 %v2354_v13, %v2339_v29  ;;  %v2359_v15 = vmul.f32 %v2355_v41, %v2338_v37  ;;  %v2455_v31 = vperm.slane %v2453_v6, 0 }
 0x481   : > { %v2360_v30 = vadd.f32 %v2358_v25, %v2326_v32  ;;  %v2361_v52 = vadd.f32 %v2359_v15, %v2327_v51  ;;  %v2445_v32 = vperm.slane %v2442_v56, 1 }
 0x482   : > { %v2644_v54 = vld.sshfl [vmem:[#allocation1 + $0x8] sm:$0xff pattern:$0x75316420]  ;;  %v2643_v46 = vld.sshfl [vmem:[#allocation1] sm:$0xff pattern:$0x75316420] }
 0x483   : > { %2649 = vrot.lane.b32.xlu2 %v2644_v54, %s4564_s30  ;;  %2647 = vrot.lane.b32.xlu0 %v2643_v46, %s4564_s30  ;;  %2675 = vst [vmem:[#allocation1] ss:$2 sm:$0xff] %v5338_v53  ;;  %s4575_s30 = smov 95  }
 0x485   : > { %v2346_v45 = vpop.permute.xlu0 %2345  ;;  %v2426_v51 = vpop.permute.xlu2 %2425 }
 0x486   : > { %v2349_v48 = vsel %vm2337_vm15, %v2346_v45, %v2348_v36  ;;  %v2350_v7 = vsel %vm2337_vm15, %v2348_v36, %v2346_v45  ;;  %vm3044_vm15 = vcmp.lt.s32.totalorder %v5458_v27, 97 }
 0x487   : > { %v2369_v58 = vmul.f32 %v2365_v38, %v2350_v7  ;;  %v2370_v24 = vmul.f32 %v2366_v1, %v2349_v48 }
 0x489   : > { %v2371_v22 = vadd.f32 %v2369_v58, %v2360_v30  ;;  %v2372_v0 = vadd.f32 %v2370_v24, %v2361_v52  ;;  %v2456_v30 = vperm.slane %v2453_v6, 1  ;;  %v2464_v24 = vld [vmem:[#allocation9 + $0x30] ss:$8 sm:$0x3] }
 0x48a   : > { %v2677_v10 = vld.sshfl [vmem:[#allocation1 + $0x8] sm:$0xff pattern:$0x75316420]  ;;  %v2676_v4 = vld.sshfl [vmem:[#allocation1] sm:$0xff pattern:$0x75316420] }
 0x48b   : > { %2682 = vrot.lane.b32.xlu0 %v2677_v10, %s4565_s18  ;;  %2680 = vrot.lane.b32.xlu1 %v2676_v4, %s4565_s18  ;;  %2687 = vst [vmem:[#allocation1] ss:$2 sm:$0xff] %v5341_v11  ;;  %v2467_v10 = vperm.slane %v2464_v24, 1  ;;  %v2480_v4 = vld [vmem:[#allocation9 + $0x91] ss:$8 sm:$0x3] }
 0x48d   : > { %v2381_v12 = vpop.permute.xlu0 %2380  ;;  %v2379_v16 = vpop.permute.xlu1 %2378 }
 0x48e   : > { %v2383_v18 = vsel %vm2382_vm0, %v2379_v16, %v2381_v12  ;;  %v2384_v14 = vsel %vm2382_vm0, %v2381_v12, %v2379_v16  ;;  %v2483_v12 = vperm.slane %v2480_v4, 1 }
 0x48f   : > { %v2403_v40 = vmul.f32 %v2399_v59, %v2384_v14  ;;  %v2404_v33 = vmul.f32 %v2400_v23, %v2383_v18  ;;  %v2482_v59 = vperm.slane %v2480_v4, 0  ;;  %v2519_v23 = vld [vmem:[#allocation9 + $0x31] ss:$8 sm:$0x3]  ;;  %v2476_v18 = vmul.f32 %v5796_v42, %v2467_v10 }
 0x490   : > { %v2609_v4 = vld [vmem:[#allocation9 + $0x33] ss:$8 sm:$0x3] }
 0x491   : > { %v2405_v9 = vadd.f32 %v2403_v40, %v2371_v22  ;;  %v2406_v61 = vadd.f32 %v2404_v33, %v2372_v0  ;;  %v2466_v0 = vperm.slane %v2464_v24, 0 }
 0x492   : > { %v2689_v39 = vld.sshfl [vmem:[#allocation1 + $0x8] sm:$0xff pattern:$0x75316420]  ;;  %v2688_v2 = vld.sshfl [vmem:[#allocation1] sm:$0xff pattern:$0x75316420] }
 0x493   : > { %2694 = vrot.lane.b32.xlu1 %v2689_v39, %s4565_s18  ;;  %2692 = vrot.lane.b32.xlu2 %v2688_v2, %s4565_s18  ;;  %2720 = vst [vmem:[#allocation1] ss:$2 sm:$0xff] %v5338_v53  ;;  %v2475_v16 = vmul.f32 %v5794_v20, %v2466_v0  ;;  %v2522_v39 = vperm.slane %v2519_v23, 1  ;;  %v2491_v2 = vmul.f32 %v5804_v35, %v2482_v59  ;;  %s4576_s18 = smov 94  }
 0x494   : > { %v2492_v20 = vmul.f32 %v5806_v17, %v2483_v12 }
 0x495   : > { %v2393_v49 = vpop.permute.xlu1 %2392 }
 0x496   : > { %v2394_v57 = vsel %vm2382_vm0, %v2391_v44, %v2393_v49  ;;  %v2395_v19 = vsel %vm2382_vm0, %v2393_v49, %v2391_v44  ;;  %vm3089_vm0 = vcmp.lt.s32.totalorder %v5458_v27, 96 }
 0x497   : > { %v2414_v34 = vmul.f32 %v2410_v63, %v2395_v19  ;;  %v2415_v3 = vmul.f32 %v2411_v60, %v2394_v57 }
 0x499   : > { %v2416_v50 = vadd.f32 %v2414_v34, %v2405_v9  ;;  %v2417_v62 = vadd.f32 %v2415_v3, %v2406_v61  ;;  %v2521_v61 = vperm.slane %v2519_v23, 0  ;;  %v2530_v34 = vld [vmem:[#allocation9 + $0x92] ss:$8 sm:$0x3] }
 0x49a   : > { %v2722_v43 = vld.sshfl [vmem:[#allocation1 + $0x8] sm:$0xff pattern:$0x75316420]  ;;  %v2721_v55 = vld.sshfl [vmem:[#allocation1] sm:$0xff pattern:$0x75316420] }
 0x49b   : > { %2727 = vrot.lane.b32.xlu2 %v2722_v43, %s4566_s20  ;;  %2725 = vrot.lane.b32.xlu0 %v2721_v55, %s4566_s20  ;;  %2732 = vst [vmem:[#allocation1] ss:$2 sm:$0xff] %v5341_v11  ;;  %v2532_v35 = vperm.slane %v2530_v34, 0  ;;  %v2533_v17 = vperm.slane %v2530_v34, 1 }
 0x49d   : > { %v2424_v21 = vpop.permute.xlu0 %2423 }
 0x49e   : > { %v2428_v5 = vsel %vm2427_vm2, %v2424_v21, %v2426_v51  ;;  %v2429_v26 = vsel %vm2427_vm2, %v2426_v51, %v2424_v21 }
 0x49f   : > { %v2448_v13 = vmul.f32 %v2444_v47, %v2429_v26  ;;  %v2449_v41 = vmul.f32 %v2445_v32, %v2428_v5  ;;  %v2564_v5 = vld [vmem:[#allocation9 + $0x32] ss:$8 sm:$0x3] }
 0x4a1   : > { %v2450_v37 = vadd.f32 %v2448_v13, %v2416_v50  ;;  %v2451_v29 = vadd.f32 %v2449_v41, %v2417_v62 }
 0x4a2   : > { %v2734_v25 = vld.sshfl [vmem:[#allocation1 + $0x8] sm:$0xff pattern:$0x75316420]  ;;  %v2733_v15 = vld.sshfl [vmem:[#allocation1] sm:$0xff pattern:$0x75316420] }
 0x4a3   : > { %2739 = vrot.lane.b32.xlu0 %v2734_v25, %s4566_s20  ;;  %2737 = vrot.lane.b32.xlu1 %v2733_v15, %s4566_s20  ;;  %2765 = vst [vmem:[#allocation1] ss:$2 sm:$0xff] %v5338_v53  ;;  %s4577_s20 = smov 93  }
 0x4a5   : > { %v2438_v52 = vpop.permute.xlu0 %2437  ;;  %v2436_v54 = vpop.permute.xlu1 %2435 }
 0x4a6   : > { %v2439_v46 = vsel %vm2427_vm2, %v2436_v54, %v2438_v52  ;;  %v2440_v38 = vsel %vm2427_vm2, %v2438_v52, %v2436_v54  ;;  %v2501_v9 = vpop.permute.xlu2 %2500  ;;  %vm3134_vm2 = vcmp.lt.s32.totalorder %v5458_v27, 95 }
 0x4a7   : > { %v2459_v1 = vmul.f32 %v2455_v31, %v2440_v38  ;;  %v2460_v36 = vmul.f32 %v2456_v30, %v2439_v46  ;;  %v2575_v46 = vld [vmem:[#allocation9 + $0x93] ss:$8 sm:$0x3] }
 0x4a9   : > { %v2461_v45 = vadd.f32 %v2459_v1, %v2450_v37  ;;  %v2462_v48 = vadd.f32 %v2460_v36, %v2451_v29  ;;  %v2566_v37 = vperm.slane %v2564_v5, 0  ;;  %v2567_v29 = vperm.slane %v2564_v5, 1 }
 0x4aa   : > { %v2767_v7 = vld.sshfl [vmem:[#allocation1 + $0x8] sm:$0xff pattern:$0x75316420]  ;;  %v2766_v58 = vld.sshfl [vmem:[#allocation1] sm:$0xff pattern:$0x75316420] }
 0x4ab   : > { %2772 = vrot.lane.b32.xlu1 %v2767_v7, %s4567_s22  ;;  %2770 = vrot.lane.b32.xlu2 %v2766_v58, %s4567_s22  ;;  %2777 = vst [vmem:[#allocation1] ss:$2 sm:$0xff] %v5341_v11  ;;  %v2477_v33 = vadd.f32 %v2475_v16, %v2461_v45  ;;  %v2478_v28 = vadd.f32 %v2476_v18, %v2462_v48  ;;  %v2577_v7 = vperm.slane %v2575_v46, 0  ;;  %v2578_v58 = vperm.slane %v2575_v46, 1 }
 0x4ac   : > { %v2611_v18 = vperm.slane %v2609_v4, 0 }
 0x4ad   : > { %v2493_v60 = vadd.f32 %v2491_v2, %v2477_v33  ;;  %v2494_v49 = vadd.f32 %v2492_v20, %v2478_v28  ;;  %v2620_v2 = vld [vmem:[#allocation9 + $0x94] ss:$8 sm:$0x3] }
 0x4ae   : > { %v2515_v43 = vpop.permute.xlu2 %2514 }
 0x4b2   : > { %v2779_v8 = vld.sshfl [vmem:[#allocation1 + $0x8] sm:$0xff pattern:$0x75316420]  ;;  %v2778_v22 = vld.sshfl [vmem:[#allocation1] sm:$0xff pattern:$0x75316420] }
 0x4b3   : > { %2784 = vrot.lane.b32.xlu2 %v2779_v8, %s4567_s22  ;;  %2782 = vrot.lane.b32.xlu0 %v2778_v22, %s4567_s22  ;;  %2810 = vst [vmem:[#allocation1] ss:$2 sm:$0xff] %v5338_v53  ;;  %s4578_s22 = smov 83  }
 0x4ba   : > { %v2812_v14 = vld.sshfl [vmem:[#allocation1 + $0x8] sm:$0xff pattern:$0x75316420]  ;;  %v2811_v40 = vld.sshfl [vmem:[#allocation1] sm:$0xff pattern:$0x75316420] }
 0x4bb   : > { %2817 = vrot.lane.b32.xlu0 %v2812_v14, %s4568_s23  ;;  %2815 = vrot.lane.b32.xlu1 %v2811_v40, %s4568_s23  ;;  %2822 = vst [vmem:[#allocation1] ss:$2 sm:$0xff] %v5341_v11  ;;  %v2612_v14 = vperm.slane %v2609_v4, 1 }
 0x4bd   : > { %v2503_v44 = vpop.permute.xlu1 %2502  ;;  %v2558_v48 = vpop.permute.xlu2 %2557 }
 0x4be   : > { %v2505_v42 = vsel %vm2504_vm3, %v2501_v9, %v2503_v44  ;;  %v2506_v63 = vsel %vm2504_vm3, %v2503_v44, %v2501_v9 }
 0x4bf   : > { %v2525_v57 = vmul.f32 %v2521_v61, %v2505_v42  ;;  %v2526_v19 = vmul.f32 %v2522_v39, %v2506_v63 }
 0x4c1   : > { %v2527_v3 = vadd.f32 %v2525_v57, %v2493_v60  ;;  %v2528_v56 = vadd.f32 %v2526_v19, %v2494_v49  ;;  %v2622_v60 = vperm.slane %v2620_v2, 0  ;;  %v2623_v49 = vperm.slane %v2620_v2, 1 }
 0x4c2   : > { %v2824_v50 = vld.sshfl [vmem:[#allocation1 + $0x8] sm:$0xff pattern:$0x75316420]  ;;  %v2823_v62 = vld.sshfl [vmem:[#allocation1] sm:$0xff pattern:$0x75316420] }
 0x4c3   : > { %2829 = vrot.lane.b32.xlu1 %v2824_v50, %s4568_s23  ;;  %2827 = vrot.lane.b32.xlu2 %v2823_v62, %s4568_s23  ;;  %2855 = vst [vmem:[#allocation1] ss:$2 sm:$0xff] %v5338_v53  ;;  %v2654_v62 = vld [vmem:[#allocation9 + $0x34] ss:$8 sm:$0x3]  ;;  %s4579_s23 = smov 82  }
 0x4c5   : > { %v2513_v55 = vpop.permute.xlu0 %2512  ;;  %v2593_v40 = vpop.permute.xlu2 %2592 }
 0x4c6   : > { %v2516_v47 = vsel %vm2504_vm3, %v2513_v55, %v2515_v43  ;;  %v2517_v32 = vsel %vm2504_vm3, %v2515_v43, %v2513_v55  ;;  %vm3179_vm3 = vcmp.lt.s32.totalorder %v5458_v27, 94 }
 0x4c7   : > { %v2536_v51 = vmul.f32 %v2532_v35, %v2516_v47  ;;  %v2537_v21 = vmul.f32 %v2533_v17, %v2517_v32  ;;  %v2656_v32 = vperm.slane %v2654_v62, 0 }
 0x4c9   : > { %v2538_v26 = vadd.f32 %v2536_v51, %v2527_v3  ;;  %v2539_v13 = vadd.f32 %v2537_v21, %v2528_v56  ;;  %v2657_v51 = vperm.slane %v2654_v62, 1 }
 0x4ca   : > { %v2857_v41 = vld.sshfl [vmem:[#allocation1 + $0x8] sm:$0xff pattern:$0x75316420]  ;;  %v2856_v6 = vld.sshfl [vmem:[#allocation1] sm:$0xff pattern:$0x75316420] }
 0x4cb   : > { %2862 = vrot.lane.b32.xlu2 %v2857_v41, %s4569_s14  ;;  %2860 = vrot.lane.b32.xlu0 %v2856_v6, %s4569_s14  ;;  %2867 = vst [vmem:[#allocation1] ss:$2 sm:$0xff] %v5341_v11  ;;  %v2665_v6 = vld [vmem:[#allocation9 + $0x95] ss:$8 sm:$0x3] }
 0x4cd   : > { %v2548_v25 = vpop.permute.xlu0 %2547  ;;  %v2546_v15 = vpop.permute.xlu1 %2545 }
 0x4ce   : > { %v2550_v31 = vsel %vm2549_vm4, %v2546_v15, %v2548_v25  ;;  %v2551_v30 = vsel %vm2549_vm4, %v2548_v25, %v2546_v15 }
 0x4cf   : > { %v2570_v52 = vmul.f32 %v2566_v37, %v2550_v31  ;;  %v2571_v54 = vmul.f32 %v2567_v29, %v2551_v30  ;;  %v2667_v31 = vperm.slane %v2665_v6, 0  ;;  %v2668_v30 = vperm.slane %v2665_v6, 1 }
 0x4d1   : > { %v2572_v38 = vadd.f32 %v2570_v52, %v2538_v26  ;;  %v2573_v1 = vadd.f32 %v2571_v54, %v2539_v13 }
 0x4d2   : > { %v2869_v36 = vld.sshfl [vmem:[#allocation1 + $0x8] sm:$0xff pattern:$0x75316420]  ;;  %v2868_v45 = vld.sshfl [vmem:[#allocation1] sm:$0xff pattern:$0x75316420] }
 0x4d3   : > { %2874 = vrot.lane.b32.xlu0 %v2869_v36, %s4569_s14  ;;  %2872 = vrot.lane.b32.xlu1 %v2868_v45, %s4569_s14  ;;  %2900 = vst [vmem:[#allocation1] ss:$2 sm:$0xff] %v5338_v53  ;;  %v2699_v45 = vld [vmem:[#allocation9 + $0x35] ss:$8 sm:$0x3]  ;;  %s4580_s14 = smov 81  }
 0x4d5   : > { %v2560_v24 = vpop.permute.xlu1 %2559  ;;  %v2636_v47 = vpop.permute.xlu2 %2635 }
 0x4d6   : > { %v2561_v8 = vsel %vm2549_vm4, %v2558_v48, %v2560_v24  ;;  %v2562_v22 = vsel %vm2549_vm4, %v2560_v24, %v2558_v48  ;;  %vm3224_vm4 = vcmp.lt.s32.totalorder %v5458_v27, 93 }
 0x4d7   : > { %v2581_v0 = vmul.f32 %v2577_v7, %v2561_v8  ;;  %v2582_v10 = vmul.f32 %v2578_v58, %v2562_v22  ;;  %v2701_v8 = vperm.slane %v2699_v45, 0  ;;  %v2702_v22 = vperm.slane %v2699_v45, 1 }
 0x4d9   : > { %v2583_v59 = vadd.f32 %v2581_v0, %v2572_v38  ;;  %v2584_v23 = vadd.f32 %v2582_v10, %v2573_v1 }
 0x4da   : > { %v2902_v12 = vld.sshfl [vmem:[#allocation1 + $0x8] sm:$0xff pattern:$0x75316420]  ;;  %v2901_v16 = vld.sshfl [vmem:[#allocation1] sm:$0xff pattern:$0x75316420] }
 0x4db   : > { %2907 = vrot.lane.b32.xlu1 %v2902_v12, %s4570_s15  ;;  %2905 = vrot.lane.b32.xlu2 %v2901_v16, %s4570_s15  ;;  %2912 = vst [vmem:[#allocation1] ss:$2 sm:$0xff] %v5341_v11  ;;  %v2710_v16 = vld [vmem:[#allocation9 + $0x96] ss:$8 sm:$0x3] }
 0x4dd   : > { %v2591_v33 = vpop.permute.xlu0 %2590  ;;  %v2650_v52 = vpop.permute.xlu2 %2649 }
 0x4de   : > { %v2595_v28 = vsel %vm2594_vm5, %v2591_v33, %v2593_v40  ;;  %v2596_v9 = vsel %vm2594_vm5, %v2593_v40, %v2591_v33 }
 0x4df   : > { %v2615_v61 = vmul.f32 %v2611_v18, %v2595_v28  ;;  %v2616_v39 = vmul.f32 %v2612_v14, %v2596_v9  ;;  %v2712_v9 = vperm.slane %v2710_v16, 0 }
 0x4e1   : > { %v2617_v20 = vadd.f32 %v2615_v61, %v2583_v59  ;;  %v2618_v44 = vadd.f32 %v2616_v39, %v2584_v23  ;;  %v2713_v61 = vperm.slane %v2710_v16, 1 }
 0x4e2   : > { %v2914_v42 = vld.sshfl [vmem:[#allocation1 + $0x8] sm:$0xff pattern:$0x75316420]  ;;  %v2913_v63 = vld.sshfl [vmem:[#allocation1] sm:$0xff pattern:$0x75316420] }
 0x4e3   : > { %2919 = vrot.lane.b32.xlu2 %v2914_v42, %s4570_s15  ;;  %2917 = vrot.lane.b32.xlu0 %v2913_v63, %s4570_s15  ;;  %2945 = vst [vmem:[#allocation1] ss:$2 sm:$0xff] %v5338_v53  ;;  %v2744_v63 = vld [vmem:[#allocation9 + $0x36] ss:$8 sm:$0x3]  ;;  %s4581_s15 = smov 80  }
 0x4e5   : > { %v2605_v57 = vpop.permute.xlu0 %2604  ;;  %v2603_v19 = vpop.permute.xlu1 %2602 }
 0x4e6   : > { %v2606_v34 = vsel %vm2594_vm5, %v2603_v19, %v2605_v57  ;;  %v2607_v3 = vsel %vm2594_vm5, %v2605_v57, %v2603_v19  ;;  %vm3269_vm5 = vcmp.lt.s32.totalorder %v5458_v27, 83 }
 0x4e7   : > { %v2626_v56 = vmul.f32 %v2622_v60, %v2606_v34  ;;  %v2627_v50 = vmul.f32 %v2623_v49, %v2607_v3  ;;  %v2746_v34 = vperm.slane %v2744_v63, 0  ;;  %v2747_v3 = vperm.slane %v2744_v63, 1 }
 0x4e9   : > { %v2628_v35 = vadd.f32 %v2626_v56, %v2617_v20  ;;  %v2629_v17 = vadd.f32 %v2627_v50, %v2618_v44 }
 0x4ea   : > { %v2947_v43 = vld.sshfl [vmem:[#allocation1 + $0x8] sm:$0xff pattern:$0x75316420]  ;;  %v2946_v55 = vld.sshfl [vmem:[#allocation1] sm:$0xff pattern:$0x75316420] }
 0x4eb   : > { %2952 = vrot.lane.b32.xlu0 %v2947_v43, %s4571_s16  ;;  %2950 = vrot.lane.b32.xlu1 %v2946_v55, %s4571_s16  ;;  %2957 = vst [vmem:[#allocation1] ss:$2 sm:$0xff] %v5341_v11  ;;  %v2755_v55 = vld [vmem:[#allocation9 + $0x97] ss:$8 sm:$0x3] }
 0x4ed   : > { %v2638_v21 = vpop.permute.xlu1 %2637  ;;  %v2693_v28 = vpop.permute.xlu2 %2692 }
 0x4ee   : > { %v2640_v5 = vsel %vm2639_vm6, %v2636_v47, %v2638_v21  ;;  %v2641_v26 = vsel %vm2639_vm6, %v2638_v21, %v2636_v47 }
 0x4ef   : > { %v2660_v13 = vmul.f32 %v2656_v32, %v2640_v5  ;;  %v2661_v41 = vmul.f32 %v2657_v51, %v2641_v26  ;;  %v2757_v5 = vperm.slane %v2755_v55, 0  ;;  %v2758_v26 = vperm.slane %v2755_v55, 1 }
 0x4f1   : > { %v2662_v37 = vadd.f32 %v2660_v13, %v2628_v35  ;;  %v2663_v29 = vadd.f32 %v2661_v41, %v2629_v17 }
 0x4f2   : > { %v2959_v25 = vld.sshfl [vmem:[#allocation1 + $0x8] sm:$0xff pattern:$0x75316420]  ;;  %v2958_v15 = vld.sshfl [vmem:[#allocation1] sm:$0xff pattern:$0x75316420] }
 0x4f3   : > { %2964 = vrot.lane.b32.xlu1 %v2959_v25, %s4571_s16  ;;  %2962 = vrot.lane.b32.xlu2 %v2958_v15, %s4571_s16  ;;  %2990 = vst [vmem:[#allocation1] ss:$2 sm:$0xff] %v5338_v53  ;;  %v2789_v15 = vld [vmem:[#allocation9 + $0x37] ss:$8 sm:$0x3]  ;;  %s4582_s16 = smov 79  }
 0x4f5   : > { %v2648_v54 = vpop.permute.xlu0 %2647  ;;  %v2728_v56 = vpop.permute.xlu2 %2727 }
 0x4f6   : > { %v2651_v46 = vsel %vm2639_vm6, %v2648_v54, %v2650_v52  ;;  %v2652_v38 = vsel %vm2639_vm6, %v2650_v52, %v2648_v54  ;;  %vm3314_vm6 = vcmp.lt.s32.totalorder %v5458_v27, 82 }
 0x4f7   : > { %v2671_v1 = vmul.f32 %v2667_v31, %v2651_v46  ;;  %v2672_v36 = vmul.f32 %v2668_v30, %v2652_v38  ;;  %v2791_v38 = vperm.slane %v2789_v15, 0 }
 0x4f9   : > { %v2673_v48 = vadd.f32 %v2671_v1, %v2662_v37  ;;  %v2674_v7 = vadd.f32 %v2672_v36, %v2663_v29  ;;  %v2792_v1 = vperm.slane %v2789_v15, 1 }
 0x4fa   : > { %v2992_v58 = vld.sshfl [vmem:[#allocation1 + $0x8] sm:$0xff pattern:$0x75316420]  ;;  %v2991_v24 = vld.sshfl [vmem:[#allocation1] sm:$0xff pattern:$0x75316420] }
 0x4fb   : > { %2997 = vrot.lane.b32.xlu2 %v2992_v58, %s4572_s10  ;;  %2995 = vrot.lane.b32.xlu0 %v2991_v24, %s4572_s10  ;;  %3002 = vst [vmem:[#allocation1] ss:$2 sm:$0xff] %v5341_v11  ;;  %v2800_v24 = vld [vmem:[#allocation9 + $0xa0] ss:$8 sm:$0x3] }
 0x4fd   : > { %v2683_v0 = vpop.permute.xlu0 %2682  ;;  %v2681_v10 = vpop.permute.xlu1 %2680 }
 0x4fe   : > { %v2685_v4 = vsel %vm2684_vm7, %v2681_v10, %v2683_v0  ;;  %v2686_v59 = vsel %vm2684_vm7, %v2683_v0, %v2681_v10 }
 0x4ff   : > { %v2705_v23 = vmul.f32 %v2701_v8, %v2685_v4  ;;  %v2706_v12 = vmul.f32 %v2702_v22, %v2686_v59  ;;  %v2802_v4 = vperm.slane %v2800_v24, 0  ;;  %v2803_v59 = vperm.slane %v2800_v24, 1 }
 0x501   : > { %v2707_v18 = vadd.f32 %v2705_v23, %v2673_v48  ;;  %v2708_v14 = vadd.f32 %v2706_v12, %v2674_v7 }
 0x502   : > { %v3004_v40 = vld.sshfl [vmem:[#allocation1 + $0x8] sm:$0xff pattern:$0x75316420]  ;;  %v3003_v33 = vld.sshfl [vmem:[#allocation1] sm:$0xff pattern:$0x75316420] }
 0x503   : > { %3009 = vrot.lane.b32.xlu0 %v3004_v40, %s4572_s10  ;;  %3007 = vrot.lane.b32.xlu1 %v3003_v33, %s4572_s10  ;;  %3035 = vst [vmem:[#allocation1] ss:$2 sm:$0xff] %v5338_v53  ;;  %v2834_v33 = vld [vmem:[#allocation9 + $0x40] ss:$8 sm:$0x3]  ;;  %s4583_s10 = smov 78  }
 0x505   : > { %v2695_v39 = vpop.permute.xlu1 %2694  ;;  %v2771_v46 = vpop.permute.xlu2 %2770 }
 0x506   : > { %v2696_v2 = vsel %vm2684_vm7, %v2693_v28, %v2695_v39  ;;  %v2697_v20 = vsel %vm2684_vm7, %v2695_v39, %v2693_v28  ;;  %vm3359_vm7 = vcmp.lt.s32.totalorder %v5458_v27, 81 }
 0x507   : > { %v2716_v44 = vmul.f32 %v2712_v9, %v2696_v2  ;;  %v2717_v42 = vmul.f32 %v2713_v61, %v2697_v20  ;;  %v2836_v2 = vperm.slane %v2834_v33, 0  ;;  %v2837_v20 = vperm.slane %v2834_v33, 1 }
 0x509   : > { %v2718_v60 = vadd.f32 %v2716_v44, %v2707_v18  ;;  %v2719_v49 = vadd.f32 %v2717_v42, %v2708_v14 }
 0x50a   : > { %v3037_v57 = vld.sshfl [vmem:[#allocation1 + $0x8] sm:$0xff pattern:$0x75316420]  ;;  %v3036_v19 = vld.sshfl [vmem:[#allocation1] sm:$0xff pattern:$0x75316420] }
 0x50b   : > { %3042 = vrot.lane.b32.xlu1 %v3037_v57, %s4573_s17  ;;  %3040 = vrot.lane.b32.xlu2 %v3036_v19, %s4573_s17  ;;  %3047 = vst [vmem:[#allocation1] ss:$2 sm:$0xff] %v5341_v11  ;;  %v2845_v19 = vld [vmem:[#allocation9 + $0xa1] ss:$8 sm:$0x3] }
 0x50d   : > { %v2726_v50 = vpop.permute.xlu0 %2725  ;;  %v2785_v23 = vpop.permute.xlu2 %2784 }
 0x50e   : > { %v2730_v62 = vsel %vm2729_vm8, %v2726_v50, %v2728_v56  ;;  %v2731_v35 = vsel %vm2729_vm8, %v2728_v56, %v2726_v50 }
 0x50f   : > { %v2750_v17 = vmul.f32 %v2746_v34, %v2730_v62  ;;  %v2751_v43 = vmul.f32 %v2747_v3, %v2731_v35  ;;  %v2847_v35 = vperm.slane %v2845_v19, 0 }
 0x511   : > { %v2752_v47 = vadd.f32 %v2750_v17, %v2718_v60  ;;  %v2753_v32 = vadd.f32 %v2751_v43, %v2719_v49  ;;  %v2848_v17 = vperm.slane %v2845_v19, 1 }
 0x512   : > { %v3049_v51 = vld.sshfl [vmem:[#allocation1 + $0x8] sm:$0xff pattern:$0x75316420]  ;;  %v3048_v21 = vld.sshfl [vmem:[#allocation1] sm:$0xff pattern:$0x75316420] }
 0x513   : > { %3054 = vrot.lane.b32.xlu2 %v3049_v51, %s4573_s17  ;;  %3052 = vrot.lane.b32.xlu0 %v3048_v21, %s4573_s17  ;;  %3080 = vst [vmem:[#allocation1] ss:$2 sm:$0xff] %v5338_v53  ;;  %v2879_v21 = vld [vmem:[#allocation9 + $0x41] ss:$8 sm:$0x3]  ;;  %s6052_s17 = sld [smem:[#allocation11 + $0x1]] }
 0x515   : > { %v2740_v13 = vpop.permute.xlu0 %2739  ;;  %v2738_v41 = vpop.permute.xlu1 %2737 }
 0x516   : > { %v2741_v6 = vsel %vm2729_vm8, %v2738_v41, %v2740_v13  ;;  %v2742_v37 = vsel %vm2729_vm8, %v2740_v13, %v2738_v41  ;;  %vm3404_vm8 = vcmp.lt.s32.totalorder %v5458_v27, 80 }
 0x517   : > { %v2761_v29 = vmul.f32 %v2757_v5, %v2741_v6  ;;  %v2762_v25 = vmul.f32 %v2758_v26, %v2742_v37  ;;  %v2881_v6 = vperm.slane %v2879_v21, 0  ;;  %v2882_v37 = vperm.slane %v2879_v21, 1 }
 0x519   : > { %v2763_v31 = vadd.f32 %v2761_v29, %v2752_v47  ;;  %v2764_v30 = vadd.f32 %v2762_v25, %v2753_v32 }
 0x51a   : > { %v3082_v52 = vld.sshfl [vmem:[#allocation1 + $0x8] sm:$0xff pattern:$0x75316420]  ;;  %v3081_v54 = vld.sshfl [vmem:[#allocation1] sm:$0xff pattern:$0x75316420] }
 0x51b   : > { %3087 = vrot.lane.b32.xlu0 %v3082_v52, %s4574_s19  ;;  %3085 = vrot.lane.b32.xlu1 %v3081_v54, %s4574_s19  ;;  %3092 = vst [vmem:[#allocation1] ss:$2 sm:$0xff] %v5341_v11  ;;  %v2890_v54 = vld [vmem:[#allocation9 + $0xa2] ss:$8 sm:$0x3] }
 0x51d   : > { %v2773_v36 = vpop.permute.xlu1 %2772  ;;  %v2828_v62 = vpop.permute.xlu2 %2827 }
 0x51e   : > { %v2775_v45 = vsel %vm2774_vm9, %v2771_v46, %v2773_v36  ;;  %v2776_v48 = vsel %vm2774_vm9, %v2773_v36, %v2771_v46 }
 0x51f   : > { %v2795_v7 = vmul.f32 %v2791_v38, %v2775_v45  ;;  %v2796_v58 = vmul.f32 %v2792_v1, %v2776_v48  ;;  %v2892_v45 = vperm.slane %v2890_v54, 0  ;;  %v2893_v48 = vperm.slane %v2890_v54, 1 }
 0x521   : > { %v2797_v8 = vadd.f32 %v2795_v7, %v2763_v31  ;;  %v2798_v22 = vadd.f32 %v2796_v58, %v2764_v30 }
 0x522   : > { %v3094_v0 = vld.sshfl [vmem:[#allocation1 + $0x8] sm:$0xff pattern:$0x75316420]  ;;  %v3093_v10 = vld.sshfl [vmem:[#allocation1] sm:$0xff pattern:$0x75316420] }
 0x523   : > { %3099 = vrot.lane.b32.xlu1 %v3094_v0, %s4574_s19  ;;  %3097 = vrot.lane.b32.xlu2 %v3093_v10, %s4574_s19  ;;  %3125 = vst [vmem:[#allocation1] ss:$2 sm:$0xff] %v5338_v53  ;;  %v2924_v10 = vld [vmem:[#allocation9 + $0x42] ss:$8 sm:$0x3]  ;;  %s4584_s19 = smov 77  }
 0x525   : > { %v2783_v12 = vpop.permute.xlu0 %2782  ;;  %v2863_v29 = vpop.permute.xlu2 %2862 }
 0x526   : > { %v2786_v16 = vsel %vm2774_vm9, %v2783_v12, %v2785_v23  ;;  %v2787_v18 = vsel %vm2774_vm9, %v2785_v23, %v2783_v12  ;;  %vm3449_vm9 = vcmp.lt.s32.totalorder %v5458_v27, 79 }
 0x527   : > { %v2806_v14 = vmul.f32 %v2802_v4, %v2786_v16  ;;  %v2807_v40 = vmul.f32 %v2803_v59, %v2787_v18  ;;  %v2926_v18 = vperm.slane %v2924_v10, 0 }
 0x529   : > { %v2808_v28 = vadd.f32 %v2806_v14, %v2797_v8  ;;  %v2809_v9 = vadd.f32 %v2807_v40, %v2798_v22  ;;  %v2927_v14 = vperm.slane %v2924_v10, 1 }
 0x52a   : > { %v3127_v61 = vld.sshfl [vmem:[#allocation1 + $0x8] sm:$0xff pattern:$0x75316420]  ;;  %v3126_v39 = vld.sshfl [vmem:[#allocation1] sm:$0xff pattern:$0x75316420] }
 0x52b   : > { %3132 = vrot.lane.b32.xlu2 %v3127_v61, %s4575_s30  ;;  %3130 = vrot.lane.b32.xlu0 %v3126_v39, %s4575_s30  ;;  %3137 = vst [vmem:[#allocation1] ss:$2 sm:$0xff] %v5341_v11  ;;  %v2935_v39 = vld [vmem:[#allocation9 + $0xa3] ss:$8 sm:$0x3] }
 0x52d   : > { %v2818_v44 = vpop.permute.xlu0 %2817  ;;  %v2816_v42 = vpop.permute.xlu1 %2815 }
 0x52e   : > { %v2820_v63 = vsel %vm2819_vm10, %v2816_v42, %v2818_v44  ;;  %v2821_v60 = vsel %vm2819_vm10, %v2818_v44, %v2816_v42 }
 0x52f   : > { %v2840_v49 = vmul.f32 %v2836_v2, %v2820_v63  ;;  %v2841_v57 = vmul.f32 %v2837_v20, %v2821_v60  ;;  %v2937_v63 = vperm.slane %v2935_v39, 0  ;;  %v2938_v60 = vperm.slane %v2935_v39, 1 }
 0x531   : > { %v2842_v34 = vadd.f32 %v2840_v49, %v2808_v28  ;;  %v2843_v3 = vadd.f32 %v2841_v57, %v2809_v9 }
 0x532   : > { %v3139_v56 = vld.sshfl [vmem:[#allocation1 + $0x8] sm:$0xff pattern:$0x75316420]  ;;  %v3138_v50 = vld.sshfl [vmem:[#allocation1] sm:$0xff pattern:$0x75316420] }
 0x533   : > { %3144 = vrot.lane.b32.xlu0 %v3139_v56, %s4575_s30  ;;  %3142 = vrot.lane.b32.xlu1 %v3138_v50, %s4575_s30  ;;  %3170 = vst [vmem:[#allocation1] ss:$2 sm:$0xff] %v5338_v53  ;;  %v2969_v50 = vld [vmem:[#allocation9 + $0x43] ss:$8 sm:$0x3]  ;;  %s3619_s30 = ssub.f32 1.0, %s6052_s17 }
 0x535   : > { %v2830_v43 = vpop.permute.xlu1 %2829  ;;  %v2906_v16 = vpop.permute.xlu2 %2905 }
 0x536   : > { %v2831_v55 = vsel %vm2819_vm10, %v2828_v62, %v2830_v43  ;;  %v2832_v47 = vsel %vm2819_vm10, %v2830_v43, %v2828_v62  ;;  %vm3494_vm10 = vcmp.lt.s32.totalorder %v5458_v27, 78 }
 0x537   : > { %v2851_v32 = vmul.f32 %v2847_v35, %v2831_v55  ;;  %v2852_v51 = vmul.f32 %v2848_v17, %v2832_v47  ;;  %v2971_v55 = vperm.slane %v2969_v50, 0  ;;  %v2972_v47 = vperm.slane %v2969_v50, 1 }
 0x539   : > { %v2853_v5 = vadd.f32 %v2851_v32, %v2842_v34  ;;  %v2854_v26 = vadd.f32 %v2852_v51, %v2843_v3 }
 0x53a   : > { %v3172_v13 = vld.sshfl [vmem:[#allocation1 + $0x8] sm:$0xff pattern:$0x75316420]  ;;  %v3171_v41 = vld.sshfl [vmem:[#allocation1] sm:$0xff pattern:$0x75316420] }
 0x53b   : > { %3177 = vrot.lane.b32.xlu1 %v3172_v13, %s4576_s18  ;;  %3175 = vrot.lane.b32.xlu2 %v3171_v41, %s4576_s18  ;;  %3182 = vst [vmem:[#allocation1] ss:$2 sm:$0xff] %v5341_v11  ;;  %v2980_v41 = vld [vmem:[#allocation9 + $0xa4] ss:$8 sm:$0x3] }
 0x53d   : > { %v2861_v25 = vpop.permute.xlu0 %2860  ;;  %v2920_v49 = vpop.permute.xlu2 %2919 }
 0x53e   : > { %v2865_v15 = vsel %vm2864_vm11, %v2861_v25, %v2863_v29  ;;  %v2866_v31 = vsel %vm2864_vm11, %v2863_v29, %v2861_v25 }
 0x53f   : > { %v2885_v30 = vmul.f32 %v2881_v6, %v2865_v15  ;;  %v2886_v52 = vmul.f32 %v2882_v37, %v2866_v31  ;;  %v2982_v31 = vperm.slane %v2980_v41, 0 }
 0x541   : > { %v2887_v46 = vadd.f32 %v2885_v30, %v2853_v5  ;;  %v2888_v38 = vadd.f32 %v2886_v52, %v2854_v26  ;;  %v2983_v30 = vperm.slane %v2980_v41, 1 }
 0x542   : > { %v3184_v1 = vld.sshfl [vmem:[#allocation1 + $0x8] sm:$0xff pattern:$0x75316420]  ;;  %v3183_v36 = vld.sshfl [vmem:[#allocation1] sm:$0xff pattern:$0x75316420] }
 0x543   : > { %3189 = vrot.lane.b32.xlu2 %v3184_v1, %s4576_s18  ;;  %3187 = vrot.lane.b32.xlu0 %v3183_v36, %s4576_s18  ;;  %3215 = vst [vmem:[#allocation1] ss:$2 sm:$0xff] %v5338_v53  ;;  %v3014_v36 = vld [vmem:[#allocation9 + $0x44] ss:$8 sm:$0x3]  ;;  %s6281_s18 = scalar_lea.vmem [#allocation12], %s4030_s5 }
 0x544   : > { %s4158_s5 = sshll.u32 %s4647_s28, 8 }
 0x545   : > { %v2875_v7 = vpop.permute.xlu0 %2874  ;;  %v2873_v58 = vpop.permute.xlu1 %2872 }
 0x546   : > { %v2876_v24 = vsel %vm2864_vm11, %v2873_v58, %v2875_v7  ;;  %v2877_v8 = vsel %vm2864_vm11, %v2875_v7, %v2873_v58  ;;  %vm3539_vm11 = vcmp.lt.s32.totalorder %v5458_v27, 77 }
 0x547   : > { %v2896_v22 = vmul.f32 %v2892_v45, %v2876_v24  ;;  %v2897_v0 = vmul.f32 %v2893_v48, %v2877_v8  ;;  %v3016_v24 = vperm.slane %v3014_v36, 0  ;;  %v3017_v8 = vperm.slane %v3014_v36, 1 }
 0x549   : > { %v2898_v4 = vadd.f32 %v2896_v22, %v2887_v46  ;;  %v2899_v59 = vadd.f32 %v2897_v0, %v2888_v38 }
 0x54a   : > { %v3217_v23 = vld.sshfl [vmem:[#allocation1 + $0x8] sm:$0xff pattern:$0x75316420]  ;;  %v3216_v12 = vld.sshfl [vmem:[#allocation1] sm:$0xff pattern:$0x75316420] }
 0x54b   : > { %3222 = vrot.lane.b32.xlu0 %v3217_v23, %s4577_s20  ;;  %3220 = vrot.lane.b32.xlu1 %v3216_v12, %s4577_s20  ;;  %3227 = vst [vmem:[#allocation1] ss:$2 sm:$0xff] %v5341_v11  ;;  %v3025_v12 = vld [vmem:[#allocation9 + $0xa5] ss:$8 sm:$0x3] }
 0x54d   : > { %v2908_v40 = vpop.permute.xlu1 %2907  ;;  %v2963_v15 = vpop.permute.xlu2 %2962 }
 0x54e   : > { %v2910_v33 = vsel %vm2909_vm12, %v2906_v16, %v2908_v40  ;;  %v2911_v28 = vsel %vm2909_vm12, %v2908_v40, %v2906_v16 }
 0x54f   : > { %v2930_v9 = vmul.f32 %v2926_v18, %v2910_v33  ;;  %v2931_v61 = vmul.f32 %v2927_v14, %v2911_v28  ;;  %v3027_v33 = vperm.slane %v3025_v12, 0  ;;  %v3028_v28 = vperm.slane %v3025_v12, 1 }
 0x551   : > { %v2932_v2 = vadd.f32 %v2930_v9, %v2898_v4  ;;  %v2933_v20 = vadd.f32 %v2931_v61, %v2899_v59 }
 0x552   : > { %v3229_v44 = vld.sshfl [vmem:[#allocation1 + $0x8] sm:$0xff pattern:$0x75316420]  ;;  %v3228_v42 = vld.sshfl [vmem:[#allocation1] sm:$0xff pattern:$0x75316420] }
 0x553   : > { %3234 = vrot.lane.b32.xlu1 %v3229_v44, %s4577_s20  ;;  %3232 = vrot.lane.b32.xlu2 %v3228_v42, %s4577_s20  ;;  %3260 = vst [vmem:[#allocation1] ss:$2 sm:$0xff] %v5338_v53  ;;  %v3059_v42 = vld [vmem:[#allocation9 + $0x45] ss:$8 sm:$0x3] }
 0x555   : > { %v2918_v57 = vpop.permute.xlu0 %2917  ;;  %v2998_v22 = vpop.permute.xlu2 %2997 }
 0x556   : > { %v2921_v19 = vsel %vm2909_vm12, %v2918_v57, %v2920_v49  ;;  %v2922_v34 = vsel %vm2909_vm12, %v2920_v49, %v2918_v57 }
 0x557   : > { %v2941_v3 = vmul.f32 %v2937_v63, %v2921_v19  ;;  %v2942_v56 = vmul.f32 %v2938_v60, %v2922_v34  ;;  %v3061_v34 = vperm.slane %v3059_v42, 0 }
 0x559   : > { %v2943_v62 = vadd.f32 %v2941_v3, %v2932_v2  ;;  %v2944_v35 = vadd.f32 %v2942_v56, %v2933_v20  ;;  %v3062_v3 = vperm.slane %v3059_v42, 1 }
 0x55a   : > { %v3262_v17 = vld.sshfl [vmem:[#allocation1 + $0x8] sm:$0xff pattern:$0x75316420]  ;;  %v3261_v43 = vld.sshfl [vmem:[#allocation1] sm:$0xff pattern:$0x75316420] }
 0x55b   : > { %3267 = vrot.lane.b32.xlu2 %v3262_v17, %s4578_s22  ;;  %3265 = vrot.lane.b32.xlu0 %v3261_v43, %s4578_s22  ;;  %3272 = vst [vmem:[#allocation1] ss:$2 sm:$0xff] %v5341_v11  ;;  %v3070_v43 = vld [vmem:[#allocation9 + $0xa6] ss:$8 sm:$0x3] }
 0x55d   : > { %v2953_v32 = vpop.permute.xlu0 %2952  ;;  %v2951_v51 = vpop.permute.xlu1 %2950 }
 0x55e   : > { %v2955_v21 = vsel %vm2954_vm13, %v2951_v51, %v2953_v32  ;;  %v2956_v5 = vsel %vm2954_vm13, %v2953_v32, %v2951_v51 }
 0x55f   : > { %v2975_v26 = vmul.f32 %v2971_v55, %v2955_v21  ;;  %v2976_v13 = vmul.f32 %v2972_v47, %v2956_v5  ;;  %v3072_v21 = vperm.slane %v3070_v43, 0  ;;  %v3073_v5 = vperm.slane %v3070_v43, 1 }
 0x561   : > { %v2977_v6 = vadd.f32 %v2975_v26, %v2943_v62  ;;  %v2978_v37 = vadd.f32 %v2976_v13, %v2944_v35 }
 0x562   : > { %v3274_v29 = vld.sshfl [vmem:[#allocation1 + $0x8] sm:$0xff pattern:$0x75316420]  ;;  %v3273_v25 = vld.sshfl [vmem:[#allocation1] sm:$0xff pattern:$0x75316420] }
 0x563   : > { %3279 = vrot.lane.b32.xlu0 %v3274_v29, %s4578_s22  ;;  %3277 = vrot.lane.b32.xlu1 %v3273_v25, %s4578_s22  ;;  %3305 = vst [vmem:[#allocation1] ss:$2 sm:$0xff] %v5338_v53  ;;  %v3104_v25 = vld [vmem:[#allocation9 + $0x46] ss:$8 sm:$0x3]  ;;  %s3921_s22 = scalar_lea.hbm %s6433_s7, %s4158_s5 }
 0x565   : > { %v2965_v52 = vpop.permute.xlu1 %2964  ;;  %v3041_v19 = vpop.permute.xlu2 %3040 }
 0x566   : > { %v2966_v54 = vsel %vm2954_vm13, %v2963_v15, %v2965_v52  ;;  %v2967_v46 = vsel %vm2954_vm13, %v2965_v52, %v2963_v15 }
 0x567   : > { %v2986_v38 = vmul.f32 %v2982_v31, %v2966_v54  ;;  %v2987_v1 = vmul.f32 %v2983_v30, %v2967_v46  ;;  %v3106_v54 = vperm.slane %v3104_v25, 0  ;;  %v3107_v46 = vperm.slane %v3104_v25, 1 }
 0x569   : > { %v2988_v45 = vadd.f32 %v2986_v38, %v2977_v6  ;;  %v2989_v48 = vadd.f32 %v2987_v1, %v2978_v37 }
 0x56a   : > { %v3307_v7 = vld.sshfl [vmem:[#allocation1 + $0x8] sm:$0xff pattern:$0x75316420]  ;;  %v3306_v58 = vld.sshfl [vmem:[#allocation1] sm:$0xff pattern:$0x75316420] }
 0x56b   : > { %3312 = vrot.lane.b32.xlu1 %v3307_v7, %s4579_s23  ;;  %3310 = vrot.lane.b32.xlu2 %v3306_v58, %s4579_s23  ;;  %3317 = vst [vmem:[#allocation1] ss:$2 sm:$0xff] %v5341_v11  ;;  %v3115_v58 = vld [vmem:[#allocation9 + $0xa7] ss:$8 sm:$0x3] }
 0x56d   : > { %v2996_v0 = vpop.permute.xlu0 %2995  ;;  %v3055_v26 = vpop.permute.xlu2 %3054 }
 0x56e   : > { %v3000_v10 = vsel %vm2999_vm14, %v2996_v0, %v2998_v22  ;;  %v3001_v4 = vsel %vm2999_vm14, %v2998_v22, %v2996_v0 }
 0x56f   : > { %v3020_v59 = vmul.f32 %v3016_v24, %v3000_v10  ;;  %v3021_v23 = vmul.f32 %v3017_v8, %v3001_v4  ;;  %v3117_v4 = vperm.slane %v3115_v58, 0 }
 0x571   : > { %v3022_v16 = vadd.f32 %v3020_v59, %v2988_v45  ;;  %v3023_v18 = vadd.f32 %v3021_v23, %v2989_v48  ;;  %v3118_v59 = vperm.slane %v3115_v58, 1 }
 0x572   : > { %v3319_v14 = vld.sshfl [vmem:[#allocation1 + $0x8] sm:$0xff pattern:$0x75316420]  ;;  %v3318_v40 = vld.sshfl [vmem:[#allocation1] sm:$0xff pattern:$0x75316420] }
 0x573   : > { %3324 = vrot.lane.b32.xlu2 %v3319_v14, %s4579_s23  ;;  %3322 = vrot.lane.b32.xlu0 %v3318_v40, %s4579_s23  ;;  %3350 = vst [vmem:[#allocation1] ss:$2 sm:$0xff] %v5338_v53  ;;  %v3149_v40 = vld [vmem:[#allocation9 + $0x47] ss:$8 sm:$0x3]  ;;  %s3922_s23 = sshll.u32 %s6281_s18, 4  ;;  %s3923_s23 = int_to_ptr.vmem [resolvable:$true] %s3922_s23 }
 0x575   : > { %v3010_v9 = vpop.permute.xlu0 %3009  ;;  %v3008_v61 = vpop.permute.xlu1 %3007 }
 0x576   : > { %v3011_v39 = vsel %vm2999_vm14, %v3008_v61, %v3010_v9  ;;  %v3012_v2 = vsel %vm2999_vm14, %v3010_v9, %v3008_v61 }
 0x577   : > { %v3031_v20 = vmul.f32 %v3027_v33, %v3011_v39  ;;  %v3032_v44 = vmul.f32 %v3028_v28, %v3012_v2  ;;  %v3151_v39 = vperm.slane %v3149_v40, 0  ;;  %v3152_v2 = vperm.slane %v3149_v40, 1 }
 0x579   : > { %v3033_v63 = vadd.f32 %v3031_v20, %v3022_v16  ;;  %v3034_v60 = vadd.f32 %v3032_v44, %v3023_v18 }
 0x57a   : > { %v3352_v49 = vld.sshfl [vmem:[#allocation1 + $0x8] sm:$0xff pattern:$0x75316420]  ;;  %v3351_v57 = vld.sshfl [vmem:[#allocation1] sm:$0xff pattern:$0x75316420] }
 0x57b   : > { %3357 = vrot.lane.b32.xlu0 %v3352_v49, %s4580_s14  ;;  %3355 = vrot.lane.b32.xlu1 %v3351_v57, %s4580_s14  ;;  %3362 = vst [vmem:[#allocation1] ss:$2 sm:$0xff] %v5341_v11 }
 0x57d   : > { %v3043_v56 = vpop.permute.xlu1 %3042  ;;  %v3098_v10 = vpop.permute.xlu2 %3097 }
 0x57e   : > { %v3045_v50 = vsel %vm3044_vm15, %v3041_v19, %v3043_v56  ;;  %v3046_v62 = vsel %vm3044_vm15, %v3043_v56, %v3041_v19 }
 0x57f   : > { %v3065_v35 = vmul.f32 %v3061_v34, %v3045_v50  ;;  %v3066_v17 = vmul.f32 %v3062_v3, %v3046_v62 }
 0x581   : > { %v3067_v55 = vadd.f32 %v3065_v35, %v3033_v63  ;;  %v3068_v47 = vadd.f32 %v3066_v17, %v3034_v60 }
 0x582   : > { %v3364_v32 = vld.sshfl [vmem:[#allocation1 + $0x8] sm:$0xff pattern:$0x75316420]  ;;  %v3363_v51 = vld.sshfl [vmem:[#allocation1] sm:$0xff pattern:$0x75316420] }
 0x583   : > { %3369 = vrot.lane.b32.xlu1 %v3364_v32, %s4580_s14  ;;  %3367 = vrot.lane.b32.xlu2 %v3363_v51, %s4580_s14  ;;  %3395 = vst [vmem:[#allocation1] ss:$2 sm:$0xff] %v5338_v53  ;;  %s3924_s14 = sshll.u32 %s3921_s22, 4  ;;  %s3925_s14 = int_to_ptr.hbm [resolvable:$true] %s3924_s14 }
 0x585   : > { %v3053_v13 = vpop.permute.xlu0 %3052  ;;  %v3133_v20 = vpop.permute.xlu2 %3132 }
 0x586   : > { %v3056_v41 = vsel %vm3044_vm15, %v3053_v13, %v3055_v26  ;;  %v3057_v6 = vsel %vm3044_vm15, %v3055_v26, %v3053_v13  ;;  %v6504_v13 = vld [vmem:[#allocation27_spill] sm:$0xff] }
 0x587   : > { %v3076_v37 = vmul.f32 %v3072_v21, %v3056_v41  ;;  %v3077_v29 = vmul.f32 %v3073_v5, %v3057_v6  ;;  %v6505_v6 = vld [vmem:[#allocation22_spill] sm:$0xff] }
 0x589   : > { %v3078_v15 = vadd.f32 %v3076_v37, %v3067_v55  ;;  %v3079_v31 = vadd.f32 %v3077_v29, %v3068_v47  ;;  %v3620_v55 = vstv %s6052_s17  ;;  %v6502_v47 = vld [vmem:[#allocation17_spill] sm:$0xff] }
 0x58a   : > { %v3397_v30 = vld.sshfl [vmem:[#allocation1 + $0x8] sm:$0xff pattern:$0x75316420]  ;;  %v3396_v52 = vld.sshfl [vmem:[#allocation1] sm:$0xff pattern:$0x75316420]  ;;  %v3621_v32 = vmul.f32 %v3620_v55, %v6502_v47  ;;  %v3623_v41 = vmul.f32 %v3620_v55, %v6504_v13  ;;  %v3624_v37 = vmul.f32 %v3620_v55, %v6505_v6 }
 0x58b   : > { %3402 = vrot.lane.b32.xlu2 %v3397_v30, %s4581_s15  ;;  %3400 = vrot.lane.b32.xlu0 %v3396_v52, %s4581_s15  ;;  %3407 = vst [vmem:[#allocation1] ss:$2 sm:$0xff] %v5341_v11 }
 0x58d   : > { %v3088_v38 = vpop.permute.xlu0 %3087  ;;  %v3086_v1 = vpop.permute.xlu1 %3085 }
 0x58e   : > { %v3090_v36 = vsel %vm3089_vm0, %v3086_v1, %v3088_v38  ;;  %v3091_v45 = vsel %vm3089_vm0, %v3088_v38, %v3086_v1 }
 0x58f   : > { %v3110_v48 = vmul.f32 %v3106_v54, %v3090_v36  ;;  %v3111_v7 = vmul.f32 %v3107_v46, %v3091_v45  ;;  %v6508_v54 = vld [vmem:[#allocation25_spill] sm:$0xff] }
 0x590   : > { %v3694_v46 = vmul.f32 %v3620_v55, %v6508_v54  ;;  %v6509_v36 = vld [vmem:[#allocation21_spill] sm:$0xff] }
 0x591   : > { %v3112_v24 = vadd.f32 %v3110_v48, %v3078_v15  ;;  %v3113_v8 = vadd.f32 %v3111_v7, %v3079_v31  ;;  %v6507_v31 = vld [vmem:[#allocation20_spill] sm:$0xff]  ;;  %v3764_v45 = vmul.f32 %v3620_v55, %v6509_v36  ;;  %v6510_v48 = vld [vmem:[#allocation31_spill] sm:$0xff] }
 0x592   : > { %v3409_v22 = vld.sshfl [vmem:[#allocation1 + $0x8] sm:$0xff pattern:$0x75316420]  ;;  %v3408_v0 = vld.sshfl [vmem:[#allocation1] sm:$0xff pattern:$0x75316420]  ;;  %v3693_v30 = vmul.f32 %v3620_v55, %v6507_v31  ;;  %v3695_v7 = vmul.f32 %v3620_v55, %v6510_v48 }
 0x593   : > { %3414 = vrot.lane.b32.xlu0 %v3409_v22, %s4581_s15  ;;  %3412 = vrot.lane.b32.xlu1 %v3408_v0, %s4581_s15  ;;  %3440 = vst [vmem:[#allocation1] ss:$2 sm:$0xff] %v5338_v53  ;;  %v3239_v31 = vld [vmem:[#allocation9 + $0x51] ss:$8 sm:$0x3]  ;;  %s3909_s15 = scalar_lea.sflag [#allocation7], %s4728_s13 }
 0x595   : > { %v3100_v23 = vpop.permute.xlu1 %3099  ;;  %v6060_v29 = vpop.permute.xlu2 %3175 }
 0x596   : > { %v3101_v12 = vsel %vm3089_vm0, %v3098_v10, %v3100_v23  ;;  %v3102_v16 = vsel %vm3089_vm0, %v3100_v23, %v3098_v10  ;;  %v6512_v10 = vld [vmem:[#allocation29_spill] sm:$0xff] }
 0x597   : > { %v3121_v18 = vmul.f32 %v3117_v4, %v3101_v12  ;;  %v3122_v14 = vmul.f32 %v3118_v59, %v3102_v16  ;;  %v3766_v4 = vmul.f32 %v3620_v55, %v6512_v10  ;;  %v6513_v59 = vld [vmem:[#allocation32_spill] sm:$0xff] }
 0x598   : > { %v3767_v23 = vmul.f32 %v3620_v55, %v6513_v59  ;;  %v6514_v12 = vld [vmem:[#allocation24_spill] sm:$0xff] }
 0x599   : > { %v3123_v33 = vadd.f32 %v3121_v18, %v3112_v24  ;;  %v3124_v28 = vadd.f32 %v3122_v14, %v3113_v8  ;;  %v6511_v24 = vld [vmem:[#allocation23_spill] sm:$0xff]  ;;  %v3836_v16 = vmul.f32 %v3620_v55, %v6514_v12 }
 0x59a   : > { %v3442_v9 = vld.sshfl [vmem:[#allocation1 + $0x8] sm:$0xff pattern:$0x75316420]  ;;  %v3441_v61 = vld.sshfl [vmem:[#allocation1] sm:$0xff pattern:$0x75316420]  ;;  %v3765_v8 = vmul.f32 %v3620_v55, %v6511_v24 }
 0x59b   : > { %3447 = vrot.lane.b32.xlu1 %v3442_v9, %s4582_s16  ;;  %3445 = vrot.lane.b32.xlu2 %v3441_v61, %s4582_s16  ;;  %3452 = vst [vmem:[#allocation1] ss:$2 sm:$0xff] %v5341_v11  ;;  %v6516_v9 = vld [vmem:[#allocation30_spill] sm:$0xff]  ;;  %v3242_v24 = vperm.slane %v3239_v31, 1 }
 0x59c   : > { %v3838_v61 = vmul.f32 %v3620_v55, %v6516_v9 }
 0x59d   : > { %v3131_v44 = vpop.permute.xlu0 %3130  ;;  %v3190_v1 = vpop.permute.xlu2 %3189 }
 0x59e   : > { %v3135_v42 = vsel %vm3134_vm2, %v3131_v44, %v3133_v20  ;;  %v3136_v63 = vsel %vm3134_vm2, %v3133_v20, %v3131_v44 }
 0x59f   : > { %v3155_v60 = vmul.f32 %v3151_v39, %v3135_v42  ;;  %v3156_v49 = vmul.f32 %v3152_v2, %v3136_v63  ;;  %v6517_v39 = vld [vmem:[#allocation28_spill] sm:$0xff] }
 0x5a0   : > { %v3839_v2 = vmul.f32 %v3620_v55, %v6517_v39 }
 0x5a1   : > { %v6045_v57 = vadd.f32 %v3155_v60, %v3123_v33  ;;  %v6047_v19 = vadd.f32 %v3156_v49, %v3124_v28  ;;  %v6515_v33 = vld [vmem:[#allocation26_spill] sm:$0xff] }
 0x5a2   : > { %v3454_v34 = vld.sshfl [vmem:[#allocation1 + $0x8] sm:$0xff pattern:$0x75316420]  ;;  %v3453_v3 = vld.sshfl [vmem:[#allocation1] sm:$0xff pattern:$0x75316420]  ;;  %v3837_v28 = vmul.f32 %v3620_v55, %v6515_v33 }
 0x5a3   : > { %3459 = vrot.lane.b32.xlu2 %v3454_v34, %s4582_s16  ;;  %3457 = vrot.lane.b32.xlu0 %v3453_v3, %s4582_s16  ;;  %3485 = vst [vmem:[#allocation1] ss:$2 sm:$0xff] %v5338_v53  ;;  %v3295_v33 = vld [vmem:[#allocation9 + $0xb3] ss:$8 sm:$0x3]  ;;  %s4470_s16 = sshra.s32 %s3925_s14, 4  ;;  %s4471_s16 = int_to_ptr.hbm [resolvable:$true] %s4470_s16 }
 0x5a4   : > { %p4477_p11 = scmp.lt.s32.totalorder %s4471_s16, %s6433_s7 }
 0x5a5   : > { %v3143_v5 = vpop.permute.xlu1 %3142  ;;  %v3145_v25 = vpop.permute.xlu0 %3144 }
 0x5a6   : > { %v3147_v47 = vsel %vm3134_vm2, %v3145_v25, %v3143_v5 }
 0x5aa   : > { %v3487_v56 = vld.sshfl [vmem:[#allocation1 + $0x8] sm:$0xff pattern:$0x75316420]  ;;  %v3486_v50 = vld.sshfl [vmem:[#allocation1] sm:$0xff pattern:$0x75316420] }
 0x5ab   : > { %3492 = vrot.lane.b32.xlu0 %v3487_v56, %s4583_s10  ;;  %3490 = vrot.lane.b32.xlu1 %v3486_v50, %s4583_s10  ;;  %3497 = vst [vmem:[#allocation1] ss:$2 sm:$0xff] %v5341_v11  ;;  %v3160_v50 = vld [vmem:[#allocation9 + $0xb0] ss:$8 sm:$0x3] }
 0x5ad   : > { %v3178_v52 = vpop.permute.xlu1 %3177  ;;  %v6070_v22 = vpop.permute.xlu2 %3232 }
 0x5ae   : > { %v3180_v6 = vsel %vm3179_vm3, %v6060_v29, %v3178_v52 }
 0x5b2   : > { %v3499_v62 = vld.sshfl [vmem:[#allocation1 + $0x8] sm:$0xff pattern:$0x75316420]  ;;  %v3498_v35 = vld.sshfl [vmem:[#allocation1] sm:$0xff pattern:$0x75316420] }
 0x5b3   : > { %3504 = vrot.lane.b32.xlu1 %v3499_v62, %s4583_s10  ;;  %3502 = vrot.lane.b32.xlu2 %v3498_v35, %s4583_s10  ;;  %3530 = vst [vmem:[#allocation1] ss:$2 sm:$0xff] %v5338_v53  ;;  %v6503_v53 = vld [vmem:[#allocation19_spill] sm:$0xff]  ;;  %v3162_v35 = vperm.slane %v3160_v50, 0  ;;  %s4472_s10 = scalar_lea.hbm %s4471_s16, 256 }
 0x5b4   : > { %v3622_v26 = vmul.f32 %v3620_v55, %v6503_v53  ;;  %p4473_p1 = scmp.ne.s32.totalorder %s4471_s16, %s4472_s10 }
 0x5b5   : > { %v3188_v38 = vpop.permute.xlu0 %3187  ;;  %v6079_v40 = vpop.permute.xlu2 %3267 }
 0x5b6   : > { %p4474_p4 = pnand %p4473_p1, %p4698_p5 }
 0x5b8   : > { %p4475_p8 = pneg %p4474_p4 }
 0x5ba   : > { %v3532_v17 = vld.sshfl [vmem:[#allocation1 + $0x8] sm:$0xff pattern:$0x75316420]  ;;  %v3531_v43 = vld.sshfl [vmem:[#allocation1] sm:$0xff pattern:$0x75316420] }
 0x5bb   : > { %3537 = vrot.lane.b32.xlu2 %v3532_v17, %s4584_s19  ;;  %3535 = vrot.lane.b32.xlu0 %v3531_v43, %s4584_s19  ;;  %3542 = vst [vmem:[#allocation1] ss:$2 sm:$0xff] %v5341_v11  ;;  %v6506_v11 = vld [vmem:[#allocation18_spill] sm:$0xff]  ;;  %v3163_v17 = vperm.slane %v3160_v50, 1 }
 0x5bc   : > { %v3692_v15 = vmul.f32 %v3620_v55, %v6506_v11  ;;  %v3194_v43 = vld [vmem:[#allocation9 + $0x50] ss:$8 sm:$0x3]  ;;  %v3146_v55 = vsel %vm3134_vm2, %v3143_v5, %v3145_v25  ;;  %v3192_v5 = vsel %vm3179_vm3, %v3190_v1, %v3188_v38 }
 0x5bd   : > { %v6067_v58 = vpop.permute.xlu1 %3220  ;;  %v3223_v0 = vpop.permute.xlu0 %3222  ;;  %v3197_v53 = vperm.slane %v3194_v43, 1  ;;  %v3166_v13 = vmul.f32 %v3162_v35, %v3146_v55 }
 0x5c2   : > { %v3544_v51 = vld.sshfl [vmem:[#allocation1 + $0x8] sm:$0xff pattern:$0x75316420]  ;;  %v3543_v21 = vld.sshfl [vmem:[#allocation1] sm:$0xff pattern:$0x75316420] }
 0x5c3   : > { %3549 = vrot.lane.b32.xlu0 %v3544_v51, %s4584_s19  ;;  %3547 = vrot.lane.b32.xlu1 %v3543_v21, %s4584_s19  ;;  %v3205_v51 = vld [vmem:[#allocation9 + $0xb1] ss:$8 sm:$0x3]  ;;  %v3196_v21 = vperm.slane %v3194_v43, 0  ;;  %s4476_s19 = scalar_lea.hbm %s6433_s7, 512 }
 0x5c4   : > { %3628 = vperm.xlu2 %4281, %v3621_v32   ;;  %v3207_v11 = vperm.slane %v3205_v51, 0  ;;  %v3329_v43 = vld [vmem:[#allocation9 + $0x53] ss:$8 sm:$0x3]  ;;  %p4478_p9 = scmp.lt.s32.totalorder %s4476_s19, %s4472_s10 }
 0x5c5   : > { %v6075_v18 = vpop.permute.xlu1 %3234  ;;  %v6086_v44 = vpop.permute.xlu2 %3310  ;;  %v3200_v25 = vmul.f32 %v3196_v21, %v3180_v6 }
 0x5c6   : > { %p4479_p2 = por %p4478_p9, %p4477_p11 }
 0x5c8   : > { %p4480_p10 = pnand %p4479_p2, %p4475_p8 }
 0x5cb   : > { %3638 = vperm.xlu0 %4282, %v3623_v41   ;;  %3633 = vperm.xlu1 %4280, %v3622_v26   ;;  %v3167_v41 = vmul.f32 %v3163_v17, %v3147_v47  ;;  %v3298_v17 = vperm.slane %v3295_v33, 1 }
 0x5cc   : > { %3643 = vperm.xlu2 %4281, %v3624_v37   ;;  %v3181_v37 = vsel %vm3179_vm3, %v3178_v52, %v6060_v29  ;;  %v3225_v52 = vsel %vm3224_vm4, %v6067_v58, %v3223_v0 }
 0x5cd   : > { %v6077_v14 = vpop.permute.xlu0 %3265  ;;  %v6094_v49 = vpop.permute.xlu2 %3324  ;;  %v3201_v54 = vmul.f32 %v3197_v53, %v3181_v37  ;;  %v3169_v48 = vadd.f32 %v3167_v41, %v6047_v19  ;;  %v3236_v19 = vsel %vm3224_vm4, %v6070_v22, %v6075_v18  ;;  %v3331_v37 = vperm.slane %v3329_v43, 0 }
 0x5ce   : > { %v3270_v35 = vsel %vm3269_vm5, %v6077_v14, %v6079_v40 }
 0x5cf   : > { %v3203_v59 = vadd.f32 %v3201_v54, %v3169_v48 }
 0x5d3   : > { %3705 = vperm.xlu0 %4282, %v3693_v30   ;;  %3700 = vperm.xlu1 %4280, %v3692_v15   ;;  %v3208_v15 = vperm.slane %v3205_v51, 1  ;;  %v3191_v30 = vsel %vm3179_vm3, %v3188_v38, %v3190_v1  ;;  %v3226_v38 = vsel %vm3224_vm4, %v3223_v0, %v6067_v58 }
 0x5d4   : > { %3710 = vperm.xlu2 %4281, %v3694_v46   ;;  %v3250_v46 = vld [vmem:[#allocation9 + $0xb2] ss:$8 sm:$0x3] }
 0x5d5   : > { %v6084_v20 = vpop.permute.xlu1 %3277  ;;  %v6088_v42 = vpop.permute.xlu0 %3279  ;;  %v3212_v29 = vmul.f32 %v3208_v15, %v3192_v5  ;;  %v3252_v1 = vperm.slane %v3250_v46, 0  ;;  %v3253_v10 = vperm.slane %v3250_v46, 1  ;;  %v3385_v46 = vld [vmem:[#allocation9 + $0xb5] ss:$8 sm:$0x3] }
 0x5d6   : > { %v3281_v51 = vsel %vm3269_vm5, %v6084_v20, %v6088_v42  ;;  %v3282_v21 = vsel %vm3269_vm5, %v6088_v42, %v6084_v20  ;;  %v3374_v42 = vld [vmem:[#allocation9 + $0x54] ss:$8 sm:$0x3] }
 0x5d7   : > { %v3214_v9 = vadd.f32 %v3212_v29, %v3203_v59  ;;  %v3376_v29 = vperm.slane %v3374_v42, 0 }
 0x5db   : > { %3772 = vperm.xlu0 %4282, %v3764_v45   ;;  %3715 = vperm.xlu1 %4280, %v3695_v7   ;;  %v3168_v45 = vadd.f32 %v3166_v13, %v6045_v57  ;;  %v3241_v7 = vperm.slane %v3239_v31, 0  ;;  %v3302_v31 = vmul.f32 %v3298_v17, %v3282_v21 }
 0x5dc   : > { %3777 = vperm.xlu2 %4281, %v3765_v8   ;;  %v3211_v8 = vmul.f32 %v3207_v11, %v3191_v30  ;;  %v3332_v11 = vperm.slane %v3329_v43, 1 }
 0x5dd   : > { %v6090_v63 = vpop.permute.xlu1 %3312  ;;  %v6098_v3 = vpop.permute.xlu2 %3367  ;;  %v3202_v57 = vadd.f32 %v3200_v25, %v3168_v45  ;;  %v3245_v0 = vmul.f32 %v3241_v7, %v3225_v52  ;;  %v3377_v52 = vperm.slane %v3374_v42, 1 }
 0x5de   : > { %v3315_v30 = vsel %vm3314_vm6, %v6086_v44, %v6090_v63  ;;  %v3316_v20 = vsel %vm3314_vm6, %v6090_v63, %v6086_v44 }
 0x5e3   : > { %3787 = vperm.xlu0 %4282, %v3767_v23   ;;  %3782 = vperm.xlu1 %4280, %v3766_v4   ;;  %v3284_v4 = vld [vmem:[#allocation9 + $0x52] ss:$8 sm:$0x3]  ;;  %v3237_v23 = vsel %vm3224_vm4, %v6075_v18, %v6070_v22  ;;  %v3271_v22 = vsel %vm3269_vm5, %v6079_v40, %v6077_v14  ;;  %v3297_v18 = vperm.slane %v3295_v33, 0 }
 0x5e4   : > { %3844 = vperm.xlu2 %4281, %v3836_v16   ;;  %v3246_v16 = vmul.f32 %v3242_v24, %v3226_v38  ;;  %v3287_v39 = vperm.slane %v3284_v4, 1  ;;  %v3257_v50 = vmul.f32 %v3253_v10, %v3237_v23  ;;  %v3340_v14 = vld [vmem:[#allocation9 + $0xb4] ss:$8 sm:$0x3]  ;;  %v3335_v24 = vmul.f32 %v3331_v37, %v3315_v30 }
 0x5e5   : > { %v6092_v60 = vpop.permute.xlu0 %3322  ;;  %v6111_v26 = vpop.permute.xlu2 %3402  ;;  %v3301_v15 = vmul.f32 %v3297_v18, %v3281_v51  ;;  %v3342_v25 = vperm.slane %v3340_v14, 0  ;;  %v3343_v54 = vperm.slane %v3340_v14, 1  ;;  %v3419_v38 = vld [vmem:[#allocation9 + $0x55] ss:$8 sm:$0x3]  ;;  %v3388_v23 = vperm.slane %v3385_v46, 1 }
 0x5e6   : > { %v3248_v47 = vadd.f32 %v3246_v16, %v3214_v9  ;;  %v3291_v13 = vmul.f32 %v3287_v39, %v3271_v22  ;;  %v3326_v7 = vsel %vm3314_vm6, %v6092_v60, %v6094_v49  ;;  %v3327_v44 = vsel %vm3314_vm6, %v6094_v49, %v6092_v60  ;;  %v3430_v49 = vld [vmem:[#allocation9 + $0xb6] ss:$8 sm:$0x3] }
 0x5e7   : > { %v3346_v59 = vmul.f32 %v3342_v25, %v3326_v7  ;;  %v3421_v16 = vperm.slane %v3419_v38, 0  ;;  %v3422_v33 = vperm.slane %v3419_v38, 1  ;;  %v3433_v22 = vperm.slane %v3430_v49, 1  ;;  %v3520_v25 = vld [vmem:[#allocation9 + $0xc0] ss:$8 sm:$0x3] }
 0x5e8   : > { %v3259_v6 = vadd.f32 %v3257_v50, %v3248_v47  ;;  %v3475_v47 = vld [vmem:[#allocation9 + $0xb7] ss:$8 sm:$0x3] }
 0x5ea   : > { %v3293_v48 = vadd.f32 %v3291_v13, %v3259_v6 }
 0x5eb   : > { %3854 = vperm.xlu0 %4282, %v3838_v61   ;;  %3849 = vperm.xlu1 %4280, %v3837_v28   ;;  %v3213_v28 = vadd.f32 %v3211_v8, %v3202_v57  ;;  %v3286_v61 = vperm.slane %v3284_v4, 0  ;;  %v3336_v8 = vmul.f32 %v3332_v11, %v3316_v20  ;;  %v3387_v57 = vperm.slane %v3385_v46, 0 }
 0x5ec   : > { %3859 = vperm.xlu2 %4281, %v3839_v2   ;;  %v3256_v2 = vmul.f32 %v3252_v1, %v3236_v19  ;;  %v3304_v10 = vadd.f32 %v3302_v31, %v3293_v48  ;;  %v3347_v19 = vmul.f32 %v3343_v54, %v3327_v44  ;;  %v3477_v11 = vperm.slane %v3475_v47, 0 }
 0x5ed   : > { %v6096_v34 = vpop.permute.xlu1 %3355  ;;  %v6100_v56 = vpop.permute.xlu0 %3357  ;;  %v3247_v55 = vadd.f32 %v3245_v0, %v3213_v28  ;;  %v3290_v53 = vmul.f32 %v3286_v61, %v3270_v35  ;;  %v3432_v35 = vperm.slane %v3430_v49, 0 }
 0x5ee   : > { %v3360_v4 = vsel %vm3359_vm7, %v6096_v34, %v6100_v56  ;;  %v3361_v60 = vsel %vm3359_vm7, %v6100_v56, %v6096_v34  ;;  %v3338_v61 = vadd.f32 %v3336_v8, %v3304_v10  ;;  %v3464_v56 = vld [vmem:[#allocation9 + $0x56] ss:$8 sm:$0x3]  ;;  %v3523_v10 = vperm.slane %v3520_v25, 1 }
 0x5ef   : > { %v3258_v41 = vadd.f32 %v3256_v2, %v3247_v55  ;;  %v3380_v39 = vmul.f32 %v3376_v29, %v3360_v4  ;;  %v3381_v2 = vmul.f32 %v3377_v52, %v3361_v60  ;;  %v3554_v29 = vld [vmem:[#allocation9 + $0x60] ss:$8 sm:$0x3] }
 0x5f0   : > { %v3349_v17 = vadd.f32 %v3347_v19, %v3338_v61  ;;  %v3556_v60 = vperm.slane %v3554_v29, 0  ;;  %v3557_v49 = vperm.slane %v3554_v29, 1 }
 0x5f1   : > { %v3292_v45 = vadd.f32 %v3290_v53, %v3258_v41 }
 0x5f2   : > { %v3383_v6 = vadd.f32 %v3381_v2, %v3349_v17 }
 0x5f3   : > { %v3303_v1 = vadd.f32 %v3301_v15, %v3292_v45  ;;  %v3478_v15 = vperm.slane %v3475_v47, 1 }
 0x5f5   : > { %v6102_v62 = vpop.permute.xlu1 %3369  ;;  %v6135_v12 = vpop.permute.xlu2 %3445  ;;  %v3337_v9 = vadd.f32 %v3335_v24, %v3303_v1 }
 0x5f6   : > { %v3371_v0 = vsel %vm3359_vm7, %v6098_v3, %v6102_v62  ;;  %v3372_v34 = vsel %vm3359_vm7, %v6102_v62, %v6098_v3  ;;  %v3466_v62 = vperm.slane %v3464_v56, 0 }
 0x5f7   : > { %v3348_v18 = vadd.f32 %v3346_v59, %v3337_v9  ;;  %v3391_v43 = vmul.f32 %v3387_v57, %v3371_v0  ;;  %v3392_v51 = vmul.f32 %v3388_v23, %v3372_v34  ;;  %v3565_v9 = vld [vmem:[#allocation9 + $0xc1] ss:$8 sm:$0x3] }
 0x5f9   : > { %v3382_v13 = vadd.f32 %v3380_v39, %v3348_v18 }
 0x5fb   : > { %v3393_v31 = vadd.f32 %v3391_v43, %v3382_v13 }
 0x5fd   : > { %v6109_v32 = vpop.permute.xlu0 %3400  ;;  %v3460_v63 = vpop.permute.xlu2 %3459 }
 0x5fe   : > { %v3405_v50 = vsel %vm3404_vm8, %v6109_v32, %v6111_v26  ;;  %v3406_v55 = vsel %vm3404_vm8, %v6111_v26, %v6109_v32  ;;  %v3467_v32 = vperm.slane %v3464_v56, 1  ;;  %v3509_v26 = vld [vmem:[#allocation9 + $0x57] ss:$8 sm:$0x3] }
 0x5ff   : > { %v3425_v14 = vmul.f32 %v3421_v16, %v3405_v50  ;;  %v3426_v37 = vmul.f32 %v3422_v33, %v3406_v55  ;;  %v3511_v54 = vperm.slane %v3509_v26, 0  ;;  %v3512_v7 = vperm.slane %v3509_v26, 1 }
 0x601   : > { %v3427_v46 = vadd.f32 %v3425_v14, %v3393_v31 }
 0x605   : > { %v6116_v36 = vpop.permute.xlu1 %3412  ;;  %v6137_v58 = vpop.permute.xlu0 %3414 }
 0x606   : > { %v3416_v3 = vsel %vm3404_vm8, %v6116_v36, %v6137_v58  ;;  %v3417_v41 = vsel %vm3404_vm8, %v6137_v58, %v6116_v36  ;;  %v3394_v36 = vadd.f32 %v3392_v51, %v3383_v6 }
 0x607   : > { %v3436_v30 = vmul.f32 %v3432_v35, %v3416_v3  ;;  %v3437_v58 = vmul.f32 %v3433_v22, %v3417_v41  ;;  %v3567_v35 = vperm.slane %v3565_v9, 0  ;;  %v3568_v22 = vperm.slane %v3565_v9, 1 }
 0x608   : > { %v3428_v44 = vadd.f32 %v3426_v37, %v3394_v36 }
 0x609   : > { %v3438_v52 = vadd.f32 %v3436_v30, %v3427_v46 }
 0x60a   : > { %v3439_v4 = vadd.f32 %v3437_v58, %v3428_v44 }
 0x60d   : > { %v6156_v40 = vpop.permute.xlu1 %3447  ;;  %v3503_v21 = vpop.permute.xlu2 %3502 }
 0x60e   : > { %v3450_v20 = vsel %vm3449_vm9, %v6135_v12, %v6156_v40  ;;  %v3451_v42 = vsel %vm3449_vm9, %v6156_v40, %v6135_v12  ;;  %v3522_v12 = vperm.slane %v3520_v25, 0 }
 0x60f   : > { %v3470_v24 = vmul.f32 %v3466_v62, %v3450_v20  ;;  %v3471_v8 = vmul.f32 %v3467_v32, %v3451_v42 }
 0x611   : > { %v3472_v23 = vadd.f32 %v3470_v24, %v3438_v52  ;;  %v3473_v0 = vadd.f32 %v3471_v8, %v3439_v4 }
 0x615   : > { %v6166_v5 = vpop.permute.xlu0 %3457  ;;  %v3538_v16 = vpop.permute.xlu2 %3537 }
 0x616   : > { %v3461_v45 = vsel %vm3449_vm9, %v6166_v5, %v3460_v63  ;;  %v3462_v48 = vsel %vm3449_vm9, %v3460_v63, %v6166_v5 }
 0x617   : > { %v3481_v57 = vmul.f32 %v3477_v11, %v3461_v45  ;;  %v3482_v59 = vmul.f32 %v3478_v15, %v3462_v48 }
 0x619   : > { %v3483_v34 = vadd.f32 %v3481_v57, %v3472_v23  ;;  %v3484_v56 = vadd.f32 %v3482_v59, %v3473_v0 }
 0x61d   : > { %v3491_v28 = vpop.permute.xlu1 %3490  ;;  %v3493_v53 = vpop.permute.xlu0 %3492 }
 0x61e   : > { %v3495_v38 = vsel %vm3494_vm10, %v3491_v28, %v3493_v53  ;;  %v3496_v1 = vsel %vm3494_vm10, %v3493_v53, %v3491_v28  ;;  %v3629_v15 = vpop.permute.xlu2 %3628 }
 0x61f   : > { %v3515_v33 = vmul.f32 %v3511_v54, %v3495_v38  ;;  %v3516_v28 = vmul.f32 %v3512_v7, %v3496_v1 }
 0x621   : > { %v3517_v18 = vadd.f32 %v3515_v33, %v3483_v34  ;;  %v3518_v17 = vadd.f32 %v3516_v28, %v3484_v56  ;;  %v6255_v34 = vstv %s3619_s30 }
 0x625   : > { %v3505_v40 = vpop.permute.xlu1 %3504 }
 0x626   : > { %v3506_v63 = vsel %vm3494_vm10, %v3503_v21, %v3505_v40  ;;  %v3507_v19 = vsel %vm3494_vm10, %v3505_v40, %v3503_v21  ;;  %v3644_v25 = vpop.permute.xlu2 %3643 }
 0x627   : > { %v3526_v2 = vmul.f32 %v3522_v12, %v3506_v63  ;;  %v3527_v50 = vmul.f32 %v3523_v10, %v3507_v19 }
 0x629   : > { %v3528_v47 = vadd.f32 %v3526_v2, %v3517_v18  ;;  %v3529_v51 = vadd.f32 %v3527_v50, %v3518_v17  ;;  %v4120_v18 = vld [vmem:[%s4734_s11 + $0x98] sm:$0xff]  ;;  %v3668_v17 = vld [vmem:[%s4734_s11] sm:$0xff] }
 0x62d   : > { %v3536_v5 = vpop.permute.xlu0 %3535 }
 0x62e   : > { %v3540_v61 = vsel %vm3539_vm11, %v3536_v5, %v3538_v16  ;;  %v3541_v39 = vsel %vm3539_vm11, %v3538_v16, %v3536_v5  ;;  %v6243_v29 = vpop.permute.xlu2 %3710 }
 0x62f   : > { %v3560_v43 = vmul.f32 %v3556_v60, %v3540_v61  ;;  %v3561_v55 = vmul.f32 %v3557_v49, %v3541_v39 }
 0x631   : > { %v3562_v13 = vadd.f32 %v3560_v43, %v3528_v47  ;;  %v3563_v14 = vadd.f32 %v3561_v55, %v3529_v51 }
 0x635   : > { %v3550_v3 = vpop.permute.xlu0 %3549  ;;  %v3548_v62 = vpop.permute.xlu1 %3547 }
 0x636   : > { %v3551_v21 = vsel %vm3539_vm11, %v3548_v62, %v3550_v3  ;;  %v3552_v53 = vsel %vm3539_vm11, %v3550_v3, %v3548_v62  ;;  %v3778_v23 = vpop.permute.xlu2 %3777 }
 0x637   : > { %v3571_v41 = vmul.f32 %v3567_v35, %v3551_v21  ;;  %v3572_v32 = vmul.f32 %v3568_v22, %v3552_v53  ;;  %v4119_v22 = vld [vmem:[%s4734_s11 + $0x90] sm:$0xff]  ;;  %v3669_v53 = vld [vmem:[%s4734_s11 + $0x8] sm:$0xff] }
 0x639   : > { %v3573_v26 = vadd.f32 %v3571_v41, %v3562_v13  ;;  %v3574_v6 = vadd.f32 %v3572_v32, %v3563_v14  ;;  %v3672_v13 = vld [vmem:[%s4734_s11 + $0x20] sm:$0xff]  ;;  %v3673_v14 = vld [vmem:[%s4734_s11 + $0x28] sm:$0xff] }
 0x63b   : > { %v4099_v37 = vmul.f32 -1.442695, %v3573_v26  ;;  %v4100_v11 = vmul.f32 -1.442695, %v3574_v6 }
 0x63d   : > { %4347 = vpow2.f32 %v4099_v37  ;;  %v3639_v8 = vpop.permute.xlu0 %3638  ;;  %v3634_v1 = vpop.permute.xlu1 %3633 }
 0x63e   : > { %4349 = vpow2.f32 %v4100_v11 }
 0x643   : > { %v4348_v31 = vpop.eup %4347 }
 0x644   : > { %v4350_v30 = vpop.eup %4349  ;;  %v3581_v20 = vadd.f32 1.0, %v4348_v31 }
 0x645   : > { %v3582_v42 = vadd.f32 1.0, %v4350_v30  ;;  %v6246_v49 = vpop.permute.xlu0 %3705  ;;  %v6248_v0 = vpop.permute.xlu1 %3700 }
 0x646   : > { %4351 = vrcp.f32 %v3581_v20  ;;  %vm3588_vm14 = vweird.f32 %v3581_v20  ;;  %v3594_v40 = vand.u32 2147483648, %v3581_v20  ;;  %v3592_v52 = vand.u32 2147483647, %v3581_v20 }
 0x647   : > { %4353 = vrcp.f32 %v3582_v42  ;;  %v3609_v7 = vand.u32 2147483648, %v3582_v42  ;;  %v3607_v24 = vand.u32 2147483647, %v3582_v42  ;;  %vm3603_vm0 = vweird.f32 %v3582_v42 }
 0x648   : > { %v3595_v59 = vor.u32 1.1754944e-38, %v3594_v40  ;;  %vm3593_vm4 = vcmp.eq.f32.partialorder %v3592_v52, 8.507059e+37  ;;  %v3670_v40 = vld [vmem:[%s4734_s11 + $0x10] sm:$0xff] }
 0x649   : > { %v3610_v10 = vor.u32 1.1754944e-38, %v3609_v7  ;;  %vm3608_vm3 = vcmp.eq.f32.partialorder %v3607_v24, 8.507059e+37 }
 0x64c   : > { %v4352_v27 = vpop.eup %4351 }
 0x64d   : > { %v4354_v36 = vpop.eup %4353  ;;  %v3584_v58 = vmul.f32 %v4352_v27, %v3581_v20  ;;  %vm3589_vm12 = vweird.f32 %v4352_v27  ;;  %v6262_v3 = vpop.permute.xlu0 %3772 }
 0x64e   : > { %v3599_v54 = vmul.f32 %v4354_v36, %v3582_v42  ;;  %vm3604_vm13 = vweird.f32 %v4354_v36  ;;  %vm3590_vm15 = vmor %vm3588_vm14, %vm3589_vm12  ;;  %v6275_v30 = vpop.permute.xlu1 %3715 }
 0x64f   : > { %v3585_v46 = vsub.f32 1.0, %v3584_v58  ;;  %vm3605_vm2 = vmor %vm3603_vm0, %vm3604_vm13 }
 0x650   : > { %v3600_v45 = vsub.f32 1.0, %v3599_v54 }
 0x651   : > { %v3586_v48 = vmul.f32 %v4352_v27, %v3585_v46 }
 0x652   : > { %v3601_v44 = vmul.f32 %v4354_v36, %v3600_v45 }
 0x653   : > { %v3587_v12 = vadd.f32 %v4352_v27, %v3586_v48 }
 0x654   : > { %v3602_v38 = vadd.f32 %v4354_v36, %v3601_v44 }
 0x655   : > { %v3591_v4 = vsel %vm3590_vm15, %v4352_v27, %v3587_v12  ;;  %v3675_v27 = vld [vmem:[%s4734_s11 + $0x38] sm:$0xff] }
 0x656   : > { %v3606_v57 = vsel %vm3605_vm2, %v4354_v36, %v3602_v38  ;;  %v3596_v19 = vsel %vm3593_vm4, %v3595_v59, %v3591_v4 }
 0x657   : > { %v3611_v5 = vsel %vm3608_vm3, %v3610_v10, %v3606_v57  ;;  %v3671_v10 = vld [vmem:[%s4734_s11 + $0x18] sm:$0xff] }
 0x658   : > { %v3615_v63 = vrot.slane %v3611_v5, 4  ;;  %v4133_v5 = vld [vmem:[%s4734_s11 + $0xc0] sm:$0xff] }
 0x65a   : > { %v3616_v60 = vsel %vm407_vm1, %v3596_v19, %v3615_v63 }
 0x65b   : > { %3618 = vst [vmem:[#allocation4] sm:$0xff] %v3616_v60 }
 0x662   : > { %v3769_v16 = vld [vmem:[#allocation4 + $0x2] ss:$4 sm:$0x3]  ;;  %v3625_v33 = vld [vmem:[#allocation4] ss:$4 sm:$0x3] }
 0x663   : > { %v6251_v28 = vperm.slane %v3769_v16, 0  ;;  %v6253_v9 = vperm.slane %v3769_v16, 1  ;;  %v3647_v61 = vperm.slane %v3625_v33, 0  ;;  %v3648_v39 = vperm.slane %v3625_v33, 1  ;;  %v4134_v33 = vld [vmem:[%s4734_s11 + $0xc8] sm:$0xff] }
 0x664   : > { %v3841_v31 = vld [vmem:[#allocation4 + $0x3] ss:$4 sm:$0x3]  ;;  %v3697_v58 = vld [vmem:[#allocation4 + $0x1] ss:$4 sm:$0x3] }
 0x665   : > { %v3797_v56 = vmul.f32 %v6251_v28, %v3778_v23  ;;  %v3798_v2 = vmul.f32 %v6253_v9, %v3778_v23  ;;  %v3651_v50 = vmul.f32 %v3647_v61, %v3629_v15  ;;  %v3652_v35 = vmul.f32 %v3648_v39, %v3629_v15  ;;  %v3845_v15 = vpop.permute.xlu2 %3844 }
 0x666   : > { %v3655_v43 = vmul.f32 %v3647_v61, %v3639_v8  ;;  %v3656_v55 = vmul.f32 %v3648_v39, %v3639_v8  ;;  %v3657_v47 = vmul.f32 %v3647_v61, %v3644_v25  ;;  %v3658_v51 = vmul.f32 %v3648_v39, %v3644_v25  ;;  %v3674_v25 = vld [vmem:[%s4734_s11 + $0x30] sm:$0xff] }
 0x667   : > { %v3805_v62 = vadd.f32 %v3797_v56, %v6255_v34  ;;  %v3806_v21 = vadd.f32 %v3798_v2, %v6255_v34  ;;  %v3660_v41 = vadd.f32 %v6255_v34, %v3651_v50  ;;  %v3661_v32 = vadd.f32 %v6255_v34, %v3652_v35  ;;  %v4103_v2 = vld [vmem:[%s4734_s11 + $0x50] sm:$0xff]  ;;  %v3788_v35 = vpop.permute.xlu0 %3787 }
 0x668   : > { %v3664_v26 = vadd.f32 %v6255_v34, %v3655_v43  ;;  %v3665_v6 = vadd.f32 %v6255_v34, %v3656_v55  ;;  %v3666_v37 = vadd.f32 %v6255_v34, %v3657_v47  ;;  %v3667_v11 = vadd.f32 %v6255_v34, %v3658_v51  ;;  %v4105_v47 = vld [vmem:[%s4734_s11 + $0x60] sm:$0xff] }
 0x669   : > { %v3821_v20 = vmul.f32 %v4119_v22, %v3805_v62  ;;  %v3822_v42 = vmul.f32 %v4120_v18, %v3806_v21  ;;  %v3676_v36 = vmul.f32 %v3668_v17, %v3660_v41  ;;  %v3677_v54 = vmul.f32 %v3669_v53, %v3661_v32  ;;  %v4104_v22 = vld [vmem:[%s4734_s11 + $0x58] sm:$0xff]  ;;  %v3783_v53 = vpop.permute.xlu1 %3782 }
 0x66a   : > { %v3680_v46 = vmul.f32 %v3672_v13, %v3664_v26  ;;  %v3681_v45 = vmul.f32 %v3673_v14, %v3665_v6  ;;  %v3653_v48 = vmul.f32 %v3647_v61, %v3634_v1  ;;  %v3654_v7 = vmul.f32 %v3648_v39, %v3634_v1  ;;  %v4106_v13 = vld [vmem:[%s4734_s11 + $0x68] sm:$0xff]  ;;  %v4101_v6 = vld [vmem:[%s4734_s11 + $0x40] sm:$0xff] }
 0x66b   : > { %4127 = vst [vmem:[%s6281_s18 + $0x90] sm:$0xff] %v3821_v20  ;;  %v6284_v44 = vperm.slane %v3841_v31, 0  ;;  %v6286_v24 = vperm.slane %v3841_v31, 1  ;;  %v3682_v8 = vmul.f32 %v3674_v25, %v3666_v37  ;;  %v3683_v12 = vmul.f32 %v3675_v27, %v3667_v11  ;;  %v4102_v31 = vld [vmem:[%s4734_s11 + $0x48] sm:$0xff]  ;;  %v4139_v27 = vld [vmem:[%s4734_s11 + $0xf0] sm:$0xff] }
 0x66c   : > { %4128 = vst [vmem:[%s6281_s18 + $0x98] sm:$0xff] %v3822_v42  ;;  %v3719_v52 = vperm.slane %v3697_v58, 0  ;;  %v3720_v38 = vperm.slane %v3697_v58, 1  ;;  %v3662_v4 = vadd.f32 %v6255_v34, %v3653_v48  ;;  %v3663_v1 = vadd.f32 %v6255_v34, %v3654_v7  ;;  %v4117_v7 = vld [vmem:[%s4734_s11 + $0x80] sm:$0xff] }
 0x66d   : > { %3684 = vst [vmem:[%s6281_s18] sm:$0xff] %v3676_v36  ;;  %v3867_v57 = vmul.f32 %v6284_v44, %v3845_v15  ;;  %v3868_v59 = vmul.f32 %v6286_v24, %v3845_v15  ;;  %v3860_v62 = vpop.permute.xlu2 %3859  ;;  %v3795_v21 = vmul.f32 %v6251_v28, %v6262_v3  ;;  %v3796_v11 = vmul.f32 %v6253_v9, %v6262_v3 }
 0x66e   : > { %3685 = vst [vmem:[%s6281_s18 + $0x8] sm:$0xff] %v3677_v54  ;;  %v3725_v63 = vmul.f32 %v3719_v52, %v6246_v49  ;;  %v3726_v19 = vmul.f32 %v3720_v38, %v6246_v49  ;;  %v3727_v60 = vmul.f32 %v3719_v52, %v6243_v29  ;;  %v3728_v23 = vmul.f32 %v3720_v38, %v6243_v29  ;;  %v4140_v54 = vld [vmem:[%s4734_s11 + $0xf8] sm:$0xff] }
 0x66f   : > { %3688 = vst [vmem:[%s6281_s18 + $0x20] sm:$0xff] %v3680_v46  ;;  %v3678_v16 = vmul.f32 %v3670_v40, %v3662_v4  ;;  %v3875_v61 = vadd.f32 %v3867_v57, %v6255_v34  ;;  %v3876_v39 = vadd.f32 %v3868_v59, %v6255_v34  ;;  %v3679_v56 = vmul.f32 %v3671_v10, %v3663_v1  ;;  %v4118_v40 = vld [vmem:[%s4734_s11 + $0x88] sm:$0xff]  ;;  %v4107_v4 = vld [vmem:[%s4734_s11 + $0x70] sm:$0xff]  ;;  %v3855_v59 = vpop.permute.xlu0 %3854 }
 0x670   : > { %3689 = vst [vmem:[%s6281_s18 + $0x28] sm:$0xff] %v3681_v45  ;;  %v3733_v50 = vadd.f32 %v3725_v63, %v6255_v34  ;;  %v3734_v49 = vadd.f32 %v3726_v19, %v6255_v34  ;;  %v3735_v18 = vadd.f32 %v3727_v60, %v6255_v34  ;;  %v3723_v17 = vmul.f32 %v3719_v52, %v6248_v0  ;;  %v4108_v63 = vld [vmem:[%s4734_s11 + $0x78] sm:$0xff] }
 0x671   : > { %3690 = vst [vmem:[%s6281_s18 + $0x30] sm:$0xff] %v3682_v8  ;;  %v3891_v29 = vmul.f32 %v4133_v5, %v3875_v61  ;;  %v3724_v43 = vmul.f32 %v3720_v38, %v6248_v0  ;;  %v3892_v55 = vmul.f32 %v4134_v33, %v3876_v39  ;;  %v3736_v51 = vadd.f32 %v3728_v23, %v6255_v34  ;;  %v4123_v23 = vld [vmem:[%s4734_s11 + $0xb0] sm:$0xff]  ;;  %v4124_v39 = vld [vmem:[%s4734_s11 + $0xb8] sm:$0xff] }
 0x672   : > { %3691 = vst [vmem:[%s6281_s18 + $0x38] sm:$0xff] %v3683_v12  ;;  %v3749_v14 = vmul.f32 %v4103_v2, %v3733_v50  ;;  %v3731_v0 = vadd.f32 %v3723_v17, %v6255_v34  ;;  %v3873_v41 = vmul.f32 %v6284_v44, %v3860_v62  ;;  %v3874_v32 = vmul.f32 %v6286_v24, %v3860_v62 }
 0x673   : > { %3686 = vst [vmem:[%s6281_s18 + $0x10] sm:$0xff] %v3678_v16  ;;  %v3750_v26 = vmul.f32 %v4104_v22, %v3734_v49  ;;  %v3732_v37 = vadd.f32 %v3724_v43, %v6255_v34  ;;  %v3751_v15 = vmul.f32 %v4105_v47, %v3735_v18  ;;  %v3729_v42 = vmul.f32 %v3719_v52, %v6275_v30  ;;  %v4121_v49 = vld [vmem:[%s4734_s11 + $0xa0] sm:$0xff]  ;;  %v4122_v18 = vld [vmem:[%s4734_s11 + $0xa8] sm:$0xff] }
 0x674   : > { %3687 = vst [vmem:[%s6281_s18 + $0x18] sm:$0xff] %v3679_v56  ;;  %v3881_v20 = vadd.f32 %v3873_v41, %v6255_v34  ;;  %v3752_v25 = vmul.f32 %v4106_v13, %v3736_v51  ;;  %v3882_v36 = vadd.f32 %v3874_v32, %v6255_v34  ;;  %v3730_v58 = vmul.f32 %v3720_v38, %v6275_v30  ;;  %v4137_v43 = vld [vmem:[%s4734_s11 + $0xe0] sm:$0xff] }
 0x675   : > { %4141 = vst [vmem:[%s6281_s18 + $0xc0] sm:$0xff] %v3891_v29  ;;  %v3747_v3 = vmul.f32 %v4101_v6, %v3731_v0  ;;  %v3803_v46 = vadd.f32 %v3795_v21, %v6255_v34  ;;  %v3801_v45 = vmul.f32 %v6251_v28, %v3788_v35  ;;  %v3748_v48 = vmul.f32 %v4102_v31, %v3732_v37  ;;  %v4135_v21 = vld [vmem:[%s4734_s11 + $0xd0] sm:$0xff] }
 0x676   : > { %4142 = vst [vmem:[%s6281_s18 + $0xc8] sm:$0xff] %v3892_v55  ;;  %v3804_v8 = vadd.f32 %v3796_v11, %v6255_v34  ;;  %v3802_v12 = vmul.f32 %v6253_v9, %v3788_v35  ;;  %v3897_v30 = vmul.f32 %v4139_v27, %v3881_v20  ;;  %v3737_v52 = vadd.f32 %v3729_v42, %v6255_v34 }
 0x677   : > { %4111 = vst [vmem:[%s6281_s18 + $0x50] sm:$0xff] %v3749_v14  ;;  %v3799_v38 = vmul.f32 %v6251_v28, %v3783_v53  ;;  %v3898_v10 = vmul.f32 %v4140_v54, %v3882_v36  ;;  %v3738_v1 = vadd.f32 %v3730_v58, %v6255_v34  ;;  %v3800_v57 = vmul.f32 %v6253_v9, %v3783_v53  ;;  %v3850_v9 = vpop.permute.xlu1 %3849  ;;  %v4136_v14 = vld [vmem:[%s4734_s11 + $0xd8] sm:$0xff] }
 0x678   : > { %4112 = vst [vmem:[%s6281_s18 + $0x58] sm:$0xff] %v3750_v26  ;;  %v3819_v5 = vmul.f32 %v4117_v7, %v3803_v46  ;;  %v3809_v19 = vadd.f32 %v3801_v45, %v6255_v34  ;;  %v3871_v60 = vmul.f32 %v6284_v44, %v3855_v59  ;;  %v3820_v28 = vmul.f32 %v4118_v40, %v3804_v8 }
 0x679   : > { %4113 = vst [vmem:[%s6281_s18 + $0x60] sm:$0xff] %v3751_v15  ;;  %v3810_v16 = vadd.f32 %v3802_v12, %v6255_v34  ;;  %v3872_v33 = vmul.f32 %v6286_v24, %v3855_v59  ;;  %v3753_v61 = vmul.f32 %v4107_v4, %v3737_v52  ;;  %v3807_v56 = vadd.f32 %v3799_v38, %v6255_v34 }
 0x67a   : > { %4114 = vst [vmem:[%s6281_s18 + $0x68] sm:$0xff] %v3752_v25  ;;  %v3869_v2 = vmul.f32 %v6284_v44, %v3850_v9  ;;  %v3754_v50 = vmul.f32 %v4108_v63, %v3738_v1  ;;  %v3808_v35 = vadd.f32 %v3800_v57, %v6255_v34  ;;  %v3870_v29 = vmul.f32 %v6286_v24, %v3850_v9  ;;  %v4138_v24 = vld [vmem:[%s4734_s11 + $0xe8] sm:$0xff] }
 0x67b   : > { %4109 = vst [vmem:[%s6281_s18 + $0x40] sm:$0xff] %v3747_v3  ;;  %v3825_v22 = vmul.f32 %v4123_v23, %v3809_v19  ;;  %v3879_v17 = vadd.f32 %v3871_v60, %v6255_v34  ;;  %v3826_v44 = vmul.f32 %v4124_v39, %v3810_v16  ;;  %v3880_v55 = vadd.f32 %v3872_v33, %v6255_v34 }
 0x67c   : > { %4110 = vst [vmem:[%s6281_s18 + $0x48] sm:$0xff] %v3748_v48  ;;  %v3823_v47 = vmul.f32 %v4121_v49, %v3807_v56  ;;  %v3877_v51 = vadd.f32 %v3869_v2, %v6255_v34  ;;  %v3824_v62 = vmul.f32 %v4122_v18, %v3808_v35  ;;  %v3878_v53 = vadd.f32 %v3870_v29, %v6255_v34 }
 0x67d   : > { %4147 = vst [vmem:[%s6281_s18 + $0xf0] sm:$0xff] %v3897_v30  ;;  %v3895_v13 = vmul.f32 %v4137_v43, %v3879_v17  ;;  %v3896_v0 = vmul.f32 %v4138_v24, %v3880_v55 }
 0x67e   : > { %4148 = vst [vmem:[%s6281_s18 + $0xf8] sm:$0xff] %v3898_v10  ;;  %v3893_v41 = vmul.f32 %v4135_v21, %v3877_v51  ;;  %v3894_v32 = vmul.f32 %v4136_v14, %v3878_v53 }
 0x67f   : > { %4125 = vst [vmem:[%s6281_s18 + $0x80] sm:$0xff] %v3819_v5 }
 0x680   : > { %4126 = vst [vmem:[%s6281_s18 + $0x88] sm:$0xff] %v3820_v28 }
 0x681   : > { %4115 = vst [vmem:[%s6281_s18 + $0x70] sm:$0xff] %v3753_v61 }
 0x682   : > { %4116 = vst [vmem:[%s6281_s18 + $0x78] sm:$0xff] %v3754_v50 }
 0x683   : > { %4131 = vst [vmem:[%s6281_s18 + $0xb0] sm:$0xff] %v3825_v22 }
 0x684   : > { %4132 = vst [vmem:[%s6281_s18 + $0xb8] sm:$0xff] %v3826_v44 }
 0x685   : > { %4129 = vst [vmem:[%s6281_s18 + $0xa0] sm:$0xff] %v3823_v47 }
 0x686   : > { %4130 = vst [vmem:[%s6281_s18 + $0xa8] sm:$0xff] %v3824_v62 }
 0x687   : > { %4145 = vst [vmem:[%s6281_s18 + $0xe0] sm:$0xff] %v3895_v13 }
 0x688   : > { %4146 = vst [vmem:[%s6281_s18 + $0xe8] sm:$0xff] %v3896_v0 }
 0x689   : > { %4143 = vst [vmem:[%s6281_s18 + $0xd0] sm:$0xff] %v3893_v41 }
 0x68a   : > { %4144 = vst [vmem:[%s6281_s18 + $0xd8] sm:$0xff] %v3894_v32 }
 0x68b   : > { %4483 = shalt.err (!%p4480_p10)
}
 0x68c   : > { %s4585_s13 = smov 256  }
 0x68d   : > { %4171 = dma.vmem_to_hbm [thread:$0]  (%p4698_p5), %s3923_s23, 4096, %s3925_s14, %s3909_s15, %s4585_s13, %s4585_s13, %s4554_s12  }
 0x68e PF: > { %s3939_s18 = sand.u32 1, %s4518_s24   ;;  %p6518_p12 = scmp.ge.s32.totalorder %s4530_s27, 2 }
 0x68f   : > { %s3940_s28 = scalar_lea.sflag [#allocation7], %s3939_s18 }
 0x690   : > { %p4185_p13 = pnand %p6518_p12, %p4661_p6 }
 0x692   : > { %p4186_p0 = pneg %p4185_p13 }
 0x694   : > { %4513 = dma.done.wait (%p4186_p0), %s3940_s28, 4096  }
 0x695   : > { %4515 = vsyncadd (%p4186_p0), %s3940_s28, 4294963200  ;;  %p22_p3 = scmp.ge.s32.totalorder %s4685_s21, 4   ;;  %s6519_s24 = smov %s4522_s25 }
 0x696   : > { %s6520_s25 = smov %s4526_s26  ;;  %s6521_s26 = smov %s4694_s29 }
 0x697   : > { %s6522_s27 = smov %s4685_s21  ;;  %24 = sbr.rel (!%p22_p3) target bundleno = 9 (0x9), region = 214 }
 0x69c   :  { %3946 = vsyncpa [#allocation6], 1 }
 0x69d   :  { %3948 = vsyncpa [#allocation6 + $0x1], 1 }
 0x69e   :  { %3949 = vsyncpa [#allocation10], 1 }
 0x69f   :  { %3950 = vsyncpa [#allocation7], 1 }
 0x6a0   :  { %3952 = vsyncpa [#allocation7 + $0x1], 1 }
 0x6a1   :  { %3953 = vsyncpa [#allocation8], 1 }
 0x6a2   :  { %3955 = vsyncpa [#allocation8 + $0x1], 1 }

</bundles_post_ra>
